<compile_context>
chip_gen: v7x
topology: tpu7x:2x2x1
jax: 0.10.0
libtpu: 0.0.40
codegen_flags: <defaults>
</compile_context>

<pallas_src>
import numpy as np

import jax
import jax.numpy as jnp
from jax import lax
from jax.experimental import pallas as pl
from jax.experimental.pallas import tpu as pltpu


# --------------------------- model configuration ---------------------------
KERNEL, STRIDE, PAD = 3, 1, 1
NC = 4
HID1 = HID2 = HID3 = HID4 = 8
HID5 = 4
IMG_H = IMG_W = 16
HW = IMG_H * IMG_W                 # 256
N_BATCH = 2
NHW = N_BATCH * HW                 # 512  (lane-dense activation width)
FC1 = HID5 * HW                    # 1024 (= hidden5 * side * side, required by decode())
FC2 = 32
BN_EPS = 1e-5
LRELU_SLOPE = 0.2
C_PAD = 8                          # conv-input channels padded to 8 sublanes

# TODO(synk): only the kernel=3 / stride=1 / padding=1 instantiation is
# implemented (spatial size preserved); stride>1 transposed conv (input
# dilation) is not needed for this configuration.
assert (KERNEL, STRIDE, PAD) == (3, 1, 1)

# 3x3 taps in (dy*3+dx) order: (dy, dx, flat lane offset in (C, N*H*W) layout)
_TAPS = tuple((dy, dx, (dy - 1) * IMG_W + (dx - 1))
              for dy in range(KERNEL) for dx in range(KERNEL))


# ------------------------- static (trace-time) tables ------------------------

def _build_masks():
    """(9, NHW) f32 masks zeroing lanes whose 3x3 tap falls into the zero
    padding (or would leak across rows / samples after the lane roll).
    Fully static given IMG_H / IMG_W / NHW, so built with numpy once."""
    li = np.arange(NHW)
    hh = (li // IMG_W) % IMG_H
    ww = li % IMG_W
    m = np.zeros((KERNEL * KERNEL, NHW), np.float32)
    for idx, (dy, dx, _) in enumerate(_TAPS):
        sy = hh + (dy - 1)
        sx = ww + (dx - 1)
        m[idx] = ((sy >= 0) & (sy < IMG_H) & (sx >= 0) & (sx < IMG_W)).astype(np.float32)
    return m


# ----------------------------- in-kernel helpers ----------------------------

def _conv3x3(x_pad, w_ref, masks):
    """3x3 / stride 1 / pad 1 conv on channel-major activations as ONE matmul.

    x_pad : (Cpad, NHW) f32 value (input channels zero-padded to Cpad).
    w_ref : (Cout, 9*Cpad) bf16 ref, stacked tap-major:
            w_ref[o, tap*Cpad + i] = w[o, i, dy, dx], tap = dy*3+dx.
    masks : list of 9 (1, NHW) f32 boundary masks.

    8 lane rolls (XLU) + masks (VPU) build a stacked (9*Cpad, NHW) operand;
    a single MXU matmul (K = 9*Cpad) produces the output.  No accumulator,
    no per-tap dots, no im2col, no HBM traffic between layers."""
    parts = []
    for idx, (_, _, off) in enumerate(_TAPS):
        shift = (-off) % NHW                       # roll: out[m] = x[m - shift]
        xs = x_pad if shift == 0 else pltpu.roll(x_pad, shift=shift, axis=1)
        parts.append(xs * masks[idx])
    stacked = jnp.concatenate(parts, axis=0).astype(jnp.bfloat16)   # (9*Cpad, NHW)
    return jnp.dot(w_ref[...], stacked, preferred_element_type=jnp.float32)


def _bn_lrelu(x, g_ref, b_ref):
    """Training-mode BatchNorm2d (per-batch biased stats over the N*HW lanes,
    eps=1e-5) with single-pass statistics, fused with LeakyReLU(0.2)."""
    inv_n = 1.0 / x.shape[1]
    mean = jnp.sum(x, axis=1, keepdims=True) * inv_n
    ex2 = jnp.sum(x * x, axis=1, keepdims=True) * inv_n
    var = ex2 - mean * mean
    y = (x - mean) * lax.rsqrt(var + BN_EPS)
    y = y * g_ref[...] + b_ref[...]
    return jnp.where(y > 0, y, LRELU_SLOPE * y)


def _lrelu(x):
    return jnp.where(x > 0, x, LRELU_SLOPE * x)


def _pad_rows(x, c_pad):
    c = x.shape[0]
    if c == c_pad:
        return x
    return jnp.concatenate([x, jnp.zeros((c_pad - c, x.shape[1]), x.dtype)], axis=0)


def _rows_to_cm(x_rows, n_ch):
    """(N, C*HW) sample-major (PyTorch .view order) -> (C, N*HW) channel-major.
    Static, 256-lane-aligned slice copies (n_ch * N_BATCH of them)."""
    rows = []
    for c in range(n_ch):
        rows.append(jnp.concatenate(
            [x_rows[b:b + 1, c * HW:(c + 1) * HW] for b in range(N_BATCH)], axis=1))
    return jnp.concatenate(rows, axis=0)


def _cm_to_rows(x_cm, n_ch):
    """(C, N*HW) channel-major -> (N, C*HW) sample-major (PyTorch .view order)."""
    rows = []
    for b in range(N_BATCH):
        rows.append(jnp.concatenate(
            [x_cm[c:c + 1, b * HW:(b + 1) * HW] for c in range(n_ch)], axis=1))
    return jnp.concatenate(rows, axis=0)


# --------------------------------- the kernel --------------------------------

def _vae_kernel(x_ref, masks_ref,
                we1, we2, we3, we4, we5,
                eg2, eb2, eg3, eb3, eg4, eb4, eg5, eb5,
                wfc, bfc, eps_ref, wd1, bd1,
                dw1, dw2, dw3, dw4, dw5,
                dg1, db1, dg2, db2, dg3, db3, dg4, db4,
                res_ref, mu_ref, lv_ref, z_ref):
    m = masks_ref[...]
    masks = [m[i:i + 1, :] for i in range(KERNEL * KERNEL)]

    # ---- NCHW-flat input (N, NC*HW) -> zero-padded channel-major (8, N*HW) ----
    x_cm = _pad_rows(_rows_to_cm(x_ref[...], NC), C_PAD)

    # -------------------------------- encoder --------------------------------
    h = _lrelu(_conv3x3(x_cm, we1, masks))
    h = _bn_lrelu(_conv3x3(h, we2, masks), eg2, eb2)
    h = _bn_lrelu(_conv3x3(h, we3, masks), eg3, eb3)
    h = _bn_lrelu(_conv3x3(h, we4, masks), eg4, eb4)
    h = _bn_lrelu(_conv3x3(h, we5, masks), eg5, eb5)        # (HID5, N*HW)

    # ---- flatten (h.view(-1, C*H*W)) + fused fcE1|fcE2 + reparameterize ----
    h_flat = _cm_to_rows(h, HID5)                           # (N, FC1)
    mulv = jnp.dot(h_flat.astype(jnp.bfloat16), wfc[...],
                   preferred_element_type=jnp.float32) + bfc[...]   # (N, 2*FC2)
    mu = mulv[:, :FC2]
    lv = mulv[:, FC2:]
    # reparameterize (training branch): std = exp(logvar); z = eps*std + mu
    z = eps_ref[...] * jnp.exp(lv) + mu
    mu_ref[...] = mu
    lv_ref[...] = lv
    z_ref[...] = z

    # ------------------------- fcD1 + ReLU + reshape --------------------------
    hd = jnp.dot(z.astype(jnp.bfloat16), wd1[...],
                 preferred_element_type=jnp.float32) + bd1[...]
    hd = jnp.maximum(hd, 0.0)                               # (N, FC1)
    hd_cm = _pad_rows(_rows_to_cm(hd, HID5), C_PAD)         # (8, N*HW)

    # -------------------------------- decoder --------------------------------
    g = _bn_lrelu(_conv3x3(hd_cm, dw1, masks), dg1, db1)
    g = _bn_lrelu(_conv3x3(g, dw2, masks), dg2, db2)
    g = _bn_lrelu(_conv3x3(g, dw3, masks), dg3, db3)
    g = _bn_lrelu(_conv3x3(g, dw4, masks), dg4, db4)
    out_cm = jax.nn.sigmoid(_conv3x3(g, dw5, masks))        # (NC, N*HW)

    res_ref[...] = _cm_to_rows(out_cm, NC)                  # (N, NC*HW), lane-dense


# --------------------------- pallas_call plumbing ---------------------------

def _full_spec(shape):
    nd = len(shape)
    return pl.BlockSpec(shape, lambda i, _nd=nd: (0,) * _nd)


# ------------------------------ full forward --------------------------------

def cnn_vae_sharded_forward(prep, x_nchw, eps):
    n = x_nchw.shape[0]
    assert n == N_BATCH, "kernel is specialized for N_BATCH"
    x_flat = x_nchw.astype(jnp.float32).reshape(n, NC * HW)   # free reshape (row-major)

    inputs = [
        x_flat, prep["masks"],
        prep["enc_w1"], prep["enc_w2"], prep["enc_w3"], prep["enc_w4"], prep["enc_w5"],
        prep["enc_bn2_g"], prep["enc_bn2_b"], prep["enc_bn3_g"], prep["enc_bn3_b"],
        prep["enc_bn4_g"], prep["enc_bn4_b"], prep["enc_bn5_g"], prep["enc_bn5_b"],
        prep["fcE_wT"], prep["fcE_b"],
        eps,
        prep["fcD1_wT"], prep["fcD1_b"],
        prep["dec_w1"], prep["dec_w2"], prep["dec_w3"], prep["dec_w4"], prep["dec_w5"],
        prep["dec_bn1_g"], prep["dec_bn1_b"], prep["dec_bn2_g"], prep["dec_bn2_b"],
        prep["dec_bn3_g"], prep["dec_bn3_b"], prep["dec_bn4_g"], prep["dec_bn4_b"],
    ]
    out_shapes = (
        jax.ShapeDtypeStruct((n, NC * HW), jnp.float32),      # reconstruction (flat)
        jax.ShapeDtypeStruct((n, FC2), jnp.float32),          # mu
        jax.ShapeDtypeStruct((n, FC2), jnp.float32),          # logvar
        jax.ShapeDtypeStruct((n, FC2), jnp.float32),          # z
    )

    conv_couts = (HID1, HID2, HID3, HID4, HID5, HID4, HID3, HID2, HID1, NC)
    flops = (2 * NHW * KERNEL * KERNEL * C_PAD * sum(conv_couts)
             + 2 * n * FC1 * (2 * FC2) + 2 * n * FC2 * FC1)
    nbytes = (sum(int(np.prod(a.shape)) * a.dtype.itemsize for a in inputs)
              + sum(int(np.prod(s.shape)) * 4 for s in out_shapes))
    transcendentals = 8 * C_PAD + n * FC2 + NC * NHW          # rsqrt + exp + sigmoid

    fn = pl.pallas_call(
        _vae_kernel,
        out_shape=out_shapes,
        grid=(1,),
        in_specs=[_full_spec(a.shape) for a in inputs],
        out_specs=tuple(_full_spec(s.shape) for s in out_shapes),
        compiler_params=pltpu.CompilerParams(
            dimension_semantics=("arbitrary",)),
        cost_estimate=pl.CostEstimate(
            flops=int(flops),
            transcendentals=int(transcendentals),
            bytes_accessed=int(nbytes)),
    )
    res_flat, mu, logvar, z = fn(*inputs)
    res = res_flat.reshape(n, NC, IMG_H, IMG_W)               # free reshape
    return res, z, mu, logvar


# --------------------------- parameter construction -------------------------

def init_raw_params(key):
    """Parameters in the native PyTorch layouts:
    Conv2d (Cout,Cin,k,k), ConvTranspose2d (Cin,Cout,k,k), Linear (out,in)."""
    keys = iter(jax.random.split(key, 40))

    def w(shape, scale=0.05):
        return (scale * jax.random.normal(next(keys), shape)).astype(jnp.float32)

    p = {}
    enc_ch = [NC, HID1, HID2, HID3, HID4, HID5]
    for i in range(5):
        p[f"enc_w{i + 1}"] = w((enc_ch[i + 1], enc_ch[i], KERNEL, KERNEL))
    for i in range(2, 6):                      # BatchNorm affine at PyTorch init
        p[f"enc_bn{i}_g"] = jnp.ones((enc_ch[i],), jnp.float32)
        p[f"enc_bn{i}_b"] = jnp.zeros((enc_ch[i],), jnp.float32)

    p["fcE1_w"] = w((FC2, FC1)); p["fcE1_b"] = w((FC2,))
    p["fcE2_w"] = w((FC2, FC1)); p["fcE2_b"] = w((FC2,))
    p["fcD1_w"] = w((FC1, FC2)); p["fcD1_b"] = w((FC1,))

    dec_ch = [HID5, HID4, HID3, HID2, HID1, NC]
    for i in range(5):
        p[f"dec_w{i + 1}"] = w((dec_ch[i], dec_ch[i + 1], KERNEL, KERNEL))
    for i in range(1, 5):
        p[f"dec_bn{i}_g"] = jnp.ones((dec_ch[i],), jnp.float32)
        p[f"dec_bn{i}_b"] = jnp.zeros((dec_ch[i],), jnp.float32)
    return p


def _stack_conv_w(w_oikk, cin_pad=C_PAD):
    """(Cout, Cin, k, k) -> (Cout, 9*cin_pad) bf16, stacked tap-major:
    out[o, tap*cin_pad + i] = w[o, i, dy, dx] (zero for padded i)."""
    cout, cin = w_oikk.shape[0], w_oikk.shape[1]
    wt = jnp.transpose(w_oikk, (0, 2, 3, 1))            # (Cout, ky, kx, Cin)
    if cin_pad > cin:
        wt = jnp.pad(wt, ((0, 0), (0, 0), (0, 0), (0, cin_pad - cin)))
    return wt.reshape(cout, KERNEL * KERNEL * cin_pad).astype(jnp.bfloat16)


def _stack_convT_w(w_iokk, cin_pad=C_PAD):
    """ConvTranspose2d(k=3, s=1, p=1) == Conv2d(p=1) with the spatially
    flipped, channel-swapped kernel; then tap-major stacking."""
    w_conv = jnp.transpose(w_iokk[:, :, ::-1, ::-1], (1, 0, 2, 3))
    return _stack_conv_w(w_conv, cin_pad)


def prepare_params(raw):
    """One-time weight re-layout (hoisted out of the jitted forward)."""
    prep = {"masks": jnp.asarray(_build_masks())}
    for i in range(1, 6):
        prep[f"enc_w{i}"] = _stack_conv_w(raw[f"enc_w{i}"])
        prep[f"dec_w{i}"] = _stack_convT_w(raw[f"dec_w{i}"])
    for i in range(2, 6):
        prep[f"enc_bn{i}_g"] = raw[f"enc_bn{i}_g"].reshape(-1, 1)
        prep[f"enc_bn{i}_b"] = raw[f"enc_bn{i}_b"].reshape(-1, 1)
    for i in range(1, 5):
        prep[f"dec_bn{i}_g"] = raw[f"dec_bn{i}_g"].reshape(-1, 1)
        prep[f"dec_bn{i}_b"] = raw[f"dec_bn{i}_b"].reshape(-1, 1)
    # fcE1 / fcE2 fused into one (FC1, 2*FC2) matmul; split after the dot.
    prep["fcE_wT"] = jnp.concatenate(
        [raw["fcE1_w"].T, raw["fcE2_w"].T], axis=1).astype(jnp.bfloat16)
    prep["fcE_b"] = jnp.concatenate(
        [raw["fcE1_b"], raw["fcE2_b"]], axis=0).reshape(1, 2 * FC2)
    prep["fcD1_wT"] = raw["fcD1_w"].T.astype(jnp.bfloat16)
    prep["fcD1_b"] = raw["fcD1_b"].reshape(1, FC1)
    return prep


# ---------------------------------- main -------------------------------------

if __name__ == "__main__":
    key = jax.random.PRNGKey(0)
    k_param, k_x, k_eps = jax.random.split(key, 3)

    raw_params = init_raw_params(k_param)
    prep_params = prepare_params(raw_params)      # one-time re-layout

    x = jax.random.uniform(k_x, (N_BATCH, NC, IMG_H, IMG_W), jnp.float32)
    eps = jax.random.normal(k_eps, (N_BATCH, FC2), jnp.float32)

    fwd = jax.jit(cnn_vae_sharded_forward)
    res, z, mu, logvar = fwd(prep_params, x, eps)
    jax.block_until_ready(res)

    assert res.shape == (N_BATCH, NC, IMG_H, IMG_W)
    assert z.shape == (N_BATCH, FC2)
    assert mu.shape == (N_BATCH, FC2) and logvar.shape == (N_BATCH, FC2)
    assert bool(jnp.all(jnp.isfinite(res)))
    assert bool(jnp.all((res >= 0.0) & (res <= 1.0)))   # decoder ends in Sigmoid
    assert bool(jnp.all(jnp.isfinite(z)))
    assert bool(jnp.all(jnp.isfinite(mu))) and bool(jnp.all(jnp.isfinite(logvar)))
    print("KERNEL_OK")
</pallas_src>

<mosaic_0001>
module attributes {stable_mosaic.version = 11 : i64} {
  func.func @_vae_kernel(%arg0: i32, %arg1: memref<2x1024xf32, #tpu.memory_space<vmem>>, %arg2: memref<9x512xf32, #tpu.memory_space<vmem>>, %arg3: memref<8x72xbf16, #tpu.memory_space<vmem>>, %arg4: memref<8x72xbf16, #tpu.memory_space<vmem>>, %arg5: memref<8x72xbf16, #tpu.memory_space<vmem>>, %arg6: memref<8x72xbf16, #tpu.memory_space<vmem>>, %arg7: memref<4x72xbf16, #tpu.memory_space<vmem>>, %arg8: memref<8x1xf32, #tpu.memory_space<vmem>>, %arg9: memref<8x1xf32, #tpu.memory_space<vmem>>, %arg10: memref<8x1xf32, #tpu.memory_space<vmem>>, %arg11: memref<8x1xf32, #tpu.memory_space<vmem>>, %arg12: memref<8x1xf32, #tpu.memory_space<vmem>>, %arg13: memref<8x1xf32, #tpu.memory_space<vmem>>, %arg14: memref<4x1xf32, #tpu.memory_space<vmem>>, %arg15: memref<4x1xf32, #tpu.memory_space<vmem>>, %arg16: memref<1024x64xbf16, #tpu.memory_space<vmem>>, %arg17: memref<1x64xf32, #tpu.memory_space<vmem>>, %arg18: memref<2x32xf32, #tpu.memory_space<vmem>>, %arg19: memref<32x1024xbf16, #tpu.memory_space<vmem>>, %arg20: memref<1x1024xf32, #tpu.memory_space<vmem>>, %arg21: memref<8x72xbf16, #tpu.memory_space<vmem>>, %arg22: memref<8x72xbf16, #tpu.memory_space<vmem>>, %arg23: memref<8x72xbf16, #tpu.memory_space<vmem>>, %arg24: memref<8x72xbf16, #tpu.memory_space<vmem>>, %arg25: memref<4x72xbf16, #tpu.memory_space<vmem>>, %arg26: memref<8x1xf32, #tpu.memory_space<vmem>>, %arg27: memref<8x1xf32, #tpu.memory_space<vmem>>, %arg28: memref<8x1xf32, #tpu.memory_space<vmem>>, %arg29: memref<8x1xf32, #tpu.memory_space<vmem>>, %arg30: memref<8x1xf32, #tpu.memory_space<vmem>>, %arg31: memref<8x1xf32, #tpu.memory_space<vmem>>, %arg32: memref<8x1xf32, #tpu.memory_space<vmem>>, %arg33: memref<8x1xf32, #tpu.memory_space<vmem>>, %arg34: memref<2x1024xf32, #tpu.memory_space<vmem>>, %arg35: memref<2x32xf32, #tpu.memory_space<vmem>>, %arg36: memref<2x32xf32, #tpu.memory_space<vmem>>, %arg37: memref<2x32xf32, #tpu.memory_space<vmem>>) attributes {dimension_semantics = [#tpu.dimension_semantics<arbitrary>], iteration_bounds = array<i64: 1>, scalar_prefetch = 0 : i64, scratch_operands = 0 : i64, tpu.core_type = #tpu.core_type<tc>, window_params = [{pipeline_mode = #tpu.pipeline_mode<synchronous>, transform_indices = @transform_0, window_bounds = array<i64: 2, 1024>}, {pipeline_mode = #tpu.pipeline_mode<synchronous>, transform_indices = @transform_1, window_bounds = array<i64: 9, 512>}, {pipeline_mode = #tpu.pipeline_mode<synchronous>, transform_indices = @transform_2, window_bounds = array<i64: 8, 72>}, {pipeline_mode = #tpu.pipeline_mode<synchronous>, transform_indices = @transform_3, window_bounds = array<i64: 8, 72>}, {pipeline_mode = #tpu.pipeline_mode<synchronous>, transform_indices = @transform_4, window_bounds = array<i64: 8, 72>}, {pipeline_mode = #tpu.pipeline_mode<synchronous>, transform_indices = @transform_5, window_bounds = array<i64: 8, 72>}, {pipeline_mode = #tpu.pipeline_mode<synchronous>, transform_indices = @transform_6, window_bounds = array<i64: 4, 72>}, {pipeline_mode = #tpu.pipeline_mode<synchronous>, transform_indices = @transform_7, window_bounds = array<i64: 8, 1>}, {pipeline_mode = #tpu.pipeline_mode<synchronous>, transform_indices = @transform_8, window_bounds = array<i64: 8, 1>}, {pipeline_mode = #tpu.pipeline_mode<synchronous>, transform_indices = @transform_9, window_bounds = array<i64: 8, 1>}, {pipeline_mode = #tpu.pipeline_mode<synchronous>, transform_indices = @transform_10, window_bounds = array<i64: 8, 1>}, {pipeline_mode = #tpu.pipeline_mode<synchronous>, transform_indices = @transform_11, window_bounds = array<i64: 8, 1>}, {pipeline_mode = #tpu.pipeline_mode<synchronous>, transform_indices = @transform_12, window_bounds = array<i64: 8, 1>}, {pipeline_mode = #tpu.pipeline_mode<synchronous>, transform_indices = @transform_13, window_bounds = array<i64: 4, 1>}, {pipeline_mode = #tpu.pipeline_mode<synchronous>, transform_indices = @transform_14, window_bounds = array<i64: 4, 1>}, {pipeline_mode = #tpu.pipeline_mode<synchronous>, transform_indices = @transform_15, window_bounds = array<i64: 1024, 64>}, {pipeline_mode = #tpu.pipeline_mode<synchronous>, transform_indices = @transform_16, window_bounds = array<i64: 1, 64>}, {pipeline_mode = #tpu.pipeline_mode<synchronous>, transform_indices = @transform_17, window_bounds = array<i64: 2, 32>}, {pipeline_mode = #tpu.pipeline_mode<synchronous>, transform_indices = @transform_18, window_bounds = array<i64: 32, 1024>}, {pipeline_mode = #tpu.pipeline_mode<synchronous>, transform_indices = @transform_19, window_bounds = array<i64: 1, 1024>}, {pipeline_mode = #tpu.pipeline_mode<synchronous>, transform_indices = @transform_20, window_bounds = array<i64: 8, 72>}, {pipeline_mode = #tpu.pipeline_mode<synchronous>, transform_indices = @transform_21, window_bounds = array<i64: 8, 72>}, {pipeline_mode = #tpu.pipeline_mode<synchronous>, transform_indices = @transform_22, window_bounds = array<i64: 8, 72>}, {pipeline_mode = #tpu.pipeline_mode<synchronous>, transform_indices = @transform_23, window_bounds = array<i64: 8, 72>}, {pipeline_mode = #tpu.pipeline_mode<synchronous>, transform_indices = @transform_24, window_bounds = array<i64: 4, 72>}, {pipeline_mode = #tpu.pipeline_mode<synchronous>, transform_indices = @transform_25, window_bounds = array<i64: 8, 1>}, {pipeline_mode = #tpu.pipeline_mode<synchronous>, transform_indices = @transform_26, window_bounds = array<i64: 8, 1>}, {pipeline_mode = #tpu.pipeline_mode<synchronous>, transform_indices = @transform_27, window_bounds = array<i64: 8, 1>}, {pipeline_mode = #tpu.pipeline_mode<synchronous>, transform_indices = @transform_28, window_bounds = array<i64: 8, 1>}, {pipeline_mode = #tpu.pipeline_mode<synchronous>, transform_indices = @transform_29, window_bounds = array<i64: 8, 1>}, {pipeline_mode = #tpu.pipeline_mode<synchronous>, transform_indices = @transform_30, window_bounds = array<i64: 8, 1>}, {pipeline_mode = #tpu.pipeline_mode<synchronous>, transform_indices = @transform_31, window_bounds = array<i64: 8, 1>}, {pipeline_mode = #tpu.pipeline_mode<synchronous>, transform_indices = @transform_32, window_bounds = array<i64: 8, 1>}, {pipeline_mode = #tpu.pipeline_mode<synchronous>, transform_indices = @transform_33, window_bounds = array<i64: 2, 1024>}, {pipeline_mode = #tpu.pipeline_mode<synchronous>, transform_indices = @transform_34, window_bounds = array<i64: 2, 32>}, {pipeline_mode = #tpu.pipeline_mode<synchronous>, transform_indices = @transform_35, window_bounds = array<i64: 2, 32>}, {pipeline_mode = #tpu.pipeline_mode<synchronous>, transform_indices = @transform_36, window_bounds = array<i64: 2, 32>}]} {
    %c0 = arith.constant 0 : index
    %c0_0 = arith.constant 0 : index
    %0 = vector.load %arg2[%c0, %c0_0] : memref<9x512xf32, #tpu.memory_space<vmem>>, vector<9x512xf32>
    %1 = vector.extract_strided_slice %0 {offsets = [0, 0], sizes = [1, 512], strides = [1, 1]} : vector<9x512xf32> to vector<1x512xf32>
    %2 = vector.extract_strided_slice %0 {offsets = [1, 0], sizes = [1, 512], strides = [1, 1]} : vector<9x512xf32> to vector<1x512xf32>
    %3 = vector.extract_strided_slice %0 {offsets = [2, 0], sizes = [1, 512], strides = [1, 1]} : vector<9x512xf32> to vector<1x512xf32>
    %4 = vector.extract_strided_slice %0 {offsets = [3, 0], sizes = [1, 512], strides = [1, 1]} : vector<9x512xf32> to vector<1x512xf32>
    %5 = vector.extract_strided_slice %0 {offsets = [4, 0], sizes = [1, 512], strides = [1, 1]} : vector<9x512xf32> to vector<1x512xf32>
    %6 = vector.extract_strided_slice %0 {offsets = [5, 0], sizes = [1, 512], strides = [1, 1]} : vector<9x512xf32> to vector<1x512xf32>
    %7 = vector.extract_strided_slice %0 {offsets = [6, 0], sizes = [1, 512], strides = [1, 1]} : vector<9x512xf32> to vector<1x512xf32>
    %8 = vector.extract_strided_slice %0 {offsets = [7, 0], sizes = [1, 512], strides = [1, 1]} : vector<9x512xf32> to vector<1x512xf32>
    %9 = vector.extract_strided_slice %0 {offsets = [8, 0], sizes = [1, 512], strides = [1, 1]} : vector<9x512xf32> to vector<1x512xf32>
    %c0_1 = arith.constant 0 : index
    %c0_2 = arith.constant 0 : index
    %10 = vector.load %arg1[%c0_1, %c0_2] : memref<2x1024xf32, #tpu.memory_space<vmem>>, vector<2x1024xf32>
    %11 = vector.extract_strided_slice %10 {offsets = [0, 0], sizes = [1, 256], strides = [1, 1]} : vector<2x1024xf32> to vector<1x256xf32>
    %12 = vector.extract_strided_slice %10 {offsets = [1, 0], sizes = [1, 256], strides = [1, 1]} : vector<2x1024xf32> to vector<1x256xf32>
    %13 = tpu.concatenate %11, %12 in 1 : vector<1x256xf32>, vector<1x256xf32> -> vector<1x512xf32>
    %14 = vector.extract_strided_slice %10 {offsets = [0, 256], sizes = [1, 256], strides = [1, 1]} : vector<2x1024xf32> to vector<1x256xf32>
    %15 = vector.extract_strided_slice %10 {offsets = [1, 256], sizes = [1, 256], strides = [1, 1]} : vector<2x1024xf32> to vector<1x256xf32>
    %16 = tpu.concatenate %14, %15 in 1 : vector<1x256xf32>, vector<1x256xf32> -> vector<1x512xf32>
    %17 = vector.extract_strided_slice %10 {offsets = [0, 512], sizes = [1, 256], strides = [1, 1]} : vector<2x1024xf32> to vector<1x256xf32>
    %18 = vector.extract_strided_slice %10 {offsets = [1, 512], sizes = [1, 256], strides = [1, 1]} : vector<2x1024xf32> to vector<1x256xf32>
    %19 = tpu.concatenate %17, %18 in 1 : vector<1x256xf32>, vector<1x256xf32> -> vector<1x512xf32>
    %20 = vector.extract_strided_slice %10 {offsets = [0, 768], sizes = [1, 256], strides = [1, 1]} : vector<2x1024xf32> to vector<1x256xf32>
    %21 = vector.extract_strided_slice %10 {offsets = [1, 768], sizes = [1, 256], strides = [1, 1]} : vector<2x1024xf32> to vector<1x256xf32>
    %22 = tpu.concatenate %20, %21 in 1 : vector<1x256xf32>, vector<1x256xf32> -> vector<1x512xf32>
    %23 = tpu.concatenate %13, %16, %19, %22 in 0 : vector<1x512xf32>, vector<1x512xf32>, vector<1x512xf32>, vector<1x512xf32> -> vector<4x512xf32>
    %cst = arith.constant 0.000000e+00 : f32
    %24 = vector.broadcast %cst : f32 to vector<4x512xf32>
    %25 = tpu.concatenate %23, %24 in 0 : vector<4x512xf32>, vector<4x512xf32> -> vector<8x512xf32>
    %c17_i32 = arith.constant 17 : i32
    %26 = tpu.dynamic_rotate %25 by %c17_i32 dim 1 : vector<8x512xf32>, i32 -> vector<8x512xf32>
    %27 = vector.broadcast %1 : vector<1x512xf32> to vector<8x512xf32>
    %28 = arith.mulf %26, %27 : vector<8x512xf32>
    %c16_i32 = arith.constant 16 : i32
    %29 = tpu.dynamic_rotate %25 by %c16_i32 dim 1 : vector<8x512xf32>, i32 -> vector<8x512xf32>
    %30 = vector.broadcast %2 : vector<1x512xf32> to vector<8x512xf32>
    %31 = arith.mulf %29, %30 : vector<8x512xf32>
    %c15_i32 = arith.constant 15 : i32
    %32 = tpu.dynamic_rotate %25 by %c15_i32 dim 1 : vector<8x512xf32>, i32 -> vector<8x512xf32>
    %33 = vector.broadcast %3 : vector<1x512xf32> to vector<8x512xf32>
    %34 = arith.mulf %32, %33 : vector<8x512xf32>
    %c1_i32 = arith.constant 1 : i32
    %35 = tpu.dynamic_rotate %25 by %c1_i32 dim 1 : vector<8x512xf32>, i32 -> vector<8x512xf32>
    %36 = vector.broadcast %4 : vector<1x512xf32> to vector<8x512xf32>
    %37 = arith.mulf %35, %36 : vector<8x512xf32>
    %38 = vector.broadcast %5 : vector<1x512xf32> to vector<8x512xf32>
    %39 = arith.mulf %25, %38 : vector<8x512xf32>
    %c511_i32 = arith.constant 511 : i32
    %40 = tpu.dynamic_rotate %25 by %c511_i32 dim 1 : vector<8x512xf32>, i32 -> vector<8x512xf32>
    %41 = vector.broadcast %6 : vector<1x512xf32> to vector<8x512xf32>
    %42 = arith.mulf %40, %41 : vector<8x512xf32>
    %c497_i32 = arith.constant 497 : i32
    %43 = tpu.dynamic_rotate %25 by %c497_i32 dim 1 : vector<8x512xf32>, i32 -> vector<8x512xf32>
    %44 = vector.broadcast %7 : vector<1x512xf32> to vector<8x512xf32>
    %45 = arith.mulf %43, %44 : vector<8x512xf32>
    %c496_i32 = arith.constant 496 : i32
    %46 = tpu.dynamic_rotate %25 by %c496_i32 dim 1 : vector<8x512xf32>, i32 -> vector<8x512xf32>
    %47 = vector.broadcast %8 : vector<1x512xf32> to vector<8x512xf32>
    %48 = arith.mulf %46, %47 : vector<8x512xf32>
    %c495_i32 = arith.constant 495 : i32
    %49 = tpu.dynamic_rotate %25 by %c495_i32 dim 1 : vector<8x512xf32>, i32 -> vector<8x512xf32>
    %50 = vector.broadcast %9 : vector<1x512xf32> to vector<8x512xf32>
    %51 = arith.mulf %49, %50 : vector<8x512xf32>
    %52 = tpu.concatenate %28, %31, %34, %37, %39, %42, %45, %48, %51 in 0 : vector<8x512xf32>, vector<8x512xf32>, vector<8x512xf32>, vector<8x512xf32>, vector<8x512xf32>, vector<8x512xf32>, vector<8x512xf32>, vector<8x512xf32>, vector<8x512xf32> -> vector<72x512xf32>
    %53 = arith.truncf %52 : vector<72x512xf32> to vector<72x512xbf16>
    %c0_3 = arith.constant 0 : index
    %c0_4 = arith.constant 0 : index
    %54 = vector.load %arg3[%c0_3, %c0_4] : memref<8x72xbf16, #tpu.memory_space<vmem>>, vector<8x72xbf16>
    %cst_5 = arith.constant dense<0.000000e+00> : vector<8x512xf32>
    %55 = tpu.matmul %54, %53, %cst_5 {dimension_numbers = #tpu.dot_dimension_numbers<[1], [0], [0], [1], [0, 0, 1, 1], [], []>} : vector<8x72xbf16>, vector<72x512xbf16>, vector<8x512xf32> -> vector<8x512xf32>
    %cst_6 = arith.constant 0.000000e+00 : f32
    %56 = vector.broadcast %cst_6 : f32 to vector<8x512xf32>
    %57 = arith.cmpf ogt, %55, %56 : vector<8x512xf32>
    %cst_7 = arith.constant 2.000000e-01 : f32
    %58 = vector.broadcast %cst_7 : f32 to vector<8x512xf32>
    %59 = arith.mulf %58, %55 : vector<8x512xf32>
    %60 = arith.select %57, %55, %59 : vector<8x512xi1>, vector<8x512xf32>
    %c17_i32_8 = arith.constant 17 : i32
    %61 = tpu.dynamic_rotate %60 by %c17_i32_8 dim 1 : vector<8x512xf32>, i32 -> vector<8x512xf32>
    %62 = vector.broadcast %1 : vector<1x512xf32> to vector<8x512xf32>
    %63 = arith.mulf %61, %62 : vector<8x512xf32>
    %c16_i32_9 = arith.constant 16 : i32
    %64 = tpu.dynamic_rotate %60 by %c16_i32_9 dim 1 : vector<8x512xf32>, i32 -> vector<8x512xf32>
    %65 = vector.broadcast %2 : vector<1x512xf32> to vector<8x512xf32>
    %66 = arith.mulf %64, %65 : vector<8x512xf32>
    %c15_i32_10 = arith.constant 15 : i32
    %67 = tpu.dynamic_rotate %60 by %c15_i32_10 dim 1 : vector<8x512xf32>, i32 -> vector<8x512xf32>
    %68 = vector.broadcast %3 : vector<1x512xf32> to vector<8x512xf32>
    %69 = arith.mulf %67, %68 : vector<8x512xf32>
    %c1_i32_11 = arith.constant 1 : i32
    %70 = tpu.dynamic_rotate %60 by %c1_i32_11 dim 1 : vector<8x512xf32>, i32 -> vector<8x512xf32>
    %71 = vector.broadcast %4 : vector<1x512xf32> to vector<8x512xf32>
    %72 = arith.mulf %70, %71 : vector<8x512xf32>
    %73 = vector.broadcast %5 : vector<1x512xf32> to vector<8x512xf32>
    %74 = arith.mulf %60, %73 : vector<8x512xf32>
    %c511_i32_12 = arith.constant 511 : i32
    %75 = tpu.dynamic_rotate %60 by %c511_i32_12 dim 1 : vector<8x512xf32>, i32 -> vector<8x512xf32>
    %76 = vector.broadcast %6 : vector<1x512xf32> to vector<8x512xf32>
    %77 = arith.mulf %75, %76 : vector<8x512xf32>
    %c497_i32_13 = arith.constant 497 : i32
    %78 = tpu.dynamic_rotate %60 by %c497_i32_13 dim 1 : vector<8x512xf32>, i32 -> vector<8x512xf32>
    %79 = vector.broadcast %7 : vector<1x512xf32> to vector<8x512xf32>
    %80 = arith.mulf %78, %79 : vector<8x512xf32>
    %c496_i32_14 = arith.constant 496 : i32
    %81 = tpu.dynamic_rotate %60 by %c496_i32_14 dim 1 : vector<8x512xf32>, i32 -> vector<8x512xf32>
    %82 = vector.broadcast %8 : vector<1x512xf32> to vector<8x512xf32>
    %83 = arith.mulf %81, %82 : vector<8x512xf32>
    %c495_i32_15 = arith.constant 495 : i32
    %84 = tpu.dynamic_rotate %60 by %c495_i32_15 dim 1 : vector<8x512xf32>, i32 -> vector<8x512xf32>
    %85 = vector.broadcast %9 : vector<1x512xf32> to vector<8x512xf32>
    %86 = arith.mulf %84, %85 : vector<8x512xf32>
    %87 = tpu.concatenate %63, %66, %69, %72, %74, %77, %80, %83, %86 in 0 : vector<8x512xf32>, vector<8x512xf32>, vector<8x512xf32>, vector<8x512xf32>, vector<8x512xf32>, vector<8x512xf32>, vector<8x512xf32>, vector<8x512xf32>, vector<8x512xf32> -> vector<72x512xf32>
    %88 = arith.truncf %87 : vector<72x512xf32> to vector<72x512xbf16>
    %c0_16 = arith.constant 0 : index
    %c0_17 = arith.constant 0 : index
    %89 = vector.load %arg4[%c0_16, %c0_17] : memref<8x72xbf16, #tpu.memory_space<vmem>>, vector<8x72xbf16>
    %cst_18 = arith.constant dense<0.000000e+00> : vector<8x512xf32>
    %90 = tpu.matmul %89, %88, %cst_18 {dimension_numbers = #tpu.dot_dimension_numbers<[1], [0], [0], [1], [0, 0, 1, 1], [], []>} : vector<8x72xbf16>, vector<72x512xbf16>, vector<8x512xf32> -> vector<8x512xf32>
    %cst_19 = arith.constant dense<0.000000e+00> : vector<8xf32>
    %91 = vector.multi_reduction <add>, %90, %cst_19 [1] : vector<8x512xf32> to vector<8xf32>
    %92 = vector.shape_cast %91 : vector<8xf32> to vector<8x1xf32>
    %cst_20 = arith.constant 0.001953125 : f32
    %93 = vector.broadcast %cst_20 : f32 to vector<8x1xf32>
    %94 = arith.mulf %92, %93 : vector<8x1xf32>
    %95 = arith.mulf %90, %90 : vector<8x512xf32>
    %cst_21 = arith.constant dense<0.000000e+00> : vector<8xf32>
    %96 = vector.multi_reduction <add>, %95, %cst_21 [1] : vector<8x512xf32> to vector<8xf32>
    %97 = vector.shape_cast %96 : vector<8xf32> to vector<8x1xf32>
    %cst_22 = arith.constant 0.001953125 : f32
    %98 = vector.broadcast %cst_22 : f32 to vector<8x1xf32>
    %99 = arith.mulf %97, %98 : vector<8x1xf32>
    %100 = arith.mulf %94, %94 : vector<8x1xf32>
    %101 = arith.subf %99, %100 : vector<8x1xf32>
    %102 = vector.broadcast %94 : vector<8x1xf32> to vector<8x512xf32>
    %103 = arith.subf %90, %102 : vector<8x512xf32>
    %cst_23 = arith.constant 9.99999974E-6 : f32
    %104 = vector.broadcast %cst_23 : f32 to vector<8x1xf32>
    %105 = arith.addf %101, %104 : vector<8x1xf32>
    %106 = math.rsqrt %105 : vector<8x1xf32>
    %107 = vector.broadcast %106 : vector<8x1xf32> to vector<8x512xf32>
    %108 = arith.mulf %103, %107 : vector<8x512xf32>
    %c0_24 = arith.constant 0 : index
    %c0_25 = arith.constant 0 : index
    %109 = vector.load %arg8[%c0_24, %c0_25] : memref<8x1xf32, #tpu.memory_space<vmem>>, vector<8x1xf32>
    %110 = vector.broadcast %109 : vector<8x1xf32> to vector<8x512xf32>
    %111 = arith.mulf %108, %110 : vector<8x512xf32>
    %c0_26 = arith.constant 0 : index
    %c0_27 = arith.constant 0 : index
    %112 = vector.load %arg9[%c0_26, %c0_27] : memref<8x1xf32, #tpu.memory_space<vmem>>, vector<8x1xf32>
    %113 = vector.broadcast %112 : vector<8x1xf32> to vector<8x512xf32>
    %114 = arith.addf %111, %113 : vector<8x512xf32>
    %cst_28 = arith.constant 0.000000e+00 : f32
    %115 = vector.broadcast %cst_28 : f32 to vector<8x512xf32>
    %116 = arith.cmpf ogt, %114, %115 : vector<8x512xf32>
    %cst_29 = arith.constant 2.000000e-01 : f32
    %117 = vector.broadcast %cst_29 : f32 to vector<8x512xf32>
    %118 = arith.mulf %117, %114 : vector<8x512xf32>
    %119 = arith.select %116, %114, %118 : vector<8x512xi1>, vector<8x512xf32>
    %c17_i32_30 = arith.constant 17 : i32
    %120 = tpu.dynamic_rotate %119 by %c17_i32_30 dim 1 : vector<8x512xf32>, i32 -> vector<8x512xf32>
    %121 = vector.broadcast %1 : vector<1x512xf32> to vector<8x512xf32>
    %122 = arith.mulf %120, %121 : vector<8x512xf32>
    %c16_i32_31 = arith.constant 16 : i32
    %123 = tpu.dynamic_rotate %119 by %c16_i32_31 dim 1 : vector<8x512xf32>, i32 -> vector<8x512xf32>
    %124 = vector.broadcast %2 : vector<1x512xf32> to vector<8x512xf32>
    %125 = arith.mulf %123, %124 : vector<8x512xf32>
    %c15_i32_32 = arith.constant 15 : i32
    %126 = tpu.dynamic_rotate %119 by %c15_i32_32 dim 1 : vector<8x512xf32>, i32 -> vector<8x512xf32>
    %127 = vector.broadcast %3 : vector<1x512xf32> to vector<8x512xf32>
    %128 = arith.mulf %126, %127 : vector<8x512xf32>
    %c1_i32_33 = arith.constant 1 : i32
    %129 = tpu.dynamic_rotate %119 by %c1_i32_33 dim 1 : vector<8x512xf32>, i32 -> vector<8x512xf32>
    %130 = vector.broadcast %4 : vector<1x512xf32> to vector<8x512xf32>
    %131 = arith.mulf %129, %130 : vector<8x512xf32>
    %132 = vector.broadcast %5 : vector<1x512xf32> to vector<8x512xf32>
    %133 = arith.mulf %119, %132 : vector<8x512xf32>
    %c511_i32_34 = arith.constant 511 : i32
    %134 = tpu.dynamic_rotate %119 by %c511_i32_34 dim 1 : vector<8x512xf32>, i32 -> vector<8x512xf32>
    %135 = vector.broadcast %6 : vector<1x512xf32> to vector<8x512xf32>
    %136 = arith.mulf %134, %135 : vector<8x512xf32>
    %c497_i32_35 = arith.constant 497 : i32
    %137 = tpu.dynamic_rotate %119 by %c497_i32_35 dim 1 : vector<8x512xf32>, i32 -> vector<8x512xf32>
    %138 = vector.broadcast %7 : vector<1x512xf32> to vector<8x512xf32>
    %139 = arith.mulf %137, %138 : vector<8x512xf32>
    %c496_i32_36 = arith.constant 496 : i32
    %140 = tpu.dynamic_rotate %119 by %c496_i32_36 dim 1 : vector<8x512xf32>, i32 -> vector<8x512xf32>
    %141 = vector.broadcast %8 : vector<1x512xf32> to vector<8x512xf32>
    %142 = arith.mulf %140, %141 : vector<8x512xf32>
    %c495_i32_37 = arith.constant 495 : i32
    %143 = tpu.dynamic_rotate %119 by %c495_i32_37 dim 1 : vector<8x512xf32>, i32 -> vector<8x512xf32>
    %144 = vector.broadcast %9 : vector<1x512xf32> to vector<8x512xf32>
    %145 = arith.mulf %143, %144 : vector<8x512xf32>
    %146 = tpu.concatenate %122, %125, %128, %131, %133, %136, %139, %142, %145 in 0 : vector<8x512xf32>, vector<8x512xf32>, vector<8x512xf32>, vector<8x512xf32>, vector<8x512xf32>, vector<8x512xf32>, vector<8x512xf32>, vector<8x512xf32>, vector<8x512xf32> -> vector<72x512xf32>
    %147 = arith.truncf %146 : vector<72x512xf32> to vector<72x512xbf16>
    %c0_38 = arith.constant 0 : index
    %c0_39 = arith.constant 0 : index
    %148 = vector.load %arg5[%c0_38, %c0_39] : memref<8x72xbf16, #tpu.memory_space<vmem>>, vector<8x72xbf16>
    %cst_40 = arith.constant dense<0.000000e+00> : vector<8x512xf32>
    %149 = tpu.matmul %148, %147, %cst_40 {dimension_numbers = #tpu.dot_dimension_numbers<[1], [0], [0], [1], [0, 0, 1, 1], [], []>} : vector<8x72xbf16>, vector<72x512xbf16>, vector<8x512xf32> -> vector<8x512xf32>
    %cst_41 = arith.constant dense<0.000000e+00> : vector<8xf32>
    %150 = vector.multi_reduction <add>, %149, %cst_41 [1] : vector<8x512xf32> to vector<8xf32>
    %151 = vector.shape_cast %150 : vector<8xf32> to vector<8x1xf32>
    %cst_42 = arith.constant 0.001953125 : f32
    %152 = vector.broadcast %cst_42 : f32 to vector<8x1xf32>
    %153 = arith.mulf %151, %152 : vector<8x1xf32>
    %154 = arith.mulf %149, %149 : vector<8x512xf32>
    %cst_43 = arith.constant dense<0.000000e+00> : vector<8xf32>
    %155 = vector.multi_reduction <add>, %154, %cst_43 [1] : vector<8x512xf32> to vector<8xf32>
    %156 = vector.shape_cast %155 : vector<8xf32> to vector<8x1xf32>
    %cst_44 = arith.constant 0.001953125 : f32
    %157 = vector.broadcast %cst_44 : f32 to vector<8x1xf32>
    %158 = arith.mulf %156, %157 : vector<8x1xf32>
    %159 = arith.mulf %153, %153 : vector<8x1xf32>
    %160 = arith.subf %158, %159 : vector<8x1xf32>
    %161 = vector.broadcast %153 : vector<8x1xf32> to vector<8x512xf32>
    %162 = arith.subf %149, %161 : vector<8x512xf32>
    %cst_45 = arith.constant 9.99999974E-6 : f32
    %163 = vector.broadcast %cst_45 : f32 to vector<8x1xf32>
    %164 = arith.addf %160, %163 : vector<8x1xf32>
    %165 = math.rsqrt %164 : vector<8x1xf32>
    %166 = vector.broadcast %165 : vector<8x1xf32> to vector<8x512xf32>
    %167 = arith.mulf %162, %166 : vector<8x512xf32>
    %c0_46 = arith.constant 0 : index
    %c0_47 = arith.constant 0 : index
    %168 = vector.load %arg10[%c0_46, %c0_47] : memref<8x1xf32, #tpu.memory_space<vmem>>, vector<8x1xf32>
    %169 = vector.broadcast %168 : vector<8x1xf32> to vector<8x512xf32>
    %170 = arith.mulf %167, %169 : vector<8x512xf32>
    %c0_48 = arith.constant 0 : index
    %c0_49 = arith.constant 0 : index
    %171 = vector.load %arg11[%c0_48, %c0_49] : memref<8x1xf32, #tpu.memory_space<vmem>>, vector<8x1xf32>
    %172 = vector.broadcast %171 : vector<8x1xf32> to vector<8x512xf32>
    %173 = arith.addf %170, %172 : vector<8x512xf32>
    %cst_50 = arith.constant 0.000000e+00 : f32
    %174 = vector.broadcast %cst_50 : f32 to vector<8x512xf32>
    %175 = arith.cmpf ogt, %173, %174 : vector<8x512xf32>
    %cst_51 = arith.constant 2.000000e-01 : f32
    %176 = vector.broadcast %cst_51 : f32 to vector<8x512xf32>
    %177 = arith.mulf %176, %173 : vector<8x512xf32>
    %178 = arith.select %175, %173, %177 : vector<8x512xi1>, vector<8x512xf32>
    %c17_i32_52 = arith.constant 17 : i32
    %179 = tpu.dynamic_rotate %178 by %c17_i32_52 dim 1 : vector<8x512xf32>, i32 -> vector<8x512xf32>
    %180 = vector.broadcast %1 : vector<1x512xf32> to vector<8x512xf32>
    %181 = arith.mulf %179, %180 : vector<8x512xf32>
    %c16_i32_53 = arith.constant 16 : i32
    %182 = tpu.dynamic_rotate %178 by %c16_i32_53 dim 1 : vector<8x512xf32>, i32 -> vector<8x512xf32>
    %183 = vector.broadcast %2 : vector<1x512xf32> to vector<8x512xf32>
    %184 = arith.mulf %182, %183 : vector<8x512xf32>
    %c15_i32_54 = arith.constant 15 : i32
    %185 = tpu.dynamic_rotate %178 by %c15_i32_54 dim 1 : vector<8x512xf32>, i32 -> vector<8x512xf32>
    %186 = vector.broadcast %3 : vector<1x512xf32> to vector<8x512xf32>
    %187 = arith.mulf %185, %186 : vector<8x512xf32>
    %c1_i32_55 = arith.constant 1 : i32
    %188 = tpu.dynamic_rotate %178 by %c1_i32_55 dim 1 : vector<8x512xf32>, i32 -> vector<8x512xf32>
    %189 = vector.broadcast %4 : vector<1x512xf32> to vector<8x512xf32>
    %190 = arith.mulf %188, %189 : vector<8x512xf32>
    %191 = vector.broadcast %5 : vector<1x512xf32> to vector<8x512xf32>
    %192 = arith.mulf %178, %191 : vector<8x512xf32>
    %c511_i32_56 = arith.constant 511 : i32
    %193 = tpu.dynamic_rotate %178 by %c511_i32_56 dim 1 : vector<8x512xf32>, i32 -> vector<8x512xf32>
    %194 = vector.broadcast %6 : vector<1x512xf32> to vector<8x512xf32>
    %195 = arith.mulf %193, %194 : vector<8x512xf32>
    %c497_i32_57 = arith.constant 497 : i32
    %196 = tpu.dynamic_rotate %178 by %c497_i32_57 dim 1 : vector<8x512xf32>, i32 -> vector<8x512xf32>
    %197 = vector.broadcast %7 : vector<1x512xf32> to vector<8x512xf32>
    %198 = arith.mulf %196, %197 : vector<8x512xf32>
    %c496_i32_58 = arith.constant 496 : i32
    %199 = tpu.dynamic_rotate %178 by %c496_i32_58 dim 1 : vector<8x512xf32>, i32 -> vector<8x512xf32>
    %200 = vector.broadcast %8 : vector<1x512xf32> to vector<8x512xf32>
    %201 = arith.mulf %199, %200 : vector<8x512xf32>
    %c495_i32_59 = arith.constant 495 : i32
    %202 = tpu.dynamic_rotate %178 by %c495_i32_59 dim 1 : vector<8x512xf32>, i32 -> vector<8x512xf32>
    %203 = vector.broadcast %9 : vector<1x512xf32> to vector<8x512xf32>
    %204 = arith.mulf %202, %203 : vector<8x512xf32>
    %205 = tpu.concatenate %181, %184, %187, %190, %192, %195, %198, %201, %204 in 0 : vector<8x512xf32>, vector<8x512xf32>, vector<8x512xf32>, vector<8x512xf32>, vector<8x512xf32>, vector<8x512xf32>, vector<8x512xf32>, vector<8x512xf32>, vector<8x512xf32> -> vector<72x512xf32>
    %206 = arith.truncf %205 : vector<72x512xf32> to vector<72x512xbf16>
    %c0_60 = arith.constant 0 : index
    %c0_61 = arith.constant 0 : index
    %207 = vector.load %arg6[%c0_60, %c0_61] : memref<8x72xbf16, #tpu.memory_space<vmem>>, vector<8x72xbf16>
    %cst_62 = arith.constant dense<0.000000e+00> : vector<8x512xf32>
    %208 = tpu.matmul %207, %206, %cst_62 {dimension_numbers = #tpu.dot_dimension_numbers<[1], [0], [0], [1], [0, 0, 1, 1], [], []>} : vector<8x72xbf16>, vector<72x512xbf16>, vector<8x512xf32> -> vector<8x512xf32>
    %cst_63 = arith.constant dense<0.000000e+00> : vector<8xf32>
    %209 = vector.multi_reduction <add>, %208, %cst_63 [1] : vector<8x512xf32> to vector<8xf32>
    %210 = vector.shape_cast %209 : vector<8xf32> to vector<8x1xf32>
    %cst_64 = arith.constant 0.001953125 : f32
    %211 = vector.broadcast %cst_64 : f32 to vector<8x1xf32>
    %212 = arith.mulf %210, %211 : vector<8x1xf32>
    %213 = arith.mulf %208, %208 : vector<8x512xf32>
    %cst_65 = arith.constant dense<0.000000e+00> : vector<8xf32>
    %214 = vector.multi_reduction <add>, %213, %cst_65 [1] : vector<8x512xf32> to vector<8xf32>
    %215 = vector.shape_cast %214 : vector<8xf32> to vector<8x1xf32>
    %cst_66 = arith.constant 0.001953125 : f32
    %216 = vector.broadcast %cst_66 : f32 to vector<8x1xf32>
    %217 = arith.mulf %215, %216 : vector<8x1xf32>
    %218 = arith.mulf %212, %212 : vector<8x1xf32>
    %219 = arith.subf %217, %218 : vector<8x1xf32>
    %220 = vector.broadcast %212 : vector<8x1xf32> to vector<8x512xf32>
    %221 = arith.subf %208, %220 : vector<8x512xf32>
    %cst_67 = arith.constant 9.99999974E-6 : f32
    %222 = vector.broadcast %cst_67 : f32 to vector<8x1xf32>
    %223 = arith.addf %219, %222 : vector<8x1xf32>
    %224 = math.rsqrt %223 : vector<8x1xf32>
    %225 = vector.broadcast %224 : vector<8x1xf32> to vector<8x512xf32>
    %226 = arith.mulf %221, %225 : vector<8x512xf32>
    %c0_68 = arith.constant 0 : index
    %c0_69 = arith.constant 0 : index
    %227 = vector.load %arg12[%c0_68, %c0_69] : memref<8x1xf32, #tpu.memory_space<vmem>>, vector<8x1xf32>
    %228 = vector.broadcast %227 : vector<8x1xf32> to vector<8x512xf32>
    %229 = arith.mulf %226, %228 : vector<8x512xf32>
    %c0_70 = arith.constant 0 : index
    %c0_71 = arith.constant 0 : index
    %230 = vector.load %arg13[%c0_70, %c0_71] : memref<8x1xf32, #tpu.memory_space<vmem>>, vector<8x1xf32>
    %231 = vector.broadcast %230 : vector<8x1xf32> to vector<8x512xf32>
    %232 = arith.addf %229, %231 : vector<8x512xf32>
    %cst_72 = arith.constant 0.000000e+00 : f32
    %233 = vector.broadcast %cst_72 : f32 to vector<8x512xf32>
    %234 = arith.cmpf ogt, %232, %233 : vector<8x512xf32>
    %cst_73 = arith.constant 2.000000e-01 : f32
    %235 = vector.broadcast %cst_73 : f32 to vector<8x512xf32>
    %236 = arith.mulf %235, %232 : vector<8x512xf32>
    %237 = arith.select %234, %232, %236 : vector<8x512xi1>, vector<8x512xf32>
    %c17_i32_74 = arith.constant 17 : i32
    %238 = tpu.dynamic_rotate %237 by %c17_i32_74 dim 1 : vector<8x512xf32>, i32 -> vector<8x512xf32>
    %239 = vector.broadcast %1 : vector<1x512xf32> to vector<8x512xf32>
    %240 = arith.mulf %238, %239 : vector<8x512xf32>
    %c16_i32_75 = arith.constant 16 : i32
    %241 = tpu.dynamic_rotate %237 by %c16_i32_75 dim 1 : vector<8x512xf32>, i32 -> vector<8x512xf32>
    %242 = vector.broadcast %2 : vector<1x512xf32> to vector<8x512xf32>
    %243 = arith.mulf %241, %242 : vector<8x512xf32>
    %c15_i32_76 = arith.constant 15 : i32
    %244 = tpu.dynamic_rotate %237 by %c15_i32_76 dim 1 : vector<8x512xf32>, i32 -> vector<8x512xf32>
    %245 = vector.broadcast %3 : vector<1x512xf32> to vector<8x512xf32>
    %246 = arith.mulf %244, %245 : vector<8x512xf32>
    %c1_i32_77 = arith.constant 1 : i32
    %247 = tpu.dynamic_rotate %237 by %c1_i32_77 dim 1 : vector<8x512xf32>, i32 -> vector<8x512xf32>
    %248 = vector.broadcast %4 : vector<1x512xf32> to vector<8x512xf32>
    %249 = arith.mulf %247, %248 : vector<8x512xf32>
    %250 = vector.broadcast %5 : vector<1x512xf32> to vector<8x512xf32>
    %251 = arith.mulf %237, %250 : vector<8x512xf32>
    %c511_i32_78 = arith.constant 511 : i32
    %252 = tpu.dynamic_rotate %237 by %c511_i32_78 dim 1 : vector<8x512xf32>, i32 -> vector<8x512xf32>
    %253 = vector.broadcast %6 : vector<1x512xf32> to vector<8x512xf32>
    %254 = arith.mulf %252, %253 : vector<8x512xf32>
    %c497_i32_79 = arith.constant 497 : i32
    %255 = tpu.dynamic_rotate %237 by %c497_i32_79 dim 1 : vector<8x512xf32>, i32 -> vector<8x512xf32>
    %256 = vector.broadcast %7 : vector<1x512xf32> to vector<8x512xf32>
    %257 = arith.mulf %255, %256 : vector<8x512xf32>
    %c496_i32_80 = arith.constant 496 : i32
    %258 = tpu.dynamic_rotate %237 by %c496_i32_80 dim 1 : vector<8x512xf32>, i32 -> vector<8x512xf32>
    %259 = vector.broadcast %8 : vector<1x512xf32> to vector<8x512xf32>
    %260 = arith.mulf %258, %259 : vector<8x512xf32>
    %c495_i32_81 = arith.constant 495 : i32
    %261 = tpu.dynamic_rotate %237 by %c495_i32_81 dim 1 : vector<8x512xf32>, i32 -> vector<8x512xf32>
    %262 = vector.broadcast %9 : vector<1x512xf32> to vector<8x512xf32>
    %263 = arith.mulf %261, %262 : vector<8x512xf32>
    %264 = tpu.concatenate %240, %243, %246, %249, %251, %254, %257, %260, %263 in 0 : vector<8x512xf32>, vector<8x512xf32>, vector<8x512xf32>, vector<8x512xf32>, vector<8x512xf32>, vector<8x512xf32>, vector<8x512xf32>, vector<8x512xf32>, vector<8x512xf32> -> vector<72x512xf32>
    %265 = arith.truncf %264 : vector<72x512xf32> to vector<72x512xbf16>
    %c0_82 = arith.constant 0 : index
    %c0_83 = arith.constant 0 : index
    %266 = vector.load %arg7[%c0_82, %c0_83] : memref<4x72xbf16, #tpu.memory_space<vmem>>, vector<4x72xbf16>
    %cst_84 = arith.constant dense<0.000000e+00> : vector<4x512xf32>
    %267 = tpu.matmul %266, %265, %cst_84 {dimension_numbers = #tpu.dot_dimension_numbers<[1], [0], [0], [1], [0, 0, 1, 1], [], []>} : vector<4x72xbf16>, vector<72x512xbf16>, vector<4x512xf32> -> vector<4x512xf32>
    %cst_85 = arith.constant dense<0.000000e+00> : vector<4xf32>
    %268 = vector.multi_reduction <add>, %267, %cst_85 [1] : vector<4x512xf32> to vector<4xf32>
    %269 = vector.shape_cast %268 : vector<4xf32> to vector<4x1xf32>
    %cst_86 = arith.constant 0.001953125 : f32
    %270 = vector.broadcast %cst_86 : f32 to vector<4x1xf32>
    %271 = arith.mulf %269, %270 : vector<4x1xf32>
    %272 = arith.mulf %267, %267 : vector<4x512xf32>
    %cst_87 = arith.constant dense<0.000000e+00> : vector<4xf32>
    %273 = vector.multi_reduction <add>, %272, %cst_87 [1] : vector<4x512xf32> to vector<4xf32>
    %274 = vector.shape_cast %273 : vector<4xf32> to vector<4x1xf32>
    %cst_88 = arith.constant 0.001953125 : f32
    %275 = vector.broadcast %cst_88 : f32 to vector<4x1xf32>
    %276 = arith.mulf %274, %275 : vector<4x1xf32>
    %277 = arith.mulf %271, %271 : vector<4x1xf32>
    %278 = arith.subf %276, %277 : vector<4x1xf32>
    %279 = vector.broadcast %271 : vector<4x1xf32> to vector<4x512xf32>
    %280 = arith.subf %267, %279 : vector<4x512xf32>
    %cst_89 = arith.constant 9.99999974E-6 : f32
    %281 = vector.broadcast %cst_89 : f32 to vector<4x1xf32>
    %282 = arith.addf %278, %281 : vector<4x1xf32>
    %283 = math.rsqrt %282 : vector<4x1xf32>
    %284 = vector.broadcast %283 : vector<4x1xf32> to vector<4x512xf32>
    %285 = arith.mulf %280, %284 : vector<4x512xf32>
    %c0_90 = arith.constant 0 : index
    %c0_91 = arith.constant 0 : index
    %286 = vector.load %arg14[%c0_90, %c0_91] : memref<4x1xf32, #tpu.memory_space<vmem>>, vector<4x1xf32>
    %287 = vector.broadcast %286 : vector<4x1xf32> to vector<4x512xf32>
    %288 = arith.mulf %285, %287 : vector<4x512xf32>
    %c0_92 = arith.constant 0 : index
    %c0_93 = arith.constant 0 : index
    %289 = vector.load %arg15[%c0_92, %c0_93] : memref<4x1xf32, #tpu.memory_space<vmem>>, vector<4x1xf32>
    %290 = vector.broadcast %289 : vector<4x1xf32> to vector<4x512xf32>
    %291 = arith.addf %288, %290 : vector<4x512xf32>
    %cst_94 = arith.constant 0.000000e+00 : f32
    %292 = vector.broadcast %cst_94 : f32 to vector<4x512xf32>
    %293 = arith.cmpf ogt, %291, %292 : vector<4x512xf32>
    %cst_95 = arith.constant 2.000000e-01 : f32
    %294 = vector.broadcast %cst_95 : f32 to vector<4x512xf32>
    %295 = arith.mulf %294, %291 : vector<4x512xf32>
    %296 = arith.select %293, %291, %295 : vector<4x512xi1>, vector<4x512xf32>
    %297 = vector.extract_strided_slice %296 {offsets = [0, 0], sizes = [1, 256], strides = [1, 1]} : vector<4x512xf32> to vector<1x256xf32>
    %298 = vector.extract_strided_slice %296 {offsets = [1, 0], sizes = [1, 256], strides = [1, 1]} : vector<4x512xf32> to vector<1x256xf32>
    %299 = vector.extract_strided_slice %296 {offsets = [2, 0], sizes = [1, 256], strides = [1, 1]} : vector<4x512xf32> to vector<1x256xf32>
    %300 = vector.extract_strided_slice %296 {offsets = [3, 0], sizes = [1, 256], strides = [1, 1]} : vector<4x512xf32> to vector<1x256xf32>
    %301 = tpu.concatenate %297, %298, %299, %300 in 1 : vector<1x256xf32>, vector<1x256xf32>, vector<1x256xf32>, vector<1x256xf32> -> vector<1x1024xf32>
    %302 = vector.extract_strided_slice %296 {offsets = [0, 256], sizes = [1, 256], strides = [1, 1]} : vector<4x512xf32> to vector<1x256xf32>
    %303 = vector.extract_strided_slice %296 {offsets = [1, 256], sizes = [1, 256], strides = [1, 1]} : vector<4x512xf32> to vector<1x256xf32>
    %304 = vector.extract_strided_slice %296 {offsets = [2, 256], sizes = [1, 256], strides = [1, 1]} : vector<4x512xf32> to vector<1x256xf32>
    %305 = vector.extract_strided_slice %296 {offsets = [3, 256], sizes = [1, 256], strides = [1, 1]} : vector<4x512xf32> to vector<1x256xf32>
    %306 = tpu.concatenate %302, %303, %304, %305 in 1 : vector<1x256xf32>, vector<1x256xf32>, vector<1x256xf32>, vector<1x256xf32> -> vector<1x1024xf32>
    %307 = tpu.concatenate %301, %306 in 0 : vector<1x1024xf32>, vector<1x1024xf32> -> vector<2x1024xf32>
    %308 = arith.truncf %307 : vector<2x1024xf32> to vector<2x1024xbf16>
    %c0_96 = arith.constant 0 : index
    %c0_97 = arith.constant 0 : index
    %309 = vector.load %arg16[%c0_96, %c0_97] : memref<1024x64xbf16, #tpu.memory_space<vmem>>, vector<1024x64xbf16>
    %cst_98 = arith.constant dense<0.000000e+00> : vector<2x64xf32>
    %310 = tpu.matmul %308, %309, %cst_98 {dimension_numbers = #tpu.dot_dimension_numbers<[1], [0], [0], [1], [0, 0, 1, 1], [], []>} : vector<2x1024xbf16>, vector<1024x64xbf16>, vector<2x64xf32> -> vector<2x64xf32>
    %c0_99 = arith.constant 0 : index
    %c0_100 = arith.constant 0 : index
    %311 = vector.load %arg17[%c0_99, %c0_100] : memref<1x64xf32, #tpu.memory_space<vmem>>, vector<1x64xf32>
    %312 = vector.broadcast %311 : vector<1x64xf32> to vector<2x64xf32>
    %313 = arith.addf %310, %312 : vector<2x64xf32>
    %314 = vector.extract_strided_slice %313 {offsets = [0, 0], sizes = [2, 32], strides = [1, 1]} : vector<2x64xf32> to vector<2x32xf32>
    %315 = vector.extract_strided_slice %313 {offsets = [0, 32], sizes = [2, 32], strides = [1, 1]} : vector<2x64xf32> to vector<2x32xf32>
    %c0_101 = arith.constant 0 : index
    %c0_102 = arith.constant 0 : index
    %316 = vector.load %arg18[%c0_101, %c0_102] : memref<2x32xf32, #tpu.memory_space<vmem>>, vector<2x32xf32>
    %317 = math.exp %315 : vector<2x32xf32>
    %318 = arith.mulf %316, %317 : vector<2x32xf32>
    %319 = arith.addf %318, %314 : vector<2x32xf32>
    %c0_103 = arith.constant 0 : index
    %c0_104 = arith.constant 0 : index
    %320 = vector.load %arg35[%c0_103, %c0_104] : memref<2x32xf32, #tpu.memory_space<vmem>>, vector<2x32xf32>
    tpu.vector_store %arg35[%c0_103, %c0_104], %314 {strides = array<i32>} : memref<2x32xf32, #tpu.memory_space<vmem>>, vector<2x32xf32>,
    %c0_105 = arith.constant 0 : index
    %c0_106 = arith.constant 0 : index
    %321 = vector.load %arg36[%c0_105, %c0_106] : memref<2x32xf32, #tpu.memory_space<vmem>>, vector<2x32xf32>
    tpu.vector_store %arg36[%c0_105, %c0_106], %315 {strides = array<i32>} : memref<2x32xf32, #tpu.memory_space<vmem>>, vector<2x32xf32>,
    %c0_107 = arith.constant 0 : index
    %c0_108 = arith.constant 0 : index
    %322 = vector.load %arg37[%c0_107, %c0_108] : memref<2x32xf32, #tpu.memory_space<vmem>>, vector<2x32xf32>
    tpu.vector_store %arg37[%c0_107, %c0_108], %319 {strides = array<i32>} : memref<2x32xf32, #tpu.memory_space<vmem>>, vector<2x32xf32>,
    %323 = arith.truncf %319 : vector<2x32xf32> to vector<2x32xbf16>
    %c0_109 = arith.constant 0 : index
    %c0_110 = arith.constant 0 : index
    %324 = vector.load %arg19[%c0_109, %c0_110] : memref<32x1024xbf16, #tpu.memory_space<vmem>>, vector<32x1024xbf16>
    %cst_111 = arith.constant dense<0.000000e+00> : vector<2x1024xf32>
    %325 = tpu.matmul %323, %324, %cst_111 {dimension_numbers = #tpu.dot_dimension_numbers<[1], [0], [0], [1], [0, 0, 1, 1], [], []>} : vector<2x32xbf16>, vector<32x1024xbf16>, vector<2x1024xf32> -> vector<2x1024xf32>
    %c0_112 = arith.constant 0 : index
    %c0_113 = arith.constant 0 : index
    %326 = vector.load %arg20[%c0_112, %c0_113] : memref<1x1024xf32, #tpu.memory_space<vmem>>, vector<1x1024xf32>
    %327 = vector.broadcast %326 : vector<1x1024xf32> to vector<2x1024xf32>
    %328 = arith.addf %325, %327 : vector<2x1024xf32>
    %cst_114 = arith.constant 0.000000e+00 : f32
    %329 = vector.broadcast %cst_114 : f32 to vector<2x1024xf32>
    %330 = arith.maximumf %328, %329 : vector<2x1024xf32>
    %331 = vector.extract_strided_slice %330 {offsets = [0, 0], sizes = [1, 256], strides = [1, 1]} : vector<2x1024xf32> to vector<1x256xf32>
    %332 = vector.extract_strided_slice %330 {offsets = [1, 0], sizes = [1, 256], strides = [1, 1]} : vector<2x1024xf32> to vector<1x256xf32>
    %333 = tpu.concatenate %331, %332 in 1 : vector<1x256xf32>, vector<1x256xf32> -> vector<1x512xf32>
    %334 = vector.extract_strided_slice %330 {offsets = [0, 256], sizes = [1, 256], strides = [1, 1]} : vector<2x1024xf32> to vector<1x256xf32>
    %335 = vector.extract_strided_slice %330 {offsets = [1, 256], sizes = [1, 256], strides = [1, 1]} : vector<2x1024xf32> to vector<1x256xf32>
    %336 = tpu.concatenate %334, %335 in 1 : vector<1x256xf32>, vector<1x256xf32> -> vector<1x512xf32>
    %337 = vector.extract_strided_slice %330 {offsets = [0, 512], sizes = [1, 256], strides = [1, 1]} : vector<2x1024xf32> to vector<1x256xf32>
    %338 = vector.extract_strided_slice %330 {offsets = [1, 512], sizes = [1, 256], strides = [1, 1]} : vector<2x1024xf32> to vector<1x256xf32>
    %339 = tpu.concatenate %337, %338 in 1 : vector<1x256xf32>, vector<1x256xf32> -> vector<1x512xf32>
    %340 = vector.extract_strided_slice %330 {offsets = [0, 768], sizes = [1, 256], strides = [1, 1]} : vector<2x1024xf32> to vector<1x256xf32>
    %341 = vector.extract_strided_slice %330 {offsets = [1, 768], sizes = [1, 256], strides = [1, 1]} : vector<2x1024xf32> to vector<1x256xf32>
    %342 = tpu.concatenate %340, %341 in 1 : vector<1x256xf32>, vector<1x256xf32> -> vector<1x512xf32>
    %343 = tpu.concatenate %333, %336, %339, %342 in 0 : vector<1x512xf32>, vector<1x512xf32>, vector<1x512xf32>, vector<1x512xf32> -> vector<4x512xf32>
    %cst_115 = arith.constant 0.000000e+00 : f32
    %344 = vector.broadcast %cst_115 : f32 to vector<4x512xf32>
    %345 = tpu.concatenate %343, %344 in 0 : vector<4x512xf32>, vector<4x512xf32> -> vector<8x512xf32>
    %c17_i32_116 = arith.constant 17 : i32
    %346 = tpu.dynamic_rotate %345 by %c17_i32_116 dim 1 : vector<8x512xf32>, i32 -> vector<8x512xf32>
    %347 = vector.broadcast %1 : vector<1x512xf32> to vector<8x512xf32>
    %348 = arith.mulf %346, %347 : vector<8x512xf32>
    %c16_i32_117 = arith.constant 16 : i32
    %349 = tpu.dynamic_rotate %345 by %c16_i32_117 dim 1 : vector<8x512xf32>, i32 -> vector<8x512xf32>
    %350 = vector.broadcast %2 : vector<1x512xf32> to vector<8x512xf32>
    %351 = arith.mulf %349, %350 : vector<8x512xf32>
    %c15_i32_118 = arith.constant 15 : i32
    %352 = tpu.dynamic_rotate %345 by %c15_i32_118 dim 1 : vector<8x512xf32>, i32 -> vector<8x512xf32>
    %353 = vector.broadcast %3 : vector<1x512xf32> to vector<8x512xf32>
    %354 = arith.mulf %352, %353 : vector<8x512xf32>
    %c1_i32_119 = arith.constant 1 : i32
    %355 = tpu.dynamic_rotate %345 by %c1_i32_119 dim 1 : vector<8x512xf32>, i32 -> vector<8x512xf32>
    %356 = vector.broadcast %4 : vector<1x512xf32> to vector<8x512xf32>
    %357 = arith.mulf %355, %356 : vector<8x512xf32>
    %358 = vector.broadcast %5 : vector<1x512xf32> to vector<8x512xf32>
    %359 = arith.mulf %345, %358 : vector<8x512xf32>
    %c511_i32_120 = arith.constant 511 : i32
    %360 = tpu.dynamic_rotate %345 by %c511_i32_120 dim 1 : vector<8x512xf32>, i32 -> vector<8x512xf32>
    %361 = vector.broadcast %6 : vector<1x512xf32> to vector<8x512xf32>
    %362 = arith.mulf %360, %361 : vector<8x512xf32>
    %c497_i32_121 = arith.constant 497 : i32
    %363 = tpu.dynamic_rotate %345 by %c497_i32_121 dim 1 : vector<8x512xf32>, i32 -> vector<8x512xf32>
    %364 = vector.broadcast %7 : vector<1x512xf32> to vector<8x512xf32>
    %365 = arith.mulf %363, %364 : vector<8x512xf32>
    %c496_i32_122 = arith.constant 496 : i32
    %366 = tpu.dynamic_rotate %345 by %c496_i32_122 dim 1 : vector<8x512xf32>, i32 -> vector<8x512xf32>
    %367 = vector.broadcast %8 : vector<1x512xf32> to vector<8x512xf32>
    %368 = arith.mulf %366, %367 : vector<8x512xf32>
    %c495_i32_123 = arith.constant 495 : i32
    %369 = tpu.dynamic_rotate %345 by %c495_i32_123 dim 1 : vector<8x512xf32>, i32 -> vector<8x512xf32>
    %370 = vector.broadcast %9 : vector<1x512xf32> to vector<8x512xf32>
    %371 = arith.mulf %369, %370 : vector<8x512xf32>
    %372 = tpu.concatenate %348, %351, %354, %357, %359, %362, %365, %368, %371 in 0 : vector<8x512xf32>, vector<8x512xf32>, vector<8x512xf32>, vector<8x512xf32>, vector<8x512xf32>, vector<8x512xf32>, vector<8x512xf32>, vector<8x512xf32>, vector<8x512xf32> -> vector<72x512xf32>
    %373 = arith.truncf %372 : vector<72x512xf32> to vector<72x512xbf16>
    %c0_124 = arith.constant 0 : index
    %c0_125 = arith.constant 0 : index
    %374 = vector.load %arg21[%c0_124, %c0_125] : memref<8x72xbf16, #tpu.memory_space<vmem>>, vector<8x72xbf16>
    %cst_126 = arith.constant dense<0.000000e+00> : vector<8x512xf32>
    %375 = tpu.matmul %374, %373, %cst_126 {dimension_numbers = #tpu.dot_dimension_numbers<[1], [0], [0], [1], [0, 0, 1, 1], [], []>} : vector<8x72xbf16>, vector<72x512xbf16>, vector<8x512xf32> -> vector<8x512xf32>
    %cst_127 = arith.constant dense<0.000000e+00> : vector<8xf32>
    %376 = vector.multi_reduction <add>, %375, %cst_127 [1] : vector<8x512xf32> to vector<8xf32>
    %377 = vector.shape_cast %376 : vector<8xf32> to vector<8x1xf32>
    %cst_128 = arith.constant 0.001953125 : f32
    %378 = vector.broadcast %cst_128 : f32 to vector<8x1xf32>
    %379 = arith.mulf %377, %378 : vector<8x1xf32>
    %380 = arith.mulf %375, %375 : vector<8x512xf32>
    %cst_129 = arith.constant dense<0.000000e+00> : vector<8xf32>
    %381 = vector.multi_reduction <add>, %380, %cst_129 [1] : vector<8x512xf32> to vector<8xf32>
    %382 = vector.shape_cast %381 : vector<8xf32> to vector<8x1xf32>
    %cst_130 = arith.constant 0.001953125 : f32
    %383 = vector.broadcast %cst_130 : f32 to vector<8x1xf32>
    %384 = arith.mulf %382, %383 : vector<8x1xf32>
    %385 = arith.mulf %379, %379 : vector<8x1xf32>
    %386 = arith.subf %384, %385 : vector<8x1xf32>
    %387 = vector.broadcast %379 : vector<8x1xf32> to vector<8x512xf32>
    %388 = arith.subf %375, %387 : vector<8x512xf32>
    %cst_131 = arith.constant 9.99999974E-6 : f32
    %389 = vector.broadcast %cst_131 : f32 to vector<8x1xf32>
    %390 = arith.addf %386, %389 : vector<8x1xf32>
    %391 = math.rsqrt %390 : vector<8x1xf32>
    %392 = vector.broadcast %391 : vector<8x1xf32> to vector<8x512xf32>
    %393 = arith.mulf %388, %392 : vector<8x512xf32>
    %c0_132 = arith.constant 0 : index
    %c0_133 = arith.constant 0 : index
    %394 = vector.load %arg26[%c0_132, %c0_133] : memref<8x1xf32, #tpu.memory_space<vmem>>, vector<8x1xf32>
    %395 = vector.broadcast %394 : vector<8x1xf32> to vector<8x512xf32>
    %396 = arith.mulf %393, %395 : vector<8x512xf32>
    %c0_134 = arith.constant 0 : index
    %c0_135 = arith.constant 0 : index
    %397 = vector.load %arg27[%c0_134, %c0_135] : memref<8x1xf32, #tpu.memory_space<vmem>>, vector<8x1xf32>
    %398 = vector.broadcast %397 : vector<8x1xf32> to vector<8x512xf32>
    %399 = arith.addf %396, %398 : vector<8x512xf32>
    %cst_136 = arith.constant 0.000000e+00 : f32
    %400 = vector.broadcast %cst_136 : f32 to vector<8x512xf32>
    %401 = arith.cmpf ogt, %399, %400 : vector<8x512xf32>
    %cst_137 = arith.constant 2.000000e-01 : f32
    %402 = vector.broadcast %cst_137 : f32 to vector<8x512xf32>
    %403 = arith.mulf %402, %399 : vector<8x512xf32>
    %404 = arith.select %401, %399, %403 : vector<8x512xi1>, vector<8x512xf32>
    %c17_i32_138 = arith.constant 17 : i32
    %405 = tpu.dynamic_rotate %404 by %c17_i32_138 dim 1 : vector<8x512xf32>, i32 -> vector<8x512xf32>
    %406 = vector.broadcast %1 : vector<1x512xf32> to vector<8x512xf32>
    %407 = arith.mulf %405, %406 : vector<8x512xf32>
    %c16_i32_139 = arith.constant 16 : i32
    %408 = tpu.dynamic_rotate %404 by %c16_i32_139 dim 1 : vector<8x512xf32>, i32 -> vector<8x512xf32>
    %409 = vector.broadcast %2 : vector<1x512xf32> to vector<8x512xf32>
    %410 = arith.mulf %408, %409 : vector<8x512xf32>
    %c15_i32_140 = arith.constant 15 : i32
    %411 = tpu.dynamic_rotate %404 by %c15_i32_140 dim 1 : vector<8x512xf32>, i32 -> vector<8x512xf32>
    %412 = vector.broadcast %3 : vector<1x512xf32> to vector<8x512xf32>
    %413 = arith.mulf %411, %412 : vector<8x512xf32>
    %c1_i32_141 = arith.constant 1 : i32
    %414 = tpu.dynamic_rotate %404 by %c1_i32_141 dim 1 : vector<8x512xf32>, i32 -> vector<8x512xf32>
    %415 = vector.broadcast %4 : vector<1x512xf32> to vector<8x512xf32>
    %416 = arith.mulf %414, %415 : vector<8x512xf32>
    %417 = vector.broadcast %5 : vector<1x512xf32> to vector<8x512xf32>
    %418 = arith.mulf %404, %417 : vector<8x512xf32>
    %c511_i32_142 = arith.constant 511 : i32
    %419 = tpu.dynamic_rotate %404 by %c511_i32_142 dim 1 : vector<8x512xf32>, i32 -> vector<8x512xf32>
    %420 = vector.broadcast %6 : vector<1x512xf32> to vector<8x512xf32>
    %421 = arith.mulf %419, %420 : vector<8x512xf32>
    %c497_i32_143 = arith.constant 497 : i32
    %422 = tpu.dynamic_rotate %404 by %c497_i32_143 dim 1 : vector<8x512xf32>, i32 -> vector<8x512xf32>
    %423 = vector.broadcast %7 : vector<1x512xf32> to vector<8x512xf32>
    %424 = arith.mulf %422, %423 : vector<8x512xf32>
    %c496_i32_144 = arith.constant 496 : i32
    %425 = tpu.dynamic_rotate %404 by %c496_i32_144 dim 1 : vector<8x512xf32>, i32 -> vector<8x512xf32>
    %426 = vector.broadcast %8 : vector<1x512xf32> to vector<8x512xf32>
    %427 = arith.mulf %425, %426 : vector<8x512xf32>
    %c495_i32_145 = arith.constant 495 : i32
    %428 = tpu.dynamic_rotate %404 by %c495_i32_145 dim 1 : vector<8x512xf32>, i32 -> vector<8x512xf32>
    %429 = vector.broadcast %9 : vector<1x512xf32> to vector<8x512xf32>
    %430 = arith.mulf %428, %429 : vector<8x512xf32>
    %431 = tpu.concatenate %407, %410, %413, %416, %418, %421, %424, %427, %430 in 0 : vector<8x512xf32>, vector<8x512xf32>, vector<8x512xf32>, vector<8x512xf32>, vector<8x512xf32>, vector<8x512xf32>, vector<8x512xf32>, vector<8x512xf32>, vector<8x512xf32> -> vector<72x512xf32>
    %432 = arith.truncf %431 : vector<72x512xf32> to vector<72x512xbf16>
    %c0_146 = arith.constant 0 : index
    %c0_147 = arith.constant 0 : index
    %433 = vector.load %arg22[%c0_146, %c0_147] : memref<8x72xbf16, #tpu.memory_space<vmem>>, vector<8x72xbf16>
    %cst_148 = arith.constant dense<0.000000e+00> : vector<8x512xf32>
    %434 = tpu.matmul %433, %432, %cst_148 {dimension_numbers = #tpu.dot_dimension_numbers<[1], [0], [0], [1], [0, 0, 1, 1], [], []>} : vector<8x72xbf16>, vector<72x512xbf16>, vector<8x512xf32> -> vector<8x512xf32>
    %cst_149 = arith.constant dense<0.000000e+00> : vector<8xf32>
    %435 = vector.multi_reduction <add>, %434, %cst_149 [1] : vector<8x512xf32> to vector<8xf32>
    %436 = vector.shape_cast %435 : vector<8xf32> to vector<8x1xf32>
    %cst_150 = arith.constant 0.001953125 : f32
    %437 = vector.broadcast %cst_150 : f32 to vector<8x1xf32>
    %438 = arith.mulf %436, %437 : vector<8x1xf32>
    %439 = arith.mulf %434, %434 : vector<8x512xf32>
    %cst_151 = arith.constant dense<0.000000e+00> : vector<8xf32>
    %440 = vector.multi_reduction <add>, %439, %cst_151 [1] : vector<8x512xf32> to vector<8xf32>
    %441 = vector.shape_cast %440 : vector<8xf32> to vector<8x1xf32>
    %cst_152 = arith.constant 0.001953125 : f32
    %442 = vector.broadcast %cst_152 : f32 to vector<8x1xf32>
    %443 = arith.mulf %441, %442 : vector<8x1xf32>
    %444 = arith.mulf %438, %438 : vector<8x1xf32>
    %445 = arith.subf %443, %444 : vector<8x1xf32>
    %446 = vector.broadcast %438 : vector<8x1xf32> to vector<8x512xf32>
    %447 = arith.subf %434, %446 : vector<8x512xf32>
    %cst_153 = arith.constant 9.99999974E-6 : f32
    %448 = vector.broadcast %cst_153 : f32 to vector<8x1xf32>
    %449 = arith.addf %445, %448 : vector<8x1xf32>
    %450 = math.rsqrt %449 : vector<8x1xf32>
    %451 = vector.broadcast %450 : vector<8x1xf32> to vector<8x512xf32>
    %452 = arith.mulf %447, %451 : vector<8x512xf32>
    %c0_154 = arith.constant 0 : index
    %c0_155 = arith.constant 0 : index
    %453 = vector.load %arg28[%c0_154, %c0_155] : memref<8x1xf32, #tpu.memory_space<vmem>>, vector<8x1xf32>
    %454 = vector.broadcast %453 : vector<8x1xf32> to vector<8x512xf32>
    %455 = arith.mulf %452, %454 : vector<8x512xf32>
    %c0_156 = arith.constant 0 : index
    %c0_157 = arith.constant 0 : index
    %456 = vector.load %arg29[%c0_156, %c0_157] : memref<8x1xf32, #tpu.memory_space<vmem>>, vector<8x1xf32>
    %457 = vector.broadcast %456 : vector<8x1xf32> to vector<8x512xf32>
    %458 = arith.addf %455, %457 : vector<8x512xf32>
    %cst_158 = arith.constant 0.000000e+00 : f32
    %459 = vector.broadcast %cst_158 : f32 to vector<8x512xf32>
    %460 = arith.cmpf ogt, %458, %459 : vector<8x512xf32>
    %cst_159 = arith.constant 2.000000e-01 : f32
    %461 = vector.broadcast %cst_159 : f32 to vector<8x512xf32>
    %462 = arith.mulf %461, %458 : vector<8x512xf32>
    %463 = arith.select %460, %458, %462 : vector<8x512xi1>, vector<8x512xf32>
    %c17_i32_160 = arith.constant 17 : i32
    %464 = tpu.dynamic_rotate %463 by %c17_i32_160 dim 1 : vector<8x512xf32>, i32 -> vector<8x512xf32>
    %465 = vector.broadcast %1 : vector<1x512xf32> to vector<8x512xf32>
    %466 = arith.mulf %464, %465 : vector<8x512xf32>
    %c16_i32_161 = arith.constant 16 : i32
    %467 = tpu.dynamic_rotate %463 by %c16_i32_161 dim 1 : vector<8x512xf32>, i32 -> vector<8x512xf32>
    %468 = vector.broadcast %2 : vector<1x512xf32> to vector<8x512xf32>
    %469 = arith.mulf %467, %468 : vector<8x512xf32>
    %c15_i32_162 = arith.constant 15 : i32
    %470 = tpu.dynamic_rotate %463 by %c15_i32_162 dim 1 : vector<8x512xf32>, i32 -> vector<8x512xf32>
    %471 = vector.broadcast %3 : vector<1x512xf32> to vector<8x512xf32>
    %472 = arith.mulf %470, %471 : vector<8x512xf32>
    %c1_i32_163 = arith.constant 1 : i32
    %473 = tpu.dynamic_rotate %463 by %c1_i32_163 dim 1 : vector<8x512xf32>, i32 -> vector<8x512xf32>
    %474 = vector.broadcast %4 : vector<1x512xf32> to vector<8x512xf32>
    %475 = arith.mulf %473, %474 : vector<8x512xf32>
    %476 = vector.broadcast %5 : vector<1x512xf32> to vector<8x512xf32>
    %477 = arith.mulf %463, %476 : vector<8x512xf32>
    %c511_i32_164 = arith.constant 511 : i32
    %478 = tpu.dynamic_rotate %463 by %c511_i32_164 dim 1 : vector<8x512xf32>, i32 -> vector<8x512xf32>
    %479 = vector.broadcast %6 : vector<1x512xf32> to vector<8x512xf32>
    %480 = arith.mulf %478, %479 : vector<8x512xf32>
    %c497_i32_165 = arith.constant 497 : i32
    %481 = tpu.dynamic_rotate %463 by %c497_i32_165 dim 1 : vector<8x512xf32>, i32 -> vector<8x512xf32>
    %482 = vector.broadcast %7 : vector<1x512xf32> to vector<8x512xf32>
    %483 = arith.mulf %481, %482 : vector<8x512xf32>
    %c496_i32_166 = arith.constant 496 : i32
    %484 = tpu.dynamic_rotate %463 by %c496_i32_166 dim 1 : vector<8x512xf32>, i32 -> vector<8x512xf32>
    %485 = vector.broadcast %8 : vector<1x512xf32> to vector<8x512xf32>
    %486 = arith.mulf %484, %485 : vector<8x512xf32>
    %c495_i32_167 = arith.constant 495 : i32
    %487 = tpu.dynamic_rotate %463 by %c495_i32_167 dim 1 : vector<8x512xf32>, i32 -> vector<8x512xf32>
    %488 = vector.broadcast %9 : vector<1x512xf32> to vector<8x512xf32>
    %489 = arith.mulf %487, %488 : vector<8x512xf32>
    %490 = tpu.concatenate %466, %469, %472, %475, %477, %480, %483, %486, %489 in 0 : vector<8x512xf32>, vector<8x512xf32>, vector<8x512xf32>, vector<8x512xf32>, vector<8x512xf32>, vector<8x512xf32>, vector<8x512xf32>, vector<8x512xf32>, vector<8x512xf32> -> vector<72x512xf32>
    %491 = arith.truncf %490 : vector<72x512xf32> to vector<72x512xbf16>
    %c0_168 = arith.constant 0 : index
    %c0_169 = arith.constant 0 : index
    %492 = vector.load %arg23[%c0_168, %c0_169] : memref<8x72xbf16, #tpu.memory_space<vmem>>, vector<8x72xbf16>
    %cst_170 = arith.constant dense<0.000000e+00> : vector<8x512xf32>
    %493 = tpu.matmul %492, %491, %cst_170 {dimension_numbers = #tpu.dot_dimension_numbers<[1], [0], [0], [1], [0, 0, 1, 1], [], []>} : vector<8x72xbf16>, vector<72x512xbf16>, vector<8x512xf32> -> vector<8x512xf32>
    %cst_171 = arith.constant dense<0.000000e+00> : vector<8xf32>
    %494 = vector.multi_reduction <add>, %493, %cst_171 [1] : vector<8x512xf32> to vector<8xf32>
    %495 = vector.shape_cast %494 : vector<8xf32> to vector<8x1xf32>
    %cst_172 = arith.constant 0.001953125 : f32
    %496 = vector.broadcast %cst_172 : f32 to vector<8x1xf32>
    %497 = arith.mulf %495, %496 : vector<8x1xf32>
    %498 = arith.mulf %493, %493 : vector<8x512xf32>
    %cst_173 = arith.constant dense<0.000000e+00> : vector<8xf32>
    %499 = vector.multi_reduction <add>, %498, %cst_173 [1] : vector<8x512xf32> to vector<8xf32>
    %500 = vector.shape_cast %499 : vector<8xf32> to vector<8x1xf32>
    %cst_174 = arith.constant 0.001953125 : f32
    %501 = vector.broadcast %cst_174 : f32 to vector<8x1xf32>
    %502 = arith.mulf %500, %501 : vector<8x1xf32>
    %503 = arith.mulf %497, %497 : vector<8x1xf32>
    %504 = arith.subf %502, %503 : vector<8x1xf32>
    %505 = vector.broadcast %497 : vector<8x1xf32> to vector<8x512xf32>
    %506 = arith.subf %493, %505 : vector<8x512xf32>
    %cst_175 = arith.constant 9.99999974E-6 : f32
    %507 = vector.broadcast %cst_175 : f32 to vector<8x1xf32>
    %508 = arith.addf %504, %507 : vector<8x1xf32>
    %509 = math.rsqrt %508 : vector<8x1xf32>
    %510 = vector.broadcast %509 : vector<8x1xf32> to vector<8x512xf32>
    %511 = arith.mulf %506, %510 : vector<8x512xf32>
    %c0_176 = arith.constant 0 : index
    %c0_177 = arith.constant 0 : index
    %512 = vector.load %arg30[%c0_176, %c0_177] : memref<8x1xf32, #tpu.memory_space<vmem>>, vector<8x1xf32>
    %513 = vector.broadcast %512 : vector<8x1xf32> to vector<8x512xf32>
    %514 = arith.mulf %511, %513 : vector<8x512xf32>
    %c0_178 = arith.constant 0 : index
    %c0_179 = arith.constant 0 : index
    %515 = vector.load %arg31[%c0_178, %c0_179] : memref<8x1xf32, #tpu.memory_space<vmem>>, vector<8x1xf32>
    %516 = vector.broadcast %515 : vector<8x1xf32> to vector<8x512xf32>
    %517 = arith.addf %514, %516 : vector<8x512xf32>
    %cst_180 = arith.constant 0.000000e+00 : f32
    %518 = vector.broadcast %cst_180 : f32 to vector<8x512xf32>
    %519 = arith.cmpf ogt, %517, %518 : vector<8x512xf32>
    %cst_181 = arith.constant 2.000000e-01 : f32
    %520 = vector.broadcast %cst_181 : f32 to vector<8x512xf32>
    %521 = arith.mulf %520, %517 : vector<8x512xf32>
    %522 = arith.select %519, %517, %521 : vector<8x512xi1>, vector<8x512xf32>
    %c17_i32_182 = arith.constant 17 : i32
    %523 = tpu.dynamic_rotate %522 by %c17_i32_182 dim 1 : vector<8x512xf32>, i32 -> vector<8x512xf32>
    %524 = vector.broadcast %1 : vector<1x512xf32> to vector<8x512xf32>
    %525 = arith.mulf %523, %524 : vector<8x512xf32>
    %c16_i32_183 = arith.constant 16 : i32
    %526 = tpu.dynamic_rotate %522 by %c16_i32_183 dim 1 : vector<8x512xf32>, i32 -> vector<8x512xf32>
    %527 = vector.broadcast %2 : vector<1x512xf32> to vector<8x512xf32>
    %528 = arith.mulf %526, %527 : vector<8x512xf32>
    %c15_i32_184 = arith.constant 15 : i32
    %529 = tpu.dynamic_rotate %522 by %c15_i32_184 dim 1 : vector<8x512xf32>, i32 -> vector<8x512xf32>
    %530 = vector.broadcast %3 : vector<1x512xf32> to vector<8x512xf32>
    %531 = arith.mulf %529, %530 : vector<8x512xf32>
    %c1_i32_185 = arith.constant 1 : i32
    %532 = tpu.dynamic_rotate %522 by %c1_i32_185 dim 1 : vector<8x512xf32>, i32 -> vector<8x512xf32>
    %533 = vector.broadcast %4 : vector<1x512xf32> to vector<8x512xf32>
    %534 = arith.mulf %532, %533 : vector<8x512xf32>
    %535 = vector.broadcast %5 : vector<1x512xf32> to vector<8x512xf32>
    %536 = arith.mulf %522, %535 : vector<8x512xf32>
    %c511_i32_186 = arith.constant 511 : i32
    %537 = tpu.dynamic_rotate %522 by %c511_i32_186 dim 1 : vector<8x512xf32>, i32 -> vector<8x512xf32>
    %538 = vector.broadcast %6 : vector<1x512xf32> to vector<8x512xf32>
    %539 = arith.mulf %537, %538 : vector<8x512xf32>
    %c497_i32_187 = arith.constant 497 : i32
    %540 = tpu.dynamic_rotate %522 by %c497_i32_187 dim 1 : vector<8x512xf32>, i32 -> vector<8x512xf32>
    %541 = vector.broadcast %7 : vector<1x512xf32> to vector<8x512xf32>
    %542 = arith.mulf %540, %541 : vector<8x512xf32>
    %c496_i32_188 = arith.constant 496 : i32
    %543 = tpu.dynamic_rotate %522 by %c496_i32_188 dim 1 : vector<8x512xf32>, i32 -> vector<8x512xf32>
    %544 = vector.broadcast %8 : vector<1x512xf32> to vector<8x512xf32>
    %545 = arith.mulf %543, %544 : vector<8x512xf32>
    %c495_i32_189 = arith.constant 495 : i32
    %546 = tpu.dynamic_rotate %522 by %c495_i32_189 dim 1 : vector<8x512xf32>, i32 -> vector<8x512xf32>
    %547 = vector.broadcast %9 : vector<1x512xf32> to vector<8x512xf32>
    %548 = arith.mulf %546, %547 : vector<8x512xf32>
    %549 = tpu.concatenate %525, %528, %531, %534, %536, %539, %542, %545, %548 in 0 : vector<8x512xf32>, vector<8x512xf32>, vector<8x512xf32>, vector<8x512xf32>, vector<8x512xf32>, vector<8x512xf32>, vector<8x512xf32>, vector<8x512xf32>, vector<8x512xf32> -> vector<72x512xf32>
    %550 = arith.truncf %549 : vector<72x512xf32> to vector<72x512xbf16>
    %c0_190 = arith.constant 0 : index
    %c0_191 = arith.constant 0 : index
    %551 = vector.load %arg24[%c0_190, %c0_191] : memref<8x72xbf16, #tpu.memory_space<vmem>>, vector<8x72xbf16>
    %cst_192 = arith.constant dense<0.000000e+00> : vector<8x512xf32>
    %552 = tpu.matmul %551, %550, %cst_192 {dimension_numbers = #tpu.dot_dimension_numbers<[1], [0], [0], [1], [0, 0, 1, 1], [], []>} : vector<8x72xbf16>, vector<72x512xbf16>, vector<8x512xf32> -> vector<8x512xf32>
    %cst_193 = arith.constant dense<0.000000e+00> : vector<8xf32>
    %553 = vector.multi_reduction <add>, %552, %cst_193 [1] : vector<8x512xf32> to vector<8xf32>
    %554 = vector.shape_cast %553 : vector<8xf32> to vector<8x1xf32>
    %cst_194 = arith.constant 0.001953125 : f32
    %555 = vector.broadcast %cst_194 : f32 to vector<8x1xf32>
    %556 = arith.mulf %554, %555 : vector<8x1xf32>
    %557 = arith.mulf %552, %552 : vector<8x512xf32>
    %cst_195 = arith.constant dense<0.000000e+00> : vector<8xf32>
    %558 = vector.multi_reduction <add>, %557, %cst_195 [1] : vector<8x512xf32> to vector<8xf32>
    %559 = vector.shape_cast %558 : vector<8xf32> to vector<8x1xf32>
    %cst_196 = arith.constant 0.001953125 : f32
    %560 = vector.broadcast %cst_196 : f32 to vector<8x1xf32>
    %561 = arith.mulf %559, %560 : vector<8x1xf32>
    %562 = arith.mulf %556, %556 : vector<8x1xf32>
    %563 = arith.subf %561, %562 : vector<8x1xf32>
    %564 = vector.broadcast %556 : vector<8x1xf32> to vector<8x512xf32>
    %565 = arith.subf %552, %564 : vector<8x512xf32>
    %cst_197 = arith.constant 9.99999974E-6 : f32
    %566 = vector.broadcast %cst_197 : f32 to vector<8x1xf32>
    %567 = arith.addf %563, %566 : vector<8x1xf32>
    %568 = math.rsqrt %567 : vector<8x1xf32>
    %569 = vector.broadcast %568 : vector<8x1xf32> to vector<8x512xf32>
    %570 = arith.mulf %565, %569 : vector<8x512xf32>
    %c0_198 = arith.constant 0 : index
    %c0_199 = arith.constant 0 : index
    %571 = vector.load %arg32[%c0_198, %c0_199] : memref<8x1xf32, #tpu.memory_space<vmem>>, vector<8x1xf32>
    %572 = vector.broadcast %571 : vector<8x1xf32> to vector<8x512xf32>
    %573 = arith.mulf %570, %572 : vector<8x512xf32>
    %c0_200 = arith.constant 0 : index
    %c0_201 = arith.constant 0 : index
    %574 = vector.load %arg33[%c0_200, %c0_201] : memref<8x1xf32, #tpu.memory_space<vmem>>, vector<8x1xf32>
    %575 = vector.broadcast %574 : vector<8x1xf32> to vector<8x512xf32>
    %576 = arith.addf %573, %575 : vector<8x512xf32>
    %cst_202 = arith.constant 0.000000e+00 : f32
    %577 = vector.broadcast %cst_202 : f32 to vector<8x512xf32>
    %578 = arith.cmpf ogt, %576, %577 : vector<8x512xf32>
    %cst_203 = arith.constant 2.000000e-01 : f32
    %579 = vector.broadcast %cst_203 : f32 to vector<8x512xf32>
    %580 = arith.mulf %579, %576 : vector<8x512xf32>
    %581 = arith.select %578, %576, %580 : vector<8x512xi1>, vector<8x512xf32>
    %c17_i32_204 = arith.constant 17 : i32
    %582 = tpu.dynamic_rotate %581 by %c17_i32_204 dim 1 : vector<8x512xf32>, i32 -> vector<8x512xf32>
    %583 = vector.broadcast %1 : vector<1x512xf32> to vector<8x512xf32>
    %584 = arith.mulf %582, %583 : vector<8x512xf32>
    %c16_i32_205 = arith.constant 16 : i32
    %585 = tpu.dynamic_rotate %581 by %c16_i32_205 dim 1 : vector<8x512xf32>, i32 -> vector<8x512xf32>
    %586 = vector.broadcast %2 : vector<1x512xf32> to vector<8x512xf32>
    %587 = arith.mulf %585, %586 : vector<8x512xf32>
    %c15_i32_206 = arith.constant 15 : i32
    %588 = tpu.dynamic_rotate %581 by %c15_i32_206 dim 1 : vector<8x512xf32>, i32 -> vector<8x512xf32>
    %589 = vector.broadcast %3 : vector<1x512xf32> to vector<8x512xf32>
    %590 = arith.mulf %588, %589 : vector<8x512xf32>
    %c1_i32_207 = arith.constant 1 : i32
    %591 = tpu.dynamic_rotate %581 by %c1_i32_207 dim 1 : vector<8x512xf32>, i32 -> vector<8x512xf32>
    %592 = vector.broadcast %4 : vector<1x512xf32> to vector<8x512xf32>
    %593 = arith.mulf %591, %592 : vector<8x512xf32>
    %594 = vector.broadcast %5 : vector<1x512xf32> to vector<8x512xf32>
    %595 = arith.mulf %581, %594 : vector<8x512xf32>
    %c511_i32_208 = arith.constant 511 : i32
    %596 = tpu.dynamic_rotate %581 by %c511_i32_208 dim 1 : vector<8x512xf32>, i32 -> vector<8x512xf32>
    %597 = vector.broadcast %6 : vector<1x512xf32> to vector<8x512xf32>
    %598 = arith.mulf %596, %597 : vector<8x512xf32>
    %c497_i32_209 = arith.constant 497 : i32
    %599 = tpu.dynamic_rotate %581 by %c497_i32_209 dim 1 : vector<8x512xf32>, i32 -> vector<8x512xf32>
    %600 = vector.broadcast %7 : vector<1x512xf32> to vector<8x512xf32>
    %601 = arith.mulf %599, %600 : vector<8x512xf32>
    %c496_i32_210 = arith.constant 496 : i32
    %602 = tpu.dynamic_rotate %581 by %c496_i32_210 dim 1 : vector<8x512xf32>, i32 -> vector<8x512xf32>
    %603 = vector.broadcast %8 : vector<1x512xf32> to vector<8x512xf32>
    %604 = arith.mulf %602, %603 : vector<8x512xf32>
    %c495_i32_211 = arith.constant 495 : i32
    %605 = tpu.dynamic_rotate %581 by %c495_i32_211 dim 1 : vector<8x512xf32>, i32 -> vector<8x512xf32>
    %606 = vector.broadcast %9 : vector<1x512xf32> to vector<8x512xf32>
    %607 = arith.mulf %605, %606 : vector<8x512xf32>
    %608 = tpu.concatenate %584, %587, %590, %593, %595, %598, %601, %604, %607 in 0 : vector<8x512xf32>, vector<8x512xf32>, vector<8x512xf32>, vector<8x512xf32>, vector<8x512xf32>, vector<8x512xf32>, vector<8x512xf32>, vector<8x512xf32>, vector<8x512xf32> -> vector<72x512xf32>
    %609 = arith.truncf %608 : vector<72x512xf32> to vector<72x512xbf16>
    %c0_212 = arith.constant 0 : index
    %c0_213 = arith.constant 0 : index
    %610 = vector.load %arg25[%c0_212, %c0_213] : memref<4x72xbf16, #tpu.memory_space<vmem>>, vector<4x72xbf16>
    %cst_214 = arith.constant dense<0.000000e+00> : vector<4x512xf32>
    %611 = tpu.matmul %610, %609, %cst_214 {dimension_numbers = #tpu.dot_dimension_numbers<[1], [0], [0], [1], [0, 0, 1, 1], [], []>} : vector<4x72xbf16>, vector<72x512xbf16>, vector<4x512xf32> -> vector<4x512xf32>
    %612 = arith.negf %611 : vector<4x512xf32>
    %613 = math.exp %612 : vector<4x512xf32>
    %cst_215 = arith.constant 1.000000e+00 : f32
    %614 = vector.broadcast %cst_215 : f32 to vector<4x512xf32>
    %615 = arith.addf %614, %613 : vector<4x512xf32>
    %616 = arith.divf %614, %615 : vector<4x512xf32>
    %617 = vector.extract_strided_slice %616 {offsets = [0, 0], sizes = [1, 256], strides = [1, 1]} : vector<4x512xf32> to vector<1x256xf32>
    %618 = vector.extract_strided_slice %616 {offsets = [1, 0], sizes = [1, 256], strides = [1, 1]} : vector<4x512xf32> to vector<1x256xf32>
    %619 = vector.extract_strided_slice %616 {offsets = [2, 0], sizes = [1, 256], strides = [1, 1]} : vector<4x512xf32> to vector<1x256xf32>
    %620 = vector.extract_strided_slice %616 {offsets = [3, 0], sizes = [1, 256], strides = [1, 1]} : vector<4x512xf32> to vector<1x256xf32>
    %621 = tpu.concatenate %617, %618, %619, %620 in 1 : vector<1x256xf32>, vector<1x256xf32>, vector<1x256xf32>, vector<1x256xf32> -> vector<1x1024xf32>
    %622 = vector.extract_strided_slice %616 {offsets = [0, 256], sizes = [1, 256], strides = [1, 1]} : vector<4x512xf32> to vector<1x256xf32>
    %623 = vector.extract_strided_slice %616 {offsets = [1, 256], sizes = [1, 256], strides = [1, 1]} : vector<4x512xf32> to vector<1x256xf32>
    %624 = vector.extract_strided_slice %616 {offsets = [2, 256], sizes = [1, 256], strides = [1, 1]} : vector<4x512xf32> to vector<1x256xf32>
    %625 = vector.extract_strided_slice %616 {offsets = [3, 256], sizes = [1, 256], strides = [1, 1]} : vector<4x512xf32> to vector<1x256xf32>
    %626 = tpu.concatenate %622, %623, %624, %625 in 1 : vector<1x256xf32>, vector<1x256xf32>, vector<1x256xf32>, vector<1x256xf32> -> vector<1x1024xf32>
    %627 = tpu.concatenate %621, %626 in 0 : vector<1x1024xf32>, vector<1x1024xf32> -> vector<2x1024xf32>
    %c0_216 = arith.constant 0 : index
    %c0_217 = arith.constant 0 : index
    %628 = vector.load %arg34[%c0_216, %c0_217] : memref<2x1024xf32, #tpu.memory_space<vmem>>, vector<2x1024xf32>
    tpu.vector_store %arg34[%c0_216, %c0_217], %627 {strides = array<i32>} : memref<2x1024xf32, #tpu.memory_space<vmem>>, vector<2x1024xf32>,
    return
  }
  func.func @transform_0(%arg0: i32) -> (i32, i32) {
    %c0_i32 = arith.constant 0 : i32
    %c0_i32_0 = arith.constant 0 : i32
    %c0_i32_1 = arith.constant 0 : i32
    return %c0_i32, %c0_i32_0 : i32, i32
  }
  func.func @transform_1(%arg0: i32) -> (i32, i32) {
    %c0_i32 = arith.constant 0 : i32
    %c0_i32_0 = arith.constant 0 : i32
    %c0_i32_1 = arith.constant 0 : i32
    return %c0_i32, %c0_i32_0 : i32, i32
  }
  func.func @transform_2(%arg0: i32) -> (i32, i32) {
    %c0_i32 = arith.constant 0 : i32
    %c0_i32_0 = arith.constant 0 : i32
    %c0_i32_1 = arith.constant 0 : i32
    return %c0_i32, %c0_i32_0 : i32, i32
  }
  func.func @transform_3(%arg0: i32) -> (i32, i32) {
    %c0_i32 = arith.constant 0 : i32
    %c0_i32_0 = arith.constant 0 : i32
    %c0_i32_1 = arith.constant 0 : i32
    return %c0_i32, %c0_i32_0 : i32, i32
  }
  func.func @transform_4(%arg0: i32) -> (i32, i32) {
    %c0_i32 = arith.constant 0 : i32
    %c0_i32_0 = arith.constant 0 : i32
    %c0_i32_1 = arith.constant 0 : i32
    return %c0_i32, %c0_i32_0 : i32, i32
  }
  func.func @transform_5(%arg0: i32) -> (i32, i32) {
    %c0_i32 = arith.constant 0 : i32
    %c0_i32_0 = arith.constant 0 : i32
    %c0_i32_1 = arith.constant 0 : i32
    return %c0_i32, %c0_i32_0 : i32, i32
  }
  func.func @transform_6(%arg0: i32) -> (i32, i32) {
    %c0_i32 = arith.constant 0 : i32
    %c0_i32_0 = arith.constant 0 : i32
    %c0_i32_1 = arith.constant 0 : i32
    return %c0_i32, %c0_i32_0 : i32, i32
  }
  func.func @transform_7(%arg0: i32) -> (i32, i32) {
    %c0_i32 = arith.constant 0 : i32
    %c0_i32_0 = arith.constant 0 : i32
    %c0_i32_1 = arith.constant 0 : i32
    return %c0_i32, %c0_i32_0 : i32, i32
  }
  func.func @transform_8(%arg0: i32) -> (i32, i32) {
    %c0_i32 = arith.constant 0 : i32
    %c0_i32_0 = arith.constant 0 : i32
    %c0_i32_1 = arith.constant 0 : i32
    return %c0_i32, %c0_i32_0 : i32, i32
  }
  func.func @transform_9(%arg0: i32) -> (i32, i32) {
    %c0_i32 = arith.constant 0 : i32
    %c0_i32_0 = arith.constant 0 : i32
    %c0_i32_1 = arith.constant 0 : i32
    return %c0_i32, %c0_i32_0 : i32, i32
  }
  func.func @transform_10(%arg0: i32) -> (i32, i32) {
    %c0_i32 = arith.constant 0 : i32
    %c0_i32_0 = arith.constant 0 : i32
    %c0_i32_1 = arith.constant 0 : i32
    return %c0_i32, %c0_i32_0 : i32, i32
  }
  func.func @transform_11(%arg0: i32) -> (i32, i32) {
    %c0_i32 = arith.constant 0 : i32
    %c0_i32_0 = arith.constant 0 : i32
    %c0_i32_1 = arith.constant 0 : i32
    return %c0_i32, %c0_i32_0 : i32, i32
  }
  func.func @transform_12(%arg0: i32) -> (i32, i32) {
    %c0_i32 = arith.constant 0 : i32
    %c0_i32_0 = arith.constant 0 : i32
    %c0_i32_1 = arith.constant 0 : i32
    return %c0_i32, %c0_i32_0 : i32, i32
  }
  func.func @transform_13(%arg0: i32) -> (i32, i32) {
    %c0_i32 = arith.constant 0 : i32
    %c0_i32_0 = arith.constant 0 : i32
    %c0_i32_1 = arith.constant 0 : i32
    return %c0_i32, %c0_i32_0 : i32, i32
  }
  func.func @transform_14(%arg0: i32) -> (i32, i32) {
    %c0_i32 = arith.constant 0 : i32
    %c0_i32_0 = arith.constant 0 : i32
    %c0_i32_1 = arith.constant 0 : i32
    return %c0_i32, %c0_i32_0 : i32, i32
  }
  func.func @transform_15(%arg0: i32) -> (i32, i32) {
    %c0_i32 = arith.constant 0 : i32
    %c0_i32_0 = arith.constant 0 : i32
    %c0_i32_1 = arith.constant 0 : i32
    return %c0_i32, %c0_i32_0 : i32, i32
  }
  func.func @transform_16(%arg0: i32) -> (i32, i32) {
    %c0_i32 = arith.constant 0 : i32
    %c0_i32_0 = arith.constant 0 : i32
    %c0_i32_1 = arith.constant 0 : i32
    return %c0_i32, %c0_i32_0 : i32, i32
  }
  func.func @transform_17(%arg0: i32) -> (i32, i32) {
    %c0_i32 = arith.constant 0 : i32
    %c0_i32_0 = arith.constant 0 : i32
    %c0_i32_1 = arith.constant 0 : i32
    return %c0_i32, %c0_i32_0 : i32, i32
  }
  func.func @transform_18(%arg0: i32) -> (i32, i32) {
    %c0_i32 = arith.constant 0 : i32
    %c0_i32_0 = arith.constant 0 : i32
    %c0_i32_1 = arith.constant 0 : i32
    return %c0_i32, %c0_i32_0 : i32, i32
  }
  func.func @transform_19(%arg0: i32) -> (i32, i32) {
    %c0_i32 = arith.constant 0 : i32
    %c0_i32_0 = arith.constant 0 : i32
    %c0_i32_1 = arith.constant 0 : i32
    return %c0_i32, %c0_i32_0 : i32, i32
  }
  func.func @transform_20(%arg0: i32) -> (i32, i32) {
    %c0_i32 = arith.constant 0 : i32
    %c0_i32_0 = arith.constant 0 : i32
    %c0_i32_1 = arith.constant 0 : i32
    return %c0_i32, %c0_i32_0 : i32, i32
  }
  func.func @transform_21(%arg0: i32) -> (i32, i32) {
    %c0_i32 = arith.constant 0 : i32
    %c0_i32_0 = arith.constant 0 : i32
    %c0_i32_1 = arith.constant 0 : i32
    return %c0_i32, %c0_i32_0 : i32, i32
  }
  func.func @transform_22(%arg0: i32) -> (i32, i32) {
    %c0_i32 = arith.constant 0 : i32
    %c0_i32_0 = arith.constant 0 : i32
    %c0_i32_1 = arith.constant 0 : i32
    return %c0_i32, %c0_i32_0 : i32, i32
  }
  func.func @transform_23(%arg0: i32) -> (i32, i32) {
    %c0_i32 = arith.constant 0 : i32
    %c0_i32_0 = arith.constant 0 : i32
    %c0_i32_1 = arith.constant 0 : i32
    return %c0_i32, %c0_i32_0 : i32, i32
  }
  func.func @transform_24(%arg0: i32) -> (i32, i32) {
    %c0_i32 = arith.constant 0 : i32
    %c0_i32_0 = arith.constant 0 : i32
    %c0_i32_1 = arith.constant 0 : i32
    return %c0_i32, %c0_i32_0 : i32, i32
  }
  func.func @transform_25(%arg0: i32) -> (i32, i32) {
    %c0_i32 = arith.constant 0 : i32
    %c0_i32_0 = arith.constant 0 : i32
    %c0_i32_1 = arith.constant 0 : i32
    return %c0_i32, %c0_i32_0 : i32, i32
  }
  func.func @transform_26(%arg0: i32) -> (i32, i32) {
    %c0_i32 = arith.constant 0 : i32
    %c0_i32_0 = arith.constant 0 : i32
    %c0_i32_1 = arith.constant 0 : i32
    return %c0_i32, %c0_i32_0 : i32, i32
  }
  func.func @transform_27(%arg0: i32) -> (i32, i32) {
    %c0_i32 = arith.constant 0 : i32
    %c0_i32_0 = arith.constant 0 : i32
    %c0_i32_1 = arith.constant 0 : i32
    return %c0_i32, %c0_i32_0 : i32, i32
  }
  func.func @transform_28(%arg0: i32) -> (i32, i32) {
    %c0_i32 = arith.constant 0 : i32
    %c0_i32_0 = arith.constant 0 : i32
    %c0_i32_1 = arith.constant 0 : i32
    return %c0_i32, %c0_i32_0 : i32, i32
  }
  func.func @transform_29(%arg0: i32) -> (i32, i32) {
    %c0_i32 = arith.constant 0 : i32
    %c0_i32_0 = arith.constant 0 : i32
    %c0_i32_1 = arith.constant 0 : i32
    return %c0_i32, %c0_i32_0 : i32, i32
  }
  func.func @transform_30(%arg0: i32) -> (i32, i32) {
    %c0_i32 = arith.constant 0 : i32
    %c0_i32_0 = arith.constant 0 : i32
    %c0_i32_1 = arith.constant 0 : i32
    return %c0_i32, %c0_i32_0 : i32, i32
  }
  func.func @transform_31(%arg0: i32) -> (i32, i32) {
    %c0_i32 = arith.constant 0 : i32
    %c0_i32_0 = arith.constant 0 : i32
    %c0_i32_1 = arith.constant 0 : i32
    return %c0_i32, %c0_i32_0 : i32, i32
  }
  func.func @transform_32(%arg0: i32) -> (i32, i32) {
    %c0_i32 = arith.constant 0 : i32
    %c0_i32_0 = arith.constant 0 : i32
    %c0_i32_1 = arith.constant 0 : i32
    return %c0_i32, %c0_i32_0 : i32, i32
  }
  func.func @transform_33(%arg0: i32) -> (i32, i32) {
    %c0_i32 = arith.constant 0 : i32
    %c0_i32_0 = arith.constant 0 : i32
    %c0_i32_1 = arith.constant 0 : i32
    return %c0_i32, %c0_i32_0 : i32, i32
  }
  func.func @transform_34(%arg0: i32) -> (i32, i32) {
    %c0_i32 = arith.constant 0 : i32
    %c0_i32_0 = arith.constant 0 : i32
    %c0_i32_1 = arith.constant 0 : i32
    return %c0_i32, %c0_i32_0 : i32, i32
  }
  func.func @transform_35(%arg0: i32) -> (i32, i32) {
    %c0_i32 = arith.constant 0 : i32
    %c0_i32_0 = arith.constant 0 : i32
    %c0_i32_1 = arith.constant 0 : i32
    return %c0_i32, %c0_i32_0 : i32, i32
  }
  func.func @transform_36(%arg0: i32) -> (i32, i32) {
    %c0_i32 = arith.constant 0 : i32
    %c0_i32_0 = arith.constant 0 : i32
    %c0_i32_1 = arith.constant 0 : i32
    return %c0_i32, %c0_i32_0 : i32, i32
  }
}

</mosaic_0001>

<bundles_post_ra>
// kernel: cnn_vae_sharded_forward.1
= control target key start
LH: loop header
LB: loop body
LE: loop exit
PB: predicated region body
PF: predicated region fallthrough
CT: control target
= control target key end

     0   :  { %s5218_s6 = smov 1   ;;  %s5219_s10 = smov 2   ;;  %s7841_s0 = inlined_call_operand.smem [shape: u32[37], index: -1, kind: input, shape index: {}] }
   0x1   :  { %s5276_s5 = sld [smem:[%s7841_s0]]   ;;  %s5220_s14 = smov 3  }
   0x2   :  { %s5281_s9 = sld [smem:[%s7841_s0 + %s5218_s6]]   ;;  %s5221_s18 = smov 4  }
   0x3   :  { %s5286_s13 = sld [smem:[%s7841_s0 + %s5219_s10]]   ;;  %s5222_s22 = smov 5  }
   0x4   :  { %s5291_s17 = sld [smem:[%s7841_s0 + %s5220_s14]]   ;;  %s5223_s26 = smov 6  }
   0x5   :  { %s5296_s21 = sld [smem:[%s7841_s0 + %s5221_s18]]   ;;  %s5224_s30 = smov 7  }
   0x6   :  { %s5301_s25 = sld [smem:[%s7841_s0 + %s5222_s22]]   ;;  %s5225_s4 = smov 8  }
   0x7   :  { %s5306_s29 = sld [smem:[%s7841_s0 + %s5223_s26]]   ;;  %s5226_s10 = smov 9  }
   0x8   :  { %s5311_s3 = sld [smem:[%s7841_s0 + %s5224_s30]]   ;;  %s5227_s15 = smov 10  }
   0x9   :  { %s5316_s8 = sld [smem:[%s7841_s0 + %s5225_s4]]   ;;  %s5228_s20 = smov 11  }
   0xa   :  { %s5321_s14 = sld [smem:[%s7841_s0 + %s5226_s10]]   ;;  %s5229_s26 = smov 12  }
   0xb   :  { %s5326_s19 = sld [smem:[%s7841_s0 + %s5227_s15]]   ;;  %s5230_s1 = smov 13  }
   0xc   :  { %s5331_s24 = sld [smem:[%s7841_s0 + %s5228_s20]]   ;;  %s5231_s7 = smov 14  }
   0xd   :  { %s5336_s30 = sld [smem:[%s7841_s0 + %s5229_s26]]   ;;  %s5232_s15 = smov 15  }
   0xe   :  { %s5341_s6 = sld [smem:[%s7841_s0 + %s5230_s1]]   ;;  %s5233_s22 = smov 16  }
   0xf   :  { %s5346_s12 = sld [smem:[%s7841_s0 + %s5231_s7]]   ;;  %s5234_s28 = smov 17  }
  0x10   :  { %s5351_s20 = sld [smem:[%s7841_s0 + %s5232_s15]]   ;;  %s5235_s7 = smov 18  }
  0x11   :  { %s5356_s27 = sld [smem:[%s7841_s0 + %s5233_s22]]   ;;  %s5236_s15 = smov 19  }
  0x12   :  { %s5361_s4 = sld [smem:[%s7841_s0 + %s5234_s28]]   ;;  %s5237_s22 = smov 20  }
  0x13   :  { %s5238_s28 = smov 21  }
  0x14   :  { %7874 = sst [smem:[#allocation9_spill]] %s5341_s6 }
  0x15   :  { %7875 = sst [smem:[#allocation10_spill]] %s5346_s12 }
  0x16   :  { %s5366_s6 = sld [smem:[%s7841_s0 + %s5235_s7]]   ;;  %s5239_s7 = smov 22  }
  0x17   :  { %7876 = sst [smem:[#allocation11_spill]] %s5356_s27 }
  0x18   :  { %7877 = sst [smem:[#allocation12_spill]] %s5361_s4 }
  0x19   :  { %s5371_s12 = sld [smem:[%s7841_s0 + %s5236_s15]]   ;;  %s5240_s15 = smov 23  }
  0x1a   :  { %s5376_s27 = sld [smem:[%s7841_s0 + %s5237_s22]]   ;;  %s5241_s22 = smov 24  }
  0x1b   :  { %s5381_s4 = sld [smem:[%s7841_s0 + %s5238_s28]]   ;;  %s5242_s28 = smov 25  }
  0x1c   :  { %7878 = sst [smem:[#allocation13_spill]] %s5366_s6 }
  0x1d   :  { %s5386_s6 = sld [smem:[%s7841_s0 + %s5239_s7]]   ;;  %s5243_s7 = smov 26  }
  0x1f   :  { %7879 = sst [smem:[#allocation14_spill]] %s5371_s12 }
  0x20   :  { %7880 = sst [smem:[#allocation15_spill]] %s5376_s27 }
  0x21   :  { %7881 = sst [smem:[#allocation16_spill]] %s5381_s4 }
  0x22   :  { %s5391_s12 = sld [smem:[%s7841_s0 + %s5240_s15]]   ;;  %s5244_s15 = smov 27  }
  0x23   :  { %7882 = sst [smem:[#allocation17_spill]] %s5386_s6 }
  0x24   :  { %s5396_s27 = sld [smem:[%s7841_s0 + %s5241_s22]]   ;;  %s5245_s22 = smov 28  }
  0x25   :  { %s5401_s4 = sld [smem:[%s7841_s0 + %s5242_s28]]   ;;  %s5246_s28 = smov 29  }
  0x26   :  { %s5406_s6 = sld [smem:[%s7841_s0 + %s5243_s7]]   ;;  %s5247_s7 = smov 30  }
  0x28   :  { %7883 = sst [smem:[#allocation18_spill]] %s5391_s12 }
  0x29   :  { %s5411_s12 = sld [smem:[%s7841_s0 + %s5244_s15]]   ;;  %s5248_s15 = smov 31  }
  0x2a   :  { %7884 = sst [smem:[#allocation19_spill]] %s5396_s27 }
  0x2b   :  { %7885 = sst [smem:[#allocation20_spill]] %s5401_s4 }
  0x2c   :  { %7886 = sst [smem:[#allocation21_spill]] %s5406_s6 }
  0x2d   :  { %s5416_s27 = sld [smem:[%s7841_s0 + %s5245_s22]]   ;;  %s5249_s22 = smov 32  }
  0x2e   :  { %s5421_s4 = sld [smem:[%s7841_s0 + %s5246_s28]]   ;;  %s5250_s28 = smov 33  }
  0x2f   :  { %7887 = sst [smem:[#allocation22_spill]] %s5411_s12 }
  0x30   :  { %s5426_s6 = sld [smem:[%s7841_s0 + %s5247_s7]]   ;;  %s5251_s7 = smov 34  }
  0x31   :  { %s5431_s12 = sld [smem:[%s7841_s0 + %s5248_s15]]   ;;  %s5252_s15 = smov 35  }
  0x33   :  { %7888 = sst [smem:[#allocation23_spill]] %s5416_s27 }
  0x34   :  { %7889 = sst [smem:[#allocation24_spill]] %s5421_s4 }
  0x35   :  { %s5436_s27 = sld [smem:[%s7841_s0 + %s5249_s22]]   ;;  %s5253_s22 = smov 36  }
  0x36   :  { %7890 = sst [smem:[#allocation25_spill]] %s5426_s6 }
  0x37   :  { %7891 = sst [smem:[#allocation26_spill]] %s5431_s12 }
  0x38   :  { %s5441_s4 = sld [smem:[%s7841_s0 + %s5250_s28]]  }
  0x39   :  { %s5446_s6 = sld [smem:[%s7841_s0 + %s5251_s7]]  }
  0x3a   :  { %s5451_s12 = sld [smem:[%s7841_s0 + %s5252_s15]]  }
  0x3b   :  { %7892 = sst [smem:[#allocation27_spill]] %s5436_s27 }
  0x3c   :  { %s5456_s27 = sld [smem:[%s7841_s0 + %s5253_s22]]  }
  0x3d   :  { %79 = vsyncpa [#allocation3], 0  ;;  %v159_v0 = vlaneseq  ;;  %v5459_v1 = vld [vmem:[%s5276_s5] sm:$0xff]  ;;  %v157_v3 = vld [vmem:[%s5276_s5 + $0x8] sm:$0xff]  ;;  %vm252_vm0 = vcmask 1040384   ;;  %vm257_vm1 = vcmask 1041408  }
  0x3e   :  { %vm262_vm2 = vcmask 1042432   ;;  %vm267_vm3 = vcmask 1043456   ;;  %s5254_s0 = smov 16   ;;  %s5255_s5 = smov 17  }
  0x3f   :  { %v5462_v2 = vshrl.u32 %v159_v0, 7  ;;  %s5256_s28 = smov 15   ;;  %s5257_s1 = smov 1  }
  0x40   :  { %s5258_s2 = smov 127  }
  0x41   :  { %7893 = vst [vmem:[#allocation28_spill] sm:$0xff] %v5462_v2  ;;  %v5466_v4 = vsub.s32 0, %v5462_v2  ;;  %v5469_v5 = vsub.s32 4, %v5462_v2  ;;  %v5478_v10 = vsub.s32 2, %v5462_v2  ;;  %v5481_v11 = vsub.s32 6, %v5462_v2 }
  0x42   :  { %v5484_v15 = vsub.s32 3, %v5462_v2  ;;  %v5496_v22 = vsub.s32 7, %v5462_v2  ;;  %v5509_v34 = vsub.s32 1, %v5462_v2  ;;  %v5512_v35 = vsub.s32 5, %v5462_v2 }
  0x43   :  { %7894 = vst [vmem:[#allocation29_spill] sm:$0xff] %v5466_v4  ;;  %7895 = vst [vmem:[#allocation30_spill] sm:$0xff] %v5469_v5  ;;  %v162_v6 = vrot.slane %v5459_v1, %v5466_v4  ;;  %v182_v7 = vrot.slane %v5459_v1, %v5469_v5  ;;  %v199_v8 = vrot.slane %v157_v3, %v5466_v4 }
  0x44   :  { %v215_v9 = vrot.slane %v157_v3, %v5469_v5  ;;  %7896 = vst [vmem:[#allocation31_spill] sm:$0xff] %v5478_v10  ;;  %7897 = vst [vmem:[#allocation32_spill] sm:$0xff] %v5481_v11  ;;  %v166_v16 = vrot.slane %v5459_v1, %v5478_v10  ;;  %v186_v17 = vrot.slane %v5459_v1, %v5481_v11 }
  0x45   :  { %v228_v12 = vrot.slane %v182_v7, 7  ;;  %v236_v13 = vrot.slane %v199_v8, 6  ;;  %7898 = vst [vmem:[#allocation33_spill] sm:$0xff] %v5484_v15  ;;  %v203_v18 = vrot.slane %v157_v3, %v5478_v10  ;;  %v219_v19 = vrot.slane %v157_v3, %v5481_v11  ;;  %7899 = vst [vmem:[#allocation34_spill] sm:$0xff] %v5496_v22 }
  0x46   :  { %v244_v14 = vrot.slane %v215_v9, 5  ;;  %v176_v21 = vrot.slane %v5459_v1, %v5484_v15  ;;  %v211_v23 = vrot.slane %v157_v3, %v5484_v15  ;;  %v229_v25 = vrot.slane %v186_v17, 7  ;;  %7900 = vst [vmem:[#allocation35_spill] sm:$0xff] %v5509_v34  ;;  %7901 = vst [vmem:[#allocation36_spill] sm:$0xff] %v5512_v35 }
  0x47   :  { %v253_v20 = vsel %vm252_vm0, %v162_v6, %v228_v12  ;;  %v237_v26 = vrot.slane %v203_v18, 6  ;;  %v245_v27 = vrot.slane %v219_v19, 5  ;;  %v194_v29 = vrot.slane %v5459_v1, %v5496_v22 }
  0x48   :  { %v258_v24 = vsel %vm257_vm1, %v253_v20, %v236_v13  ;;  %v227_v30 = vrot.slane %v157_v3, %v5496_v22  ;;  %v239_v31 = vrot.slane %v211_v23, 6  ;;  %v254_v33 = vsel %vm252_vm0, %v166_v16, %v229_v25 }
  0x49   :  { %v263_v28 = vsel %vm262_vm2, %v258_v24, %v244_v14  ;;  %v259_v36 = vsel %vm257_vm1, %v254_v33, %v237_v26  ;;  %v231_v37 = vrot.slane %v194_v29, 7  ;;  %v172_v40 = vrot.slane %v5459_v1, %v5509_v34 }
  0x4a   :  { %v5505_v32 = vsel %vm267_vm3, %v263_v28, 0.0  ;;  %v247_v38 = vrot.slane %v227_v30, 5  ;;  %v264_v39 = vsel %vm262_vm2, %v259_v36, %v245_v27  ;;  %v190_v41 = vrot.slane %v5459_v1, %v5512_v35 }
  0x4b   :  { %307 = vrot.lane.b32.xlu1 %v5505_v32, %s5254_s0  ;;  %272 = vrot.lane.b32.xlu0 %v5505_v32, %s5255_s5  ;;  %v207_v42 = vrot.slane %v157_v3, %v5509_v34  ;;  %v5526_v43 = vsel %vm267_vm3, %v264_v39, 0.0  ;;  %v256_v44 = vsel %vm252_vm0, %v176_v21, %v231_v37  ;;  %v223_v45 = vrot.slane %v157_v3, %v5512_v35 }
  0x4c   :  { %v261_v46 = vsel %vm257_vm1, %v256_v44, %v239_v31  ;;  %v230_v47 = vrot.slane %v190_v41, 7 }
  0x4d   :  { %v238_v48 = vrot.slane %v207_v42, 6  ;;  %v266_v49 = vsel %vm262_vm2, %v261_v46, %v247_v38  ;;  %v246_v50 = vrot.slane %v223_v45, 5 }
  0x4e   :  { %v5537_v51 = vsel %vm267_vm3, %v266_v49, 0.0  ;;  %v255_v52 = vsel %vm252_vm0, %v172_v40, %v230_v47 }
  0x4f   :  { %309 = vrot.lane.b32.xlu1 %v5526_v43, %s5254_s0  ;;  %274 = vrot.lane.b32.xlu0 %v5526_v43, %s5255_s5  ;;  %v260_v53 = vsel %vm257_vm1, %v255_v52, %v238_v48 }
  0x50   :  { %v265_v54 = vsel %vm262_vm2, %v260_v53, %v246_v50 }
  0x51   :  { %v5545_v55 = vsel %vm267_vm3, %v265_v54, 0.0 }
  0x53   :  { %278 = vrot.lane.b32.xlu1 %v5537_v51, %s5255_s5  ;;  %276 = vrot.lane.b32.xlu0 %v5545_v55, %s5255_s5 }
  0x57   :  { %313 = vrot.lane.b32.xlu1 %v5537_v51, %s5254_s0  ;;  %311 = vrot.lane.b32.xlu0 %v5545_v55, %s5254_s0 }
  0x5b   :  { %342 = vrot.lane.b32.xlu1 %v5526_v43, %s5256_s28  ;;  %340 = vrot.lane.b32.xlu0 %v5505_v32, %s5256_s28 }
  0x5f   :  { %375 = vrot.lane.b32.xlu1 %v5526_v43, %s5257_s1  ;;  %373 = vrot.lane.b32.xlu0 %v5505_v32, %s5257_s1 }
  0x63   :  { %346 = vrot.lane.b32.xlu1 %v5537_v51, %s5256_s28  ;;  %344 = vrot.lane.b32.xlu0 %v5545_v55, %s5256_s28 }
  0x67   :  { %379 = vrot.lane.b32.xlu1 %v5537_v51, %s5257_s1  ;;  %377 = vrot.lane.b32.xlu0 %v5545_v55, %s5257_s1 }
  0x6b   :  { %430 = vrot.lane.b32.xlu1 %v5545_v55, %s5258_s2  ;;  %428 = vrot.lane.b32.xlu0 %v5526_v43, %s5258_s2 }
  0x6f   :  { %432 = vrot.lane.b32.xlu1 %v5537_v51, %s5258_s2  ;;  %426 = vrot.lane.b32.xlu0 %v5505_v32, %s5258_s2 }
  0x70   :  { %80 = vsyncpa [#allocation5], 0  ;;  %s5259_s7 = smov 113   ;;  %s5260_s10 = smov 112   ;;  %v7843_v56 = vmov 0   ;;  %v5606_v57 = vand.u32 127, %v159_v0 }
  0x71   :  { %627 = vmatprep.mubr.bf16.mxu0 %v7843_v56  ;;  %668 = vmatprep.mubr.bf16.mxu1 %v7843_v56  ;;  %s5262_s11 = smov 111   ;;  %v5609_v58 = vld [vmem:[%s5281_s9 + $0x8] sm:$0xff]  ;;  %v5628_v8 = vld [vmem:[%s5281_s9] sm:$0xff]  ;;  %v5631_v9 = vld [vmem:[%s5281_s9 + $0x18] sm:$0xff]  ;;  %vm7868_vm12 = vcmask 588800   ;;  %s7944_s15 = sld [smem:[#allocation22_spill]] }
  0x72   :  { %5036 = vset.pattern.permute.xlu0 %v7843_v56  ;;  %5037 = vset.pattern.permute.xlu1 %v7843_v56  ;;  %vm282_vm4 = vcmp.lt.s32.totalorder %v5606_v57, 17  ;;  %vm315_vm5 = vcmp.lt.s32.totalorder %v5606_v57, 16  ;;  %v5615_v61 = vrot.slane %v5609_v58, %v5466_v4  ;;  %v5619_v62 = vrot.slane %v5609_v58, %v5509_v34  ;;  %v5634_v14 = vld [vmem:[%s5281_s9 + $0x10] sm:$0xff]  ;;  %s7945_s16 = sld [smem:[#allocation17_spill]]  ;;  %s7948_s22 = sld [smem:[#allocation24_spill]] }
  0x73   :  { %463 = vrot.lane.b32.xlu1 %v5545_v55, %s5259_s7  ;;  %461 = vrot.lane.b32.xlu0 %v5526_v43, %s5259_s7  ;;  %v5638_v17 = vrot.slane %v5628_v8, %v5466_v4  ;;  %v5642_v18 = vrot.slane %v5628_v8, %v5509_v34  ;;  %v5646_v19 = vrot.slane %v5631_v9, %v5466_v4  ;;  %vm348_vm6 = vcmp.lt.s32.totalorder %v5606_v57, 15  ;;  %s7947_s18 = sld [smem:[#allocation25_spill]]  ;;  %s7949_s23 = sld [smem:[#allocation18_spill]] }
  0x74   :  { %7902 = vst [vmem:[#allocation37_spill] sm:$0xff] %v5619_v62  ;;  %v5652_v21 = vrot.slane %v5631_v9, %v5509_v34  ;;  %v5656_v23 = vrot.slane %v5634_v14, %v5466_v4  ;;  %v5660_v24 = vrot.slane %v5634_v14, %v5509_v34  ;;  %vm381_vm7 = vcmp.lt.s32.totalorder %v5606_v57, 1  ;;  %s7952_s26 = sld [smem:[#allocation26_spill]] }
  0x75   :  { %v5682_v47 = vrot.slane %v5609_v58, %v5478_v10  ;;  %v5686_v48 = vrot.slane %v5609_v58, %v5484_v15  ;;  %vm434_vm8 = vcmp.lt.s32.totalorder %v5606_v57, 127  ;;  %vm467_vm9 = vcmp.lt.s32.totalorder %v5606_v57, 113 }
  0x76   :  { %7903 = vst [vmem:[#allocation38_spill] sm:$0xff] %v5660_v24  ;;  %vm500_vm10 = vcmp.lt.s32.totalorder %v5606_v57, 112  ;;  %vm533_vm11 = vcmp.lt.s32.totalorder %v5606_v57, 111 }
  0x77   :  { %496 = vrot.lane.b32.xlu1 %v5545_v55, %s5260_s10  ;;  %494 = vrot.lane.b32.xlu0 %v5526_v43, %s5260_s10 }
  0x7b   :  { %465 = vrot.lane.b32.xlu1 %v5537_v51, %s5259_s7  ;;  %459 = vrot.lane.b32.xlu0 %v5505_v32, %s5259_s7 }
  0x7f   :  { %498 = vrot.lane.b32.xlu1 %v5537_v51, %s5260_s10  ;;  %492 = vrot.lane.b32.xlu0 %v5505_v32, %s5260_s10 }
  0x83   :  { %527 = vrot.lane.b32.xlu1 %v5526_v43, %s5262_s11  ;;  %525 = vrot.lane.b32.xlu0 %v5505_v32, %s5262_s11 }
  0x87   :  { %531 = vrot.lane.b32.xlu1 %v5537_v51, %s5262_s11  ;;  %529 = vrot.lane.b32.xlu0 %v5545_v55, %s5262_s11 }
  0xbd   :  { %v308_v59 = vpop.permute.xlu1 %307  ;;  %v273_v60 = vpop.permute.xlu0 %272 }
  0xc1   :  { %v310_v63 = vpop.permute.xlu1 %309  ;;  %v275_v0 = vpop.permute.xlu0 %274 }
  0xc2   :  { %v285_v1 = vsel %vm282_vm4, %v273_v60, %v275_v0  ;;  %v318_v3 = vsel %vm315_vm5, %v308_v59, %v310_v63 }
  0xc3   :  { %v304_v6 = vmul.f32 %v5615_v61, %v285_v1  ;;  %v337_v7 = vmul.f32 %v5619_v62, %v318_v3  ;;  %v5696_v1 = vrot.slane %v5628_v8, %v5478_v10  ;;  %v5700_v3 = vrot.slane %v5634_v14, %v5478_v10 }
  0xc5   :  { %v279_v12 = vpop.permute.xlu1 %278  ;;  %v559_v13 = vpack.c.bf16 %v337_v7, %v304_v6  ;;  %v277_v16 = vpop.permute.xlu0 %276  ;;  %v5704_v6 = vrot.slane %v5628_v8, %v5484_v15 }
  0xc6   :  { %v286_v20 = vsel %vm282_vm4, %v279_v12, %v273_v60  ;;  %v284_v25 = vsel %vm282_vm4, %v275_v0, %v277_v16  ;;  %v283_v27 = vsel %vm282_vm4, %v277_v16, %v279_v12  ;;  %v5710_v12 = vrot.slane %v5631_v9, %v5478_v10 }
  0xc7   :  { %595 = vmatprep.subr.bf16.mxu0 %v559_v13  ;;  %v303_v31 = vmul.f32 %v5638_v17, %v286_v20  ;;  %v306_v37 = vmul.f32 %v5646_v19, %v283_v27  ;;  %v305_v39 = vmul.f32 %v5656_v23, %v284_v25  ;;  %v5714_v13 = vrot.slane %v5634_v14, %v5484_v15 }
  0xc8   :  { %v5718_v16 = vrot.slane %v5631_v9, %v5484_v15  ;;  %v5726_v27 = vrot.slane %v5609_v58, %v5469_v5 }
  0xc9   :  { %v314_v26 = vpop.permute.xlu1 %313  ;;  %v312_v29 = vpop.permute.xlu0 %311 }
  0xca   :  { %v319_v28 = vsel %vm315_vm5, %v314_v26, %v308_v59  ;;  %v317_v30 = vsel %vm315_vm5, %v310_v63, %v312_v29  ;;  %v316_v36 = vsel %vm315_vm5, %v312_v29, %v314_v26 }
  0xcb   :  { %v336_v33 = vmul.f32 %v5642_v18, %v319_v28  ;;  %v339_v38 = vmul.f32 %v5652_v21, %v316_v36  ;;  %v338_v40 = vmul.f32 %v5660_v24, %v317_v30  ;;  %v5733_v30 = vrot.slane %v5609_v58, %v5512_v35 }
  0xcd   :  { %v343_v41 = vpop.permute.xlu1 %342  ;;  %v558_v42 = vpack.c.bf16 %v336_v33, %v303_v31  ;;  %v341_v44 = vpop.permute.xlu0 %340  ;;  %v561_v45 = vpack.c.bf16 %v339_v38, %v306_v37  ;;  %v560_v46 = vpack.c.bf16 %v338_v40, %v305_v39 }
  0xce   :  { %v351_v49 = vsel %vm348_vm6, %v341_v44, %v343_v41 }
  0xcf   :  { %596 = vmatpush1.bf16.msra.mxu0 %v558_v42  ;;  %636 = vmatprep.subr.bf16.mxu1 %v561_v45  ;;  %v370_v54 = vmul.f32 %v5682_v47, %v351_v49  ;;  %v423_v45 = vmul.f32 %v5726_v27, %v5526_v43  ;;  %v5763_v43 = vrot.slane %v5634_v14, %v5512_v35 }
  0xd0   :  { %637 = vmatpush1.bf16.msra.mxu1 %v560_v46  ;;  %v5749_v46 = vrot.slane %v5634_v14, %v5469_v5 }
  0xd1   :  { %v376_v50 = vpop.permute.xlu1 %375  ;;  %v374_v52 = vpop.permute.xlu0 %373 }
  0xd2   :  { %v384_v53 = vsel %vm381_vm7, %v374_v52, %v376_v50 }
  0xd3   :  { %v403_v59 = vmul.f32 %v5686_v48, %v384_v53  ;;  %v5753_v53 = vrot.slane %v5628_v8, %v5469_v5 }
  0xd5   :  { %v347_v60 = vpop.permute.xlu1 %346  ;;  %v345_v63 = vpop.permute.xlu0 %344  ;;  %v563_v0 = vpack.c.bf16 %v403_v59, %v370_v54  ;;  %v5757_v54 = vrot.slane %v5631_v9, %v5469_v5 }
  0xd6   :  { %v352_v7 = vsel %vm348_vm6, %v347_v60, %v341_v44  ;;  %v349_v20 = vsel %vm348_vm6, %v345_v63, %v347_v60  ;;  %v350_v25 = vsel %vm348_vm6, %v343_v41, %v345_v63  ;;  %v5768_v63 = vrot.slane %v5628_v8, %v5512_v35 }
  0xd7   :  { %597 = vmatprep.subr.bf16.mxu0 %v563_v0  ;;  %v369_v31 = vmul.f32 %v5696_v1, %v352_v7  ;;  %v371_v38 = vmul.f32 %v5700_v3, %v350_v25  ;;  %v372_v39 = vmul.f32 %v5710_v12, %v349_v20  ;;  %v5772_v0 = vrot.slane %v5631_v9, %v5512_v35 }
  0xd8   :  { %v424_v20 = vmul.f32 %v5749_v46, %v5545_v55 }
  0xd9   :  { %v380_v26 = vpop.permute.xlu1 %379  ;;  %v378_v29 = vpop.permute.xlu0 %377 }
  0xda   :  { %v385_v28 = vsel %vm381_vm7, %v380_v26, %v374_v52  ;;  %v382_v36 = vsel %vm381_vm7, %v378_v29, %v380_v26  ;;  %v383_v37 = vsel %vm381_vm7, %v376_v50, %v378_v29  ;;  %v422_v29 = vmul.f32 %v5753_v53, %v5505_v32 }
  0xdb   :  { %v402_v33 = vmul.f32 %v5704_v6, %v385_v28  ;;  %v404_v40 = vmul.f32 %v5714_v13, %v383_v37  ;;  %v405_v41 = vmul.f32 %v5718_v16, %v382_v36 }
  0xdd   :  { %v431_v42 = vpop.permute.xlu1 %430  ;;  %v562_v44 = vpack.c.bf16 %v402_v33, %v369_v31  ;;  %v429_v49 = vpop.permute.xlu0 %428  ;;  %v565_v52 = vpack.c.bf16 %v405_v41, %v372_v39  ;;  %v564_v50 = vpack.c.bf16 %v404_v40, %v371_v38  ;;  %v425_v31 = vmul.f32 %v5757_v54, %v5537_v51 }
  0xde   :  { %v436_v59 = vsel %vm434_vm8, %v429_v49, %v431_v42 }
  0xdf   :  { %598 = vmatpush1.bf16.msra.mxu0 %v562_v44  ;;  %v456_v60 = vmul.f32 %v5733_v30, %v436_v59  ;;  %638 = vmatprep.subr.bf16.mxu1 %v565_v52  ;;  %v5797_v44 = vrot.slane %v5609_v58, %v5496_v22 }
  0xe0   :  { %639 = vmatpush1.bf16.msra.mxu1 %v564_v50 }
  0xe1   :  { %v433_v7 = vpop.permute.xlu1 %432  ;;  %v427_v26 = vpop.permute.xlu0 %426  ;;  %v567_v28 = vpack.c.bf16 %v456_v60, %v423_v45 }
  0xe2   :  { %v435_v25 = vsel %vm434_vm8, %v431_v42, %v433_v7  ;;  %v437_v36 = vsel %vm434_vm8, %v427_v26, %v429_v49  ;;  %v438_v37 = vsel %vm434_vm8, %v433_v7, %v427_v26  ;;  %v5793_v42 = vrot.slane %v5609_v58, %v5481_v11 }
  0xe3   :  { %v457_v33 = vmul.f32 %v5763_v43, %v435_v25  ;;  %v455_v55 = vmul.f32 %v5768_v63, %v437_v36  ;;  %v458_v38 = vmul.f32 %v5772_v0, %v438_v37  ;;  %599 = vmatprep.subr.bf16.mxu0 %v567_v28  ;;  %v5807_v58 = vrot.slane %v5634_v14, %v5481_v11 }
  0xe4   :  { %v5811_v26 = vrot.slane %v5628_v8, %v5481_v11  ;;  %v5815_v28 = vrot.slane %v5634_v14, %v5496_v22  ;;  %v5829_v36 = vrot.slane %v5631_v9, %v5496_v22 }
  0xe5   :  { %v464_v39 = vpop.permute.xlu1 %463  ;;  %v568_v40 = vpack.c.bf16 %v457_v33, %v424_v20  ;;  %v462_v32 = vpop.permute.xlu0 %461  ;;  %v566_v41 = vpack.c.bf16 %v455_v55, %v422_v29  ;;  %v569_v51 = vpack.c.bf16 %v458_v38, %v425_v31  ;;  %v5821_v31 = vrot.slane %v5631_v9, %v5481_v11 }
  0xe6   :  { %v469_v45 = vsel %vm467_vm9, %v462_v32, %v464_v39  ;;  %v5825_v33 = vrot.slane %v5628_v8, %v5496_v22 }
  0xe7   :  { %600 = vmatpush1.bf16.msra.mxu0 %v566_v41  ;;  %640 = vmatprep.subr.bf16.mxu1 %v569_v51  ;;  %v489_v59 = vmul.f32 %v5793_v42, %v469_v45  ;;  %7904 = vst [vmem:[#allocation39_spill] sm:$0xff] %v5821_v31 }
  0xe8   :  { %641 = vmatpush1.bf16.msra.mxu1 %v568_v40 }
  0xe9   :  { %v497_v49 = vpop.permute.xlu1 %496  ;;  %v495_v52 = vpop.permute.xlu0 %494 }
  0xea   :  { %v502_v50 = vsel %vm500_vm10, %v495_v52, %v497_v49 }
  0xeb   :  { %v522_v60 = vmul.f32 %v5797_v44, %v502_v50 }
  0xed   :  { %v466_v7 = vpop.permute.xlu1 %465  ;;  %v460_v20 = vpop.permute.xlu0 %459  ;;  %v571_v25 = vpack.c.bf16 %v522_v60, %v489_v59  ;;  %v5849_v60 = vld [vmem:[%s5281_s9 + $0x20] ss:$0 sm:$0xff] }
  0xee   :  { %v468_v29 = vsel %vm467_vm9, %v464_v39, %v466_v7  ;;  %v470_v14 = vsel %vm467_vm9, %v460_v20, %v462_v32  ;;  %v471_v37 = vsel %vm467_vm9, %v466_v7, %v460_v20  ;;  %7905 = vst [vmem:[#allocation40_spill] sm:$0xff] %v5849_v60 }
  0xef   :  { %601 = vmatprep.subr.bf16.mxu0 %v571_v25  ;;  %v490_v8 = vmul.f32 %v5807_v58, %v468_v29  ;;  %v488_v41 = vmul.f32 %v5811_v26, %v470_v14  ;;  %v491_v51 = vmul.f32 %v5821_v31, %v471_v37  ;;  %v5854_v29 = vld [vmem:[%s5281_s9 + $0x38] ss:$0 sm:$0xff] }
  0xf0   :  { %7906 = vst [vmem:[#allocation41_spill] sm:$0xff] %v5854_v29 }
  0xf1   :  { %v499_v55 = vpop.permute.xlu1 %498  ;;  %v493_v39 = vpop.permute.xlu0 %492 }
  0xf2   :  { %v501_v38 = vsel %vm500_vm10, %v497_v49, %v499_v55  ;;  %v503_v9 = vsel %vm500_vm10, %v493_v39, %v495_v52  ;;  %v504_v32 = vsel %vm500_vm10, %v499_v55, %v493_v39  ;;  %v5858_v55 = vld [vmem:[%s5281_s9 + $0x28] ss:$0 sm:$0xff] }
  0xf3   :  { %v523_v40 = vmul.f32 %v5815_v28, %v501_v38  ;;  %v521_v45 = vmul.f32 %v5825_v33, %v503_v9  ;;  %v524_v49 = vmul.f32 %v5829_v36, %v504_v32  ;;  %7907 = vst [vmem:[#allocation42_spill] sm:$0xff] %v5858_v55  ;;  %v5861_v38 = vld [vmem:[%s5281_s9 + $0x30] ss:$0 sm:$0xff] }
  0xf4   :  { %7908 = vst [vmem:[#allocation43_spill] sm:$0xff] %v5861_v38 }
  0xf5   :  { %v528_v50 = vpop.permute.xlu1 %527  ;;  %v572_v59 = vpack.c.bf16 %v523_v40, %v490_v8  ;;  %v526_v7 = vpop.permute.xlu0 %525  ;;  %v570_v20 = vpack.c.bf16 %v521_v45, %v488_v41  ;;  %v573_v52 = vpack.c.bf16 %v524_v49, %v491_v51 }
  0xf6   :  { %v536_v25 = vsel %vm533_vm11, %v526_v7, %v528_v50 }
  0xf7   :  { %602 = vmatpush1.bf16.msra.mxu0 %v570_v20  ;;  %642 = vmatprep.subr.bf16.mxu1 %v573_v52  ;;  %v554_v14 = vmul.f32 %v5849_v60, %v536_v25  ;;  %v578_v25 = vld [vmem:[%s5286_s13] sm:$0xf]  ;;  %s7917_s13 = sld [smem:[#allocation10_spill]] }
  0xf8   :  { %643 = vmatpush1.bf16.msra.mxu1 %v572_v59 }
  0xf9   :  { %v532_v37 = vpop.permute.xlu1 %531  ;;  %v530_v8 = vpop.permute.xlu0 %529  ;;  %v574_v51 = vpack.c.bf16 %v554_v14, %v554_v14 }
  0xfa   :  { %v537_v39 = vsel %vm533_vm11, %v532_v37, %v526_v7  ;;  %v534_v9 = vsel %vm533_vm11, %v530_v8, %v532_v37  ;;  %v535_v32 = vsel %vm533_vm11, %v528_v50, %v530_v8 }
  0xfb   :  { %v557_v40 = vmul.f32 %v5854_v29, %v537_v39  ;;  %v555_v41 = vmul.f32 %v5858_v55, %v535_v32  ;;  %v556_v45 = vmul.f32 %v5861_v38, %v534_v9  ;;  %v584_v7 = vsel %vm267_vm3, %v574_v51, 0 }
  0xfd   :  { %v577_v49 = vpack.c.bf16 %v557_v40, %v557_v40  ;;  %v575_v59 = vpack.c.bf16 %v555_v41, %v555_v41  ;;  %v576_v20 = vpack.c.bf16 %v556_v45, %v556_v45 }
  0xff   :  { %4753 = vmatprep.subr.msk.bf16.mxu1 %vm267_vm3, %v577_v49  ;;  %4751 = vmatprep.subr.msk.bf16.mxu0 %vm267_vm3, %v575_v59  ;;  %v590_v52 = vsel %vm267_vm3, %v576_v20, 0 }
 0x100   :  { %604 = vmatpush1.bf16.msra.mxu0 %v584_v7  ;;  %645 = vmatpush1.bf16.msra.mxu1 %v590_v52 }
 0x103   :  { %4752 = vmatmul.mubr.msk.bf16.vlgmr.msra.gmra.mrb[0].mxu0 %vm7868_vm12, %v578_v25  ;;  %4754 = vmatmul.mubr.msk.bf16.vlgmr.msra.gmra.mrb[0].mxu1 %vm7868_vm12, %v578_v25 }
 0x104   :  { %889 = vmatprep.mubr.bf16.mxu0 %v7843_v56  ;;  %930 = vmatprep.mubr.bf16.mxu1 %v7843_v56 }
 0x1d6   :  { %v629_v50 = vpop.f32.mrb[0].mxu0  ;;  %v670_v14 = vpop.f32.mrb[0].mxu1 }
 0x1d7   :  { %vm677_vm13 = vcmp.gt.f32.partialorder %v629_v50, 0.0  ;;  %v681_v37 = vmul.f32 0.2, %v629_v50  ;;  %vm679_vm14 = vcmp.gt.f32.partialorder %v670_v14, 0.0  ;;  %v683_v39 = vmul.f32 0.2, %v670_v14 }
 0x1d8   :  { %v631_v8 = vpop.f32.mrb[1].mxu0  ;;  %v672_v40 = vpop.f32.mrb[1].mxu1 }
 0x1d9   :  { %v5881_v9 = vsel %vm677_vm13, %v629_v50, %v681_v37  ;;  %v5883_v32 = vsel %vm679_vm14, %v670_v14, %v683_v39  ;;  %v633_v41 = vpop.f32.mrb[2].mxu0  ;;  %v674_v51 = vpop.f32.mrb[2].mxu1  ;;  %v682_v59 = vmul.f32 0.2, %v631_v8  ;;  %vm678_vm15 = vcmp.gt.f32.partialorder %v631_v8, 0.0 }
 0x1da   :  { %v634_v45 = vpop.f32.mrb[3].mxu0  ;;  %v675_v49 = vpop.f32.mrb[3].mxu1  ;;  %709 = vrot.lane.b32.xlu1 %v5883_v32, %s5254_s0  ;;  %689 = vrot.lane.b32.xlu0 %v5881_v9, %s5255_s5  ;;  %v684_v7 = vmul.f32 0.2, %v672_v40  ;;  %vm680_vm13 = vcmp.gt.f32.partialorder %v672_v40, 0.0 }
 0x1db   :  { %v5909_v20 = vsel %vm678_vm15, %v631_v8, %v682_v59 }
 0x1dc   :  { %v5919_v52 = vsel %vm680_vm13, %v672_v40, %v684_v7 }
 0x1de   :  { %741 = vrot.lane.b32.xlu1 %v5883_v32, %s5257_s1  ;;  %705 = vrot.lane.b32.xlu0 %v5881_v9, %s5254_s0 }
 0x1e2   :  { %761 = vrot.lane.b32.xlu1 %v5883_v32, %s5258_s2  ;;  %693 = vrot.lane.b32.xlu0 %v5883_v32, %s5255_s5 }
 0x1e6   :  { %777 = vrot.lane.b32.xlu1 %v5883_v32, %s5259_s7  ;;  %721 = vrot.lane.b32.xlu0 %v5881_v9, %s5256_s28 }
 0x1ea   :  { %793 = vrot.lane.b32.xlu1 %v5883_v32, %s5260_s10  ;;  %737 = vrot.lane.b32.xlu0 %v5881_v9, %s5257_s1 }
 0x1ee   :  { %789 = vrot.lane.b32.xlu1 %v5881_v9, %s5260_s10  ;;  %725 = vrot.lane.b32.xlu0 %v5883_v32, %s5256_s28 }
 0x1f2   :  { %757 = vrot.lane.b32.xlu0 %v5881_v9, %s5258_s2  ;;  %691 = vrot.lane.b32.xlu1 %v5909_v20, %s5255_s5 }
 0x1f6   :  { %773 = vrot.lane.b32.xlu0 %v5881_v9, %s5259_s7  ;;  %707 = vrot.lane.b32.xlu1 %v5909_v20, %s5254_s0 }
 0x1fa   :  { %805 = vrot.lane.b32.xlu0 %v5881_v9, %s5262_s11  ;;  %711 = vrot.lane.b32.xlu1 %v5919_v52, %s5254_s0 }
 0x1fe   :  { %695 = vrot.lane.b32.xlu0 %v5919_v52, %s5255_s5  ;;  %723 = vrot.lane.b32.xlu1 %v5909_v20, %s5256_s28 }
 0x202   :  { %727 = vrot.lane.b32.xlu0 %v5919_v52, %s5256_s28  ;;  %739 = vrot.lane.b32.xlu1 %v5909_v20, %s5257_s1 }
 0x206   :  { %759 = vrot.lane.b32.xlu0 %v5909_v20, %s5258_s2  ;;  %743 = vrot.lane.b32.xlu1 %v5919_v52, %s5257_s1 }
 0x20a   :  { %775 = vrot.lane.b32.xlu0 %v5909_v20, %s5259_s7  ;;  %763 = vrot.lane.b32.xlu1 %v5919_v52, %s5258_s2 }
 0x20e   :  { %791 = vrot.lane.b32.xlu0 %v5909_v20, %s5260_s10  ;;  %795 = vrot.lane.b32.xlu1 %v5919_v52, %s5260_s10 }
 0x212   :  { %779 = vrot.lane.b32.xlu0 %v5919_v52, %s5259_s7  ;;  %807 = vrot.lane.b32.xlu1 %v5909_v20, %s5262_s11 }
 0x216   :  { %809 = vrot.lane.b32.xlu0 %v5883_v32, %s5262_s11  ;;  %811 = vrot.lane.b32.xlu1 %v5919_v52, %s5262_s11 }
 0x24c   :  { %v710_v25 = vpop.permute.xlu1 %709  ;;  %v690_v50 = vpop.permute.xlu0 %689 }
 0x250   :  { %v742_v14 = vpop.permute.xlu1 %741  ;;  %v706_v37 = vpop.permute.xlu0 %705 }
 0x254   :  { %v5953_v39 = vpop.permute.xlu1 %761  ;;  %v694_v8 = vpop.permute.xlu0 %693 }
 0x258   :  { %v5955_v40 = vpop.permute.xlu1 %777  ;;  %v722_v41 = vpop.permute.xlu0 %721 }
 0x25c   :  { %v5957_v51 = vpop.permute.xlu1 %793  ;;  %v738_v45 = vpop.permute.xlu0 %737 }
 0x260   :  { %v5959_v49 = vpop.permute.xlu1 %789  ;;  %v726_v59 = vpop.permute.xlu0 %725 }
 0x264   :  { %v5961_v7 = vpop.permute.xlu0 %757  ;;  %v692_v56 = vpop.permute.xlu1 %691 }
 0x265   :  { %v699_v2 = vsel %vm282_vm4, %v690_v50, %v692_v56 }
 0x266   :  { %v702_v5 = vmul.f32 %v699_v2, %v5615_v61  ;;  %v698_v2 = vsel %vm282_vm4, %v692_v56, %v694_v8 }
 0x267   :  { %v703_v56 = vmul.f32 %v698_v2, %v5656_v23 }
 0x268   :  { %v5965_v22 = vpop.permute.xlu0 %773  ;;  %v708_v35 = vpop.permute.xlu1 %707 }
 0x269   :  { %v715_v11 = vsel %vm315_vm5, %v706_v37, %v708_v35  ;;  %v714_v29 = vsel %vm315_vm5, %v708_v35, %v710_v25 }
 0x26a   :  { %v718_v15 = vmul.f32 %v715_v11, %v5619_v62  ;;  %v719_v11 = vmul.f32 %v714_v29, %v5660_v24 }
 0x26c   :  { %v5971_v34 = vpop.permute.xlu0 %805  ;;  %v712_v10 = vpop.permute.xlu1 %711  ;;  %v822_v4 = vpack.c.bf16 %v718_v15, %v702_v5 }
 0x26d   :  { %v713_v38 = vsel %vm315_vm5, %v710_v25, %v712_v10  ;;  %v716_v55 = vsel %vm315_vm5, %v712_v10, %v706_v37 }
 0x26e   :  { %857 = vmatprep.subr.bf16.mxu0 %v822_v4  ;;  %v717_v4 = vmul.f32 %v716_v55, %v5642_v18  ;;  %v720_v35 = vmul.f32 %v713_v38, %v5652_v21 }
 0x270   :  { %v696_v60 = vpop.permute.xlu0 %695  ;;  %v724_v31 = vpop.permute.xlu1 %723 }
 0x271   :  { %v697_v5 = vsel %vm282_vm4, %v694_v8, %v696_v60  ;;  %v700_v15 = vsel %vm282_vm4, %v696_v60, %v690_v50  ;;  %v731_v37 = vsel %vm348_vm6, %v722_v41, %v724_v31  ;;  %v823_v50 = vpack.c.bf16 %v719_v11, %v703_v56 }
 0x272   :  { %v701_v25 = vmul.f32 %v700_v15, %v5638_v17  ;;  %v704_v10 = vmul.f32 %v697_v5, %v5646_v19  ;;  %v734_v5 = vmul.f32 %v731_v37, %v5682_v47 }
 0x274   :  { %v821_v29 = vpack.c.bf16 %v717_v4, %v701_v25  ;;  %v728_v24 = vpop.permute.xlu0 %727  ;;  %v740_v62 = vpop.permute.xlu1 %739  ;;  %v824_v8 = vpack.c.bf16 %v720_v35, %v704_v10  ;;  %v754_v4 = vmul.f32 %v5909_v20, %v5726_v27  ;;  %v730_v35 = vsel %vm348_vm6, %v724_v31, %v726_v59 }
 0x275   :  { %v729_v60 = vsel %vm348_vm6, %v726_v59, %v728_v24  ;;  %v732_v55 = vsel %vm348_vm6, %v728_v24, %v722_v41  ;;  %v747_v38 = vsel %vm381_vm7, %v738_v45, %v740_v62  ;;  %v746_v2 = vsel %vm381_vm7, %v740_v62, %v742_v14 }
 0x276   :  { %v750_v15 = vmul.f32 %v747_v38, %v5686_v48  ;;  %858 = vmatpush1.bf16.msra.mxu0 %v821_v29  ;;  %898 = vmatprep.subr.bf16.mxu1 %v824_v8  ;;  %v733_v24 = vmul.f32 %v732_v55, %v5696_v1  ;;  %v736_v41 = vmul.f32 %v729_v60, %v5710_v12 }
 0x277   :  { %899 = vmatpush1.bf16.msra.mxu1 %v823_v50  ;;  %v751_v59 = vmul.f32 %v746_v2, %v5714_v13  ;;  %v735_v60 = vmul.f32 %v730_v35, %v5700_v3  ;;  %v753_v55 = vmul.f32 %v5881_v9, %v5753_v53  ;;  %v755_v2 = vmul.f32 %v5883_v32, %v5749_v46 }
 0x278   :  { %v760_v11 = vpop.permute.xlu0 %759  ;;  %v744_v25 = vpop.permute.xlu1 %743  ;;  %v826_v10 = vpack.c.bf16 %v750_v15, %v734_v5  ;;  %v756_v9 = vmul.f32 %v5919_v52, %v5757_v54 }
 0x279   :  { %v766_v37 = vsel %vm434_vm8, %v760_v11, %v5953_v39  ;;  %v767_v62 = vsel %vm434_vm8, %v5961_v7, %v760_v11  ;;  %v745_v20 = vsel %vm381_vm7, %v742_v14, %v744_v25  ;;  %v748_v31 = vsel %vm381_vm7, %v744_v25, %v738_v45 }
 0x27a   :  { %v770_v56 = vmul.f32 %v766_v37, %v5733_v30  ;;  %v749_v29 = vmul.f32 %v748_v31, %v5704_v6  ;;  %v752_v8 = vmul.f32 %v745_v20, %v5718_v16  ;;  %859 = vmatprep.subr.bf16.mxu0 %v826_v10  ;;  %v769_v38 = vmul.f32 %v767_v62, %v5768_v63 }
 0x27b   :  { %v827_v25 = vpack.c.bf16 %v751_v59, %v735_v60 }
 0x27c   :  { %v825_v14 = vpack.c.bf16 %v749_v29, %v733_v24  ;;  %v776_v50 = vpop.permute.xlu0 %775  ;;  %v764_v5 = vpop.permute.xlu1 %763  ;;  %v828_v45 = vpack.c.bf16 %v752_v8, %v736_v41  ;;  %v830_v15 = vpack.c.bf16 %v770_v56, %v754_v4 }
 0x27d   :  { %v765_v11 = vsel %vm434_vm8, %v5953_v39, %v764_v5  ;;  %v768_v35 = vsel %vm434_vm8, %v764_v5, %v5961_v7  ;;  %v783_v24 = vsel %vm467_vm9, %v5965_v22, %v776_v50  ;;  %v782_v39 = vsel %vm467_vm9, %v776_v50, %v5955_v40 }
 0x27e   :  { %v771_v4 = vmul.f32 %v765_v11, %v5763_v43  ;;  %v772_v32 = vmul.f32 %v768_v35, %v5772_v0  ;;  %860 = vmatpush1.bf16.msra.mxu0 %v825_v14  ;;  %900 = vmatprep.subr.bf16.mxu1 %v828_v45  ;;  %v829_v7 = vpack.c.bf16 %v769_v38, %v753_v55  ;;  %v7909_v11 = vld [vmem:[#allocation39_spill] sm:$0xff] }
 0x27f   :  { %861 = vmatprep.subr.bf16.mxu0 %v830_v15  ;;  %901 = vmatpush1.bf16.msra.mxu1 %v827_v25  ;;  %v785_v62 = vmul.f32 %v783_v24, %v5811_v26  ;;  %v786_v59 = vmul.f32 %v782_v39, %v5793_v42 }
 0x280   :  { %v831_v41 = vpack.c.bf16 %v771_v4, %v755_v2  ;;  %v792_v52 = vpop.permute.xlu0 %791  ;;  %v796_v10 = vpop.permute.xlu1 %795  ;;  %v832_v37 = vpack.c.bf16 %v772_v32, %v756_v9  ;;  %v7910_v9 = vld [vmem:[#allocation40_spill] sm:$0xff] }
 0x281   :  { %v798_v20 = vsel %vm500_vm10, %v792_v52, %v5957_v51  ;;  %v799_v31 = vsel %vm500_vm10, %v5959_v49, %v792_v52  ;;  %v797_v8 = vsel %vm500_vm10, %v5957_v51, %v796_v10  ;;  %v800_v60 = vsel %vm500_vm10, %v796_v10, %v5959_v49  ;;  %v7911_v52 = vld [vmem:[#allocation42_spill] sm:$0xff] }
 0x282   :  { %v801_v56 = vmul.f32 %v799_v31, %v5825_v33  ;;  %v802_v29 = vmul.f32 %v798_v20, %v5797_v44  ;;  %862 = vmatpush1.bf16.msra.mxu0 %v829_v7  ;;  %902 = vmatprep.subr.bf16.mxu1 %v832_v37  ;;  %v803_v5 = vmul.f32 %v797_v8, %v5815_v28  ;;  %v7912_v37 = vld [vmem:[#allocation43_spill] sm:$0xff]  ;;  %v7913_v20 = vld [vmem:[#allocation41_spill] sm:$0xff] }
 0x283   :  { %903 = vmatpush1.bf16.msra.mxu1 %v831_v41  ;;  %v804_v15 = vmul.f32 %v800_v60, %v5829_v36  ;;  %v841_v60 = vld [vmem:[%s5291_s17] sm:$0xf]  ;;  %s7918_s17 = sld [smem:[#allocation9_spill]] }
 0x284   :  { %v833_v55 = vpack.c.bf16 %v801_v56, %v785_v62  ;;  %v780_v38 = vpop.permute.xlu0 %779  ;;  %v808_v14 = vpop.permute.xlu1 %807  ;;  %v834_v50 = vpack.c.bf16 %v802_v29, %v786_v59 }
 0x285   :  { %v781_v45 = vsel %vm467_vm9, %v5955_v40, %v780_v38  ;;  %v784_v51 = vsel %vm467_vm9, %v780_v38, %v5965_v22  ;;  %v815_v49 = vsel %vm533_vm11, %v5971_v34, %v808_v14 }
 0x286   :  { %v787_v2 = vmul.f32 %v781_v45, %v5807_v58  ;;  %v788_v35 = vmul.f32 %v784_v51, %v7909_v11  ;;  %v817_v25 = vmul.f32 %v7910_v9, %v815_v49  ;;  %863 = vmatprep.subr.bf16.mxu0 %v834_v50 }
 0x287   :  { %864 = vmatpush1.bf16.msra.mxu0 %v833_v55  ;;  %v7914_v55 = vmov 0  }
 0x288   :  { %v835_v24 = vpack.c.bf16 %v803_v5, %v787_v2  ;;  %v810_v40 = vpop.permute.xlu0 %809  ;;  %v812_v4 = vpop.permute.xlu1 %811  ;;  %v836_v32 = vpack.c.bf16 %v804_v15, %v788_v35  ;;  %v837_v41 = vpack.c.bf16 %v817_v25, %v817_v25 }
 0x289   :  { %v814_v22 = vsel %vm533_vm11, %v808_v14, %v810_v40  ;;  %v813_v39 = vsel %vm533_vm11, %v810_v40, %v812_v4  ;;  %v816_v7 = vsel %vm533_vm11, %v812_v4, %v5971_v34 }
 0x28a   :  { %v818_v10 = vmul.f32 %v7911_v52, %v814_v22  ;;  %v819_v62 = vmul.f32 %v7912_v37, %v813_v39  ;;  %v820_v31 = vmul.f32 %v7913_v20, %v816_v7  ;;  %904 = vmatprep.subr.bf16.mxu1 %v836_v32  ;;  %v846_v8 = vsel %vm267_vm3, %v837_v41, 0  ;;  %v977_v41 = vld [vmem:[%s5316_s8] sm:$0xff]  ;;  %s7923_s8 = sld [smem:[#allocation14_spill]] }
 0x28b   :  { %905 = vmatpush1.bf16.msra.mxu1 %v835_v24 }
 0x28c   :  { %v838_v59 = vpack.c.bf16 %v818_v10, %v818_v10  ;;  %v839_v56 = vpack.c.bf16 %v819_v62, %v819_v62  ;;  %v840_v29 = vpack.c.bf16 %v820_v31, %v820_v31  ;;  %v967_v10 = vld [vmem:[%s5311_s3] sm:$0xff]  ;;  %s5263_s3 = smov 96  }
 0x28e   :  { %4755 = vmatprep.subr.msk.bf16.mxu0 %vm267_vm3, %v838_v59  ;;  %4757 = vmatprep.subr.msk.bf16.mxu1 %vm267_vm3, %v840_v29  ;;  %v852_v34 = vsel %vm267_vm3, %v839_v56, 0 }
 0x28f   :  { %866 = vmatpush1.bf16.msra.mxu0 %v846_v8  ;;  %907 = vmatpush1.bf16.msra.mxu1 %v852_v34 }
 0x292   :  { %4756 = vmatmul.mubr.msk.bf16.vlgmr.msra.gmra.mrb[4].mxu0 %vm7868_vm12, %v841_v60  ;;  %4758 = vmatmul.mubr.msk.bf16.vlgmr.msra.gmra.mrb[4].mxu1 %vm7868_vm12, %v841_v60 }
 0x293   :  { %1199 = vmatprep.mubr.bf16.mxu0 %v7914_v55  ;;  %1240 = vmatprep.mubr.bf16.mxu1 %v7914_v55 }
 0x365   :  { %v891_v38 = vpop.f32.mrb[4].mxu0  ;;  %v932_v14 = vpop.f32.mrb[4].mxu1 }
 0x366   :  { %v945_v50 = vmul.f32 %v891_v38, %v891_v38  ;;  %v893_v5 = vpop.f32.mrb[5].mxu0  ;;  %v934_v45 = vpop.f32.mrb[5].mxu1  ;;  %v947_v51 = vmul.f32 %v932_v14, %v932_v14 }
 0x367   :  { %v939_v49 = vadd.f32 %v893_v5, %v891_v38  ;;  %v946_v15 = vmul.f32 %v893_v5, %v893_v5  ;;  %v895_v2 = vpop.f32.mrb[6].mxu0  ;;  %v936_v35 = vpop.f32.mrb[6].mxu1  ;;  %v948_v22 = vmul.f32 %v934_v45, %v934_v45 }
 0x368   :  { %v896_v25 = vpop.f32.mrb[7].mxu0  ;;  %v937_v24 = vpop.f32.mrb[7].mxu1 }
 0x369   :  { %v940_v40 = vadd.f32 %v939_v49, %v932_v14  ;;  %v949_v4 = vadd.f32 %v946_v15, %v945_v50 }
 0x36b   :  { %v941_v32 = vadd.f32 %v940_v40, %v934_v45  ;;  %v950_v39 = vadd.f32 %v949_v4, %v947_v51 }
 0x36d   :  { %942 = vadd.xlane.f32.xlu0 %v941_v32  ;;  %v951_v7 = vadd.f32 %v950_v39, %v948_v22 }
 0x36f   :  { %952 = vadd.xlane.f32.xlu1 %v951_v7 }
 0x380   :  { %980 = vperm.xlu1 %5037, %v977_v41  }
 0x383   :  { %970 = vperm.xlu0 %5036, %v967_v10  }
 0x3fa   :  { %v943_v62 = vpop.xlane.xlu0 %942 }
 0x3fb   :  { %v944_v31 = vmul.f32 0.001953125, %v943_v62 }
 0x3fc   :  { %v953_v59 = vpop.xlane.xlu1 %952 }
 0x3fd   :  { %v954_v56 = vmul.f32 0.001953125, %v953_v59  ;;  %v955_v29 = vmul.f32 %v944_v31, %v944_v31  ;;  %v957_v60 = vsub.f32 %v891_v38, %v944_v31  ;;  %v958_v50 = vsub.f32 %v893_v5, %v944_v31 }
 0x3fe   :  { %v959_v49 = vsub.f32 %v932_v14, %v944_v31  ;;  %v960_v22 = vsub.f32 %v934_v45, %v944_v31 }
 0x3ff   :  { %v956_v8 = vsub.f32 %v954_v56, %v955_v29 }
 0x400   :  { %v981_v24 = vpop.permute.xlu1 %980 }
 0x401   :  { %v961_v34 = vadd.f32 1e-05, %v956_v8 }
 0x402   :  { %v971_v51 = vpop.permute.xlu0 %970 }
 0x403   :  { %5102 = vrsqrt.f32 %v961_v34 }
 0x40d   :  { %v5103_v15 = vpop.eup %5102 }
 0x40e   :  { %v963_v2 = vmul.f32 %v5103_v15, %v957_v60  ;;  %v964_v35 = vmul.f32 %v5103_v15, %v958_v50  ;;  %v965_v25 = vmul.f32 %v5103_v15, %v959_v49  ;;  %v966_v41 = vmul.f32 %v5103_v15, %v960_v22 }
 0x410   :  { %v973_v40 = vmul.f32 %v971_v51, %v963_v2  ;;  %v974_v4 = vmul.f32 %v971_v51, %v964_v35  ;;  %v975_v32 = vmul.f32 %v971_v51, %v965_v25  ;;  %v976_v5 = vmul.f32 %v971_v51, %v966_v41 }
 0x412   :  { %v983_v39 = vadd.f32 %v981_v24, %v973_v40  ;;  %v985_v7 = vadd.f32 %v981_v24, %v975_v32  ;;  %v984_v10 = vadd.f32 %v981_v24, %v974_v4  ;;  %v986_v45 = vadd.f32 %v981_v24, %v976_v5  ;;  %v7915_v4 = vld [vmem:[#allocation37_spill] sm:$0xff] }
 0x414   :  { %vm987_vm14 = vcmp.gt.f32.partialorder %v983_v39, 0.0  ;;  %vm989_vm15 = vcmp.gt.f32.partialorder %v985_v7, 0.0  ;;  %v991_v62 = vmul.f32 0.2, %v983_v39  ;;  %v993_v38 = vmul.f32 0.2, %v985_v7 }
 0x415   :  { %v992_v14 = vmul.f32 0.2, %v984_v10  ;;  %vm988_vm13 = vcmp.gt.f32.partialorder %v984_v10, 0.0  ;;  %v994_v29 = vmul.f32 0.2, %v986_v45 }
 0x416   :  { %v6096_v59 = vsel %vm987_vm14, %v983_v39, %v991_v62  ;;  %v6098_v56 = vsel %vm989_vm15, %v985_v7, %v993_v38  ;;  %vm990_vm14 = vcmp.gt.f32.partialorder %v986_v45, 0.0 }
 0x417   :  { %1003 = vrot.lane.b32.xlu0 %v6098_v56, %s5255_s5  ;;  %999 = vrot.lane.b32.xlu1 %v6096_v59, %s5255_s5  ;;  %v6104_v31 = vsel %vm988_vm13, %v984_v10, %v992_v14  ;;  %v6114_v8 = vsel %vm990_vm14, %v986_v45, %v994_v29 }
 0x41b   :  { %1031 = vrot.lane.b32.xlu0 %v6096_v59, %s5256_s28  ;;  %1001 = vrot.lane.b32.xlu1 %v6104_v31, %s5255_s5 }
 0x41f   :  { %1047 = vrot.lane.b32.xlu0 %v6096_v59, %s5257_s1  ;;  %1015 = vrot.lane.b32.xlu1 %v6096_v59, %s5254_s0 }
 0x423   :  { %1037 = vrot.lane.b32.xlu0 %v6114_v8, %s5256_s28  ;;  %1017 = vrot.lane.b32.xlu1 %v6104_v31, %s5254_s0 }
 0x427   :  { %1035 = vrot.lane.b32.xlu0 %v6098_v56, %s5256_s28  ;;  %1005 = vrot.lane.b32.xlu1 %v6114_v8, %s5255_s5 }
 0x42b   :  { %1069 = vrot.lane.b32.xlu0 %v6104_v31, %s5258_s2  ;;  %1021 = vrot.lane.b32.xlu1 %v6114_v8, %s5254_s0 }
 0x42f   :  { %1067 = vrot.lane.b32.xlu0 %v6096_v59, %s5258_s2  ;;  %1019 = vrot.lane.b32.xlu1 %v6098_v56, %s5254_s0 }
 0x433   :  { %1085 = vrot.lane.b32.xlu0 %v6104_v31, %s5259_s7  ;;  %1033 = vrot.lane.b32.xlu1 %v6104_v31, %s5256_s28 }
 0x437   :  { %1101 = vrot.lane.b32.xlu0 %v6104_v31, %s5260_s10  ;;  %1049 = vrot.lane.b32.xlu1 %v6104_v31, %s5257_s1 }
 0x43b   :  { %1083 = vrot.lane.b32.xlu0 %v6096_v59, %s5259_s7  ;;  %1053 = vrot.lane.b32.xlu1 %v6114_v8, %s5257_s1 }
 0x43f   :  { %1089 = vrot.lane.b32.xlu0 %v6114_v8, %s5259_s7  ;;  %1051 = vrot.lane.b32.xlu1 %v6098_v56, %s5257_s1 }
 0x443   :  { %1115 = vrot.lane.b32.xlu0 %v6096_v59, %s5262_s11  ;;  %1071 = vrot.lane.b32.xlu1 %v6098_v56, %s5258_s2 }
 0x447   :  { %1119 = vrot.lane.b32.xlu0 %v6098_v56, %s5262_s11  ;;  %1073 = vrot.lane.b32.xlu1 %v6114_v8, %s5258_s2 }
 0x44b   :  { %1087 = vrot.lane.b32.xlu1 %v6098_v56, %s5259_s7 }
 0x44f   :  { %1103 = vrot.lane.b32.xlu1 %v6098_v56, %s5260_s10 }
 0x453   :  { %1099 = vrot.lane.b32.xlu1 %v6096_v59, %s5260_s10 }
 0x457   :  { %1105 = vrot.lane.b32.xlu1 %v6114_v8, %s5260_s10 }
 0x45b   :  { %1117 = vrot.lane.b32.xlu1 %v6104_v31, %s5262_s11 }
 0x45f   :  { %1121 = vrot.lane.b32.xlu1 %v6114_v8, %s5262_s11 }
 0x489   :  { %v1004_v34 = vpop.permute.xlu0 %1003  ;;  %v1000_v60 = vpop.permute.xlu1 %999 }
 0x48d   :  { %v1032_v50 = vpop.permute.xlu0 %1031  ;;  %v1002_v49 = vpop.permute.xlu1 %1001 }
 0x48e   :  { %v1009_v2 = vsel %vm282_vm4, %v1000_v60, %v1002_v49  ;;  %v1008_v14 = vsel %vm282_vm4, %v1002_v49, %v1004_v34 }
 0x48f   :  { %v1012_v24 = vmul.f32 %v1009_v2, %v5615_v61 }
 0x491   :  { %v1048_v15 = vpop.permute.xlu0 %1047  ;;  %v1016_v51 = vpop.permute.xlu1 %1015 }
 0x495   :  { %v1018_v35 = vpop.permute.xlu1 %1017  ;;  %v1038_v40 = vpop.permute.xlu0 %1037 }
 0x496   :  { %v1025_v25 = vsel %vm315_vm5, %v1016_v51, %v1018_v35 }
 0x497   :  { %v1028_v32 = vmul.f32 %v1025_v25, %v7915_v4 }
 0x499   :  { %v1006_v22 = vpop.permute.xlu1 %1005  ;;  %v1132_v39 = vpack.c.bf16 %v1028_v32, %v1012_v24  ;;  %v1036_v41 = vpop.permute.xlu0 %1035 }
 0x49a   :  { %v1010_v7 = vsel %vm282_vm4, %v1006_v22, %v1000_v60  ;;  %v1007_v45 = vsel %vm282_vm4, %v1004_v34, %v1006_v22 }
 0x49b   :  { %1167 = vmatprep.subr.bf16.mxu0 %v1132_v39  ;;  %v1011_v38 = vmul.f32 %v1010_v7, %v5638_v17  ;;  %v1014_v24 = vmul.f32 %v1007_v45, %v5646_v19  ;;  %v7916_v39 = vld [vmem:[#allocation38_spill] sm:$0xff] }
 0x49d   :  { %v1022_v10 = vpop.permute.xlu1 %1021  ;;  %v1070_v32 = vpop.permute.xlu0 %1069 }
 0x49e   :  { %v1026_v62 = vsel %vm315_vm5, %v1022_v10, %v1016_v51  ;;  %v1013_v51 = vmul.f32 %v1008_v14, %v5656_v23 }
 0x49f   :  { %v1027_v5 = vmul.f32 %v1026_v62, %v5642_v18 }
 0x4a1   :  { %v1131_v29 = vpack.c.bf16 %v1027_v5, %v1011_v38  ;;  %v1020_v2 = vpop.permute.xlu1 %1019  ;;  %v1068_v38 = vpop.permute.xlu0 %1067 }
 0x4a2   :  { %v1023_v60 = vsel %vm315_vm5, %v1020_v2, %v1022_v10  ;;  %v1024_v25 = vsel %vm315_vm5, %v1018_v35, %v1020_v2 }
 0x4a3   :  { %v1029_v7 = vmul.f32 %v1024_v25, %v7916_v39  ;;  %v1030_v49 = vmul.f32 %v1023_v60, %v5652_v21  ;;  %1168 = vmatpush1.bf16.msra.mxu0 %v1131_v29  ;;  %v1042_v29 = vsel %vm348_vm6, %v1038_v40, %v1032_v50 }
 0x4a5   :  { %v1133_v62 = vpack.c.bf16 %v1029_v7, %v1013_v51  ;;  %v1034_v34 = vpop.permute.xlu1 %1033  ;;  %v1134_v22 = vpack.c.bf16 %v1030_v49, %v1014_v24  ;;  %v1043_v51 = vmul.f32 %v1042_v29, %v5696_v1  ;;  %v1039_v24 = vsel %vm348_vm6, %v1036_v41, %v1038_v40  ;;  %v1086_v7 = vpop.permute.xlu0 %1085 }
 0x4a6   :  { %v1041_v10 = vsel %vm348_vm6, %v1032_v50, %v1034_v34  ;;  %v1046_v50 = vmul.f32 %v1039_v24, %v5710_v12  ;;  %v1077_v40 = vsel %vm434_vm8, %v1068_v38, %v1070_v32  ;;  %v1064_v24 = vmul.f32 %v6104_v31, %v5726_v27 }
 0x4a7   :  { %1208 = vmatprep.subr.bf16.mxu1 %v1134_v22  ;;  %v1044_v14 = vmul.f32 %v1041_v10, %v5682_v47 }
 0x4a8   :  { %1209 = vmatpush1.bf16.msra.mxu1 %v1133_v62  ;;  %v1040_v62 = vsel %vm348_vm6, %v1034_v34, %v1036_v41 }
 0x4a9   :  { %v1050_v35 = vpop.permute.xlu1 %1049  ;;  %v1102_v41 = vpop.permute.xlu0 %1101 }
 0x4aa   :  { %v1057_v5 = vsel %vm381_vm7, %v1048_v15, %v1050_v35 }
 0x4ab   :  { %v1060_v45 = vmul.f32 %v1057_v5, %v5686_v48 }
 0x4ad   :  { %v1054_v2 = vpop.permute.xlu1 %1053  ;;  %v1136_v60 = vpack.c.bf16 %v1060_v45, %v1044_v14  ;;  %v1045_v14 = vmul.f32 %v1040_v62, %v5700_v3 }
 0x4ae   :  { %v1058_v25 = vsel %vm381_vm7, %v1054_v2, %v1048_v15 }
 0x4af   :  { %v1059_v49 = vmul.f32 %v1058_v25, %v5704_v6  ;;  %1169 = vmatprep.subr.bf16.mxu0 %v1136_v60 }
 0x4b1   :  { %v1135_v22 = vpack.c.bf16 %v1059_v49, %v1043_v51  ;;  %v1052_v10 = vpop.permute.xlu1 %1051  ;;  %v1079_v51 = vmul.f32 %v1077_v40, %v5768_v63  ;;  %v1063_v49 = vmul.f32 %v6096_v59, %v5753_v53  ;;  %v1066_v59 = vmul.f32 %v6114_v8, %v5757_v54 }
 0x4b2   :  { %v1055_v5 = vsel %vm381_vm7, %v1052_v10, %v1054_v2  ;;  %v1056_v15 = vsel %vm381_vm7, %v1050_v35, %v1052_v10 }
 0x4b3   :  { %v1061_v45 = vmul.f32 %v1056_v15, %v5714_v13  ;;  %v1062_v29 = vmul.f32 %v1055_v5, %v5718_v16  ;;  %1170 = vmatpush1.bf16.msra.mxu0 %v1135_v22  ;;  %v1139_v10 = vpack.c.bf16 %v1079_v51, %v1063_v49  ;;  %v1065_v15 = vmul.f32 %v6098_v56, %v5749_v46 }
 0x4b5   :  { %v1137_v34 = vpack.c.bf16 %v1061_v45, %v1045_v14  ;;  %v1072_v60 = vpop.permute.xlu1 %1071  ;;  %v1138_v25 = vpack.c.bf16 %v1062_v29, %v1046_v50 }
 0x4b6   :  { %v1076_v2 = vsel %vm434_vm8, %v1070_v32, %v1072_v60  ;;  %v1084_v32 = vpop.permute.xlu0 %1083 }
 0x4b7   :  { %v1080_v35 = vmul.f32 %v1076_v2, %v5733_v30  ;;  %1210 = vmatprep.subr.bf16.mxu1 %v1138_v25  ;;  %v1093_v8 = vsel %vm467_vm9, %v1084_v32, %v1086_v7 }
 0x4b8   :  { %1211 = vmatpush1.bf16.msra.mxu1 %v1137_v34  ;;  %v1095_v49 = vmul.f32 %v1093_v8, %v5811_v26 }
 0x4b9   :  { %v1074_v62 = vpop.permute.xlu1 %1073  ;;  %v1140_v22 = vpack.c.bf16 %v1080_v35, %v1064_v24 }
 0x4ba   :  { %v1075_v50 = vsel %vm434_vm8, %v1072_v60, %v1074_v62  ;;  %v1078_v5 = vsel %vm434_vm8, %v1074_v62, %v1068_v38  ;;  %v1090_v34 = vpop.permute.xlu0 %1089 }
 0x4bb   :  { %v1081_v40 = vmul.f32 %v1075_v50, %v5763_v43  ;;  %v1082_v31 = vmul.f32 %v1078_v5, %v5772_v0  ;;  %1171 = vmatprep.subr.bf16.mxu0 %v1140_v22 }
 0x4bc   :  { %1172 = vmatpush1.bf16.msra.mxu0 %v1139_v10  ;;  %v1094_v10 = vsel %vm467_vm9, %v1090_v34, %v1084_v32 }
 0x4bd   :  { %v1141_v14 = vpack.c.bf16 %v1081_v40, %v1065_v15  ;;  %v1088_v45 = vpop.permute.xlu1 %1087  ;;  %v1142_v29 = vpack.c.bf16 %v1082_v31, %v1066_v59  ;;  %v1098_v40 = vmul.f32 %v1094_v10, %v7909_v11 }
 0x4be   :  { %v1092_v38 = vsel %vm467_vm9, %v1086_v7, %v1088_v45  ;;  %v1116_v62 = vpop.permute.xlu0 %1115  ;;  %v1091_v50 = vsel %vm467_vm9, %v1088_v45, %v1090_v34 }
 0x4bf   :  { %1212 = vmatprep.subr.bf16.mxu1 %v1142_v29  ;;  %v1096_v25 = vmul.f32 %v1092_v38, %v5793_v42  ;;  %v1097_v31 = vmul.f32 %v1091_v50, %v5807_v58 }
 0x4c0   :  { %1213 = vmatpush1.bf16.msra.mxu1 %v1141_v14 }
 0x4c1   :  { %v1104_v60 = vpop.permute.xlu1 %1103 }
 0x4c2   :  { %v1108_v56 = vsel %vm500_vm10, %v1102_v41, %v1104_v60  ;;  %v1120_v32 = vpop.permute.xlu0 %1119 }
 0x4c3   :  { %v1112_v51 = vmul.f32 %v1108_v56, %v5797_v44 }
 0x4c5   :  { %v1100_v2 = vpop.permute.xlu1 %1099  ;;  %v1144_v35 = vpack.c.bf16 %v1112_v51, %v1096_v25 }
 0x4c6   :  { %v1109_v24 = vsel %vm500_vm10, %v1100_v2, %v1102_v41 }
 0x4c7   :  { %v1111_v22 = vmul.f32 %v1109_v24, %v5825_v33  ;;  %1173 = vmatprep.subr.bf16.mxu0 %v1144_v35 }
 0x4c9   :  { %v1143_v5 = vpack.c.bf16 %v1111_v22, %v1095_v49  ;;  %v1106_v15 = vpop.permute.xlu1 %1105 }
 0x4ca   :  { %v1107_v7 = vsel %vm500_vm10, %v1104_v60, %v1106_v15  ;;  %v1110_v41 = vsel %vm500_vm10, %v1106_v15, %v1100_v2 }
 0x4cb   :  { %v1113_v59 = vmul.f32 %v1107_v7, %v5815_v28  ;;  %v1114_v14 = vmul.f32 %v1110_v41, %v5829_v36  ;;  %1174 = vmatpush1.bf16.msra.mxu0 %v1143_v5 }
 0x4cd   :  { %v1145_v29 = vpack.c.bf16 %v1113_v59, %v1097_v31  ;;  %v1118_v45 = vpop.permute.xlu1 %1117  ;;  %v1146_v38 = vpack.c.bf16 %v1114_v14, %v1098_v40 }
 0x4ce   :  { %v1124_v34 = vsel %vm533_vm11, %v1118_v45, %v1120_v32  ;;  %v1125_v60 = vsel %vm533_vm11, %v1116_v62, %v1118_v45 }
 0x4cf   :  { %v1127_v56 = vmul.f32 %v7910_v9, %v1125_v60  ;;  %v1128_v25 = vmul.f32 %v7911_v52, %v1124_v34  ;;  %1214 = vmatprep.subr.bf16.mxu1 %v1146_v38  ;;  %v1151_v52 = vld [vmem:[%s5296_s21] sm:$0xf]  ;;  %s7919_s21 = sld [smem:[#allocation13_spill]] }
 0x4d0   :  { %1215 = vmatpush1.bf16.msra.mxu1 %v1145_v29 }
 0x4d1   :  { %v1147_v51 = vpack.c.bf16 %v1127_v56, %v1127_v56  ;;  %v1148_v8 = vpack.c.bf16 %v1128_v25, %v1128_v25  ;;  %v1122_v2 = vpop.permute.xlu1 %1121 }
 0x4d2   :  { %v1123_v35 = vsel %vm533_vm11, %v1120_v32, %v1122_v2  ;;  %v1126_v24 = vsel %vm533_vm11, %v1122_v2, %v1116_v62 }
 0x4d3   :  { %v1129_v49 = vmul.f32 %v7912_v37, %v1123_v35  ;;  %v1130_v22 = vmul.f32 %v7913_v20, %v1126_v24  ;;  %4759 = vmatprep.subr.msk.bf16.mxu0 %vm267_vm3, %v1148_v8  ;;  %v1156_v9 = vsel %vm267_vm3, %v1147_v51, 0  ;;  %v1287_v51 = vld [vmem:[%s5326_s19] sm:$0xff]  ;;  %s7937_s19 = sld [smem:[#allocation21_spill]] }
 0x4d4   :  { %1176 = vmatpush1.bf16.msra.mxu0 %v1156_v9  ;;  %v1277_v8 = vld [vmem:[%s5321_s14] sm:$0xff]  ;;  %s7933_s14 = sld [smem:[#allocation15_spill]] }
 0x4d5   :  { %v1149_v10 = vpack.c.bf16 %v1129_v49, %v1129_v49  ;;  %v1150_v50 = vpack.c.bf16 %v1130_v22, %v1130_v22 }
 0x4d7   :  { %4760 = vmatmul.mubr.msk.bf16.vlgmr.msra.gmra.mrb[8].mxu0 %vm7868_vm12, %v1151_v52  ;;  %4761 = vmatprep.subr.msk.bf16.mxu1 %vm267_vm3, %v1150_v50  ;;  %v1162_v5 = vsel %vm267_vm3, %v1149_v10, 0 }
 0x4d8   :  { %1217 = vmatpush1.bf16.msra.mxu1 %v1162_v5  ;;  %1509 = vmatprep.mubr.bf16.mxu0 %v7914_v55 }
 0x4db   :  { %4762 = vmatmul.mubr.msk.bf16.vlgmr.msra.gmra.mrb[8].mxu1 %vm7868_vm12, %v1151_v52 }
 0x4dc   :  { %1550 = vmatprep.mubr.bf16.mxu1 %v7914_v55 }
 0x5aa   :  { %v1201_v37 = vpop.f32.mrb[8].mxu0 }
 0x5ab   :  { %v1255_v20 = vmul.f32 %v1201_v37, %v1201_v37  ;;  %v1203_v62 = vpop.f32.mrb[9].mxu0 }
 0x5ac   :  { %v1249_v15 = vadd.f32 %v1203_v62, %v1201_v37  ;;  %v1256_v7 = vmul.f32 %v1203_v62, %v1203_v62  ;;  %v1205_v41 = vpop.f32.mrb[10].mxu0 }
 0x5ad   :  { %v1206_v40 = vpop.f32.mrb[11].mxu0 }
 0x5ae   :  { %v1259_v31 = vadd.f32 %v1256_v7, %v1255_v20  ;;  %v1242_v59 = vpop.f32.mrb[8].mxu1 }
 0x5af   :  { %v1257_v14 = vmul.f32 %v1242_v59, %v1242_v59  ;;  %v1244_v32 = vpop.f32.mrb[9].mxu1  ;;  %v1250_v29 = vadd.f32 %v1249_v15, %v1242_v59 }
 0x5b0   :  { %v1258_v45 = vmul.f32 %v1244_v32, %v1244_v32  ;;  %v1246_v38 = vpop.f32.mrb[10].mxu1 }
 0x5b1   :  { %v1260_v34 = vadd.f32 %v1259_v31, %v1257_v14  ;;  %v1247_v60 = vpop.f32.mrb[11].mxu1  ;;  %v1251_v56 = vadd.f32 %v1250_v29, %v1244_v32 }
 0x5b3   :  { %1252 = vadd.xlane.f32.xlu0 %v1251_v56  ;;  %v1261_v25 = vadd.f32 %v1260_v34, %v1258_v45 }
 0x5b5   :  { %1262 = vadd.xlane.f32.xlu1 %v1261_v25 }
 0x5c6   :  { %1290 = vperm.xlu1 %5037, %v1287_v51  }
 0x5c9   :  { %1280 = vperm.xlu0 %5036, %v1277_v8  }
 0x640   :  { %v1253_v2 = vpop.xlane.xlu0 %1252 }
 0x641   :  { %v1254_v35 = vmul.f32 0.001953125, %v1253_v2 }
 0x642   :  { %v1263_v24 = vpop.xlane.xlu1 %1262 }
 0x643   :  { %v1264_v49 = vmul.f32 0.001953125, %v1263_v24  ;;  %v1265_v22 = vmul.f32 %v1254_v35, %v1254_v35  ;;  %v1267_v10 = vsub.f32 %v1201_v37, %v1254_v35  ;;  %v1268_v50 = vsub.f32 %v1203_v62, %v1254_v35 }
 0x644   :  { %v1270_v20 = vsub.f32 %v1244_v32, %v1254_v35  ;;  %v1269_v45 = vsub.f32 %v1242_v59, %v1254_v35 }
 0x645   :  { %v1266_v9 = vsub.f32 %v1264_v49, %v1265_v22 }
 0x646   :  { %v1291_v29 = vpop.permute.xlu1 %1290 }
 0x647   :  { %v1271_v52 = vadd.f32 1e-05, %v1266_v9 }
 0x648   :  { %v1281_v40 = vpop.permute.xlu0 %1280 }
 0x649   :  { %5104 = vrsqrt.f32 %v1271_v52 }
 0x653   :  { %v5105_v5 = vpop.eup %5104 }
 0x654   :  { %v1273_v15 = vmul.f32 %v5105_v5, %v1267_v10  ;;  %v1274_v7 = vmul.f32 %v5105_v5, %v1268_v50  ;;  %v1276_v41 = vmul.f32 %v5105_v5, %v1270_v20  ;;  %v1275_v60 = vmul.f32 %v5105_v5, %v1269_v45 }
 0x656   :  { %v1283_v31 = vmul.f32 %v1281_v40, %v1273_v15  ;;  %v1284_v14 = vmul.f32 %v1281_v40, %v1274_v7  ;;  %v1286_v56 = vmul.f32 %v1281_v40, %v1276_v41  ;;  %v1285_v37 = vmul.f32 %v1281_v40, %v1275_v60 }
 0x658   :  { %v1293_v38 = vadd.f32 %v1291_v29, %v1283_v31  ;;  %v1294_v34 = vadd.f32 %v1291_v29, %v1284_v14  ;;  %v1296_v62 = vadd.f32 %v1291_v29, %v1286_v56  ;;  %v1295_v59 = vadd.f32 %v1291_v29, %v1285_v37 }
 0x65a   :  { %vm1297_vm15 = vcmp.gt.f32.partialorder %v1293_v38, 0.0  ;;  %vm1298_vm13 = vcmp.gt.f32.partialorder %v1294_v34, 0.0  ;;  %v1301_v25 = vmul.f32 0.2, %v1293_v38  ;;  %v1302_v51 = vmul.f32 0.2, %v1294_v34 }
 0x65b   :  { %v1304_v2 = vmul.f32 0.2, %v1296_v62  ;;  %vm1300_vm14 = vcmp.gt.f32.partialorder %v1296_v62, 0.0  ;;  %v1303_v35 = vmul.f32 0.2, %v1295_v59 }
 0x65c   :  { %v6283_v8 = vsel %vm1297_vm15, %v1293_v38, %v1301_v25  ;;  %v6285_v32 = vsel %vm1298_vm13, %v1294_v34, %v1302_v51  ;;  %vm1299_vm15 = vcmp.gt.f32.partialorder %v1295_v59, 0.0 }
 0x65d   :  { %1311 = vrot.lane.b32.xlu1 %v6285_v32, %s5255_s5  ;;  %1309 = vrot.lane.b32.xlu0 %v6283_v8, %s5255_s5  ;;  %v6295_v24 = vsel %vm1300_vm14, %v1296_v62, %v1304_v2  ;;  %v6301_v49 = vsel %vm1299_vm15, %v1295_v59, %v1303_v35 }
 0x661   :  { %1327 = vrot.lane.b32.xlu1 %v6285_v32, %s5254_s0  ;;  %1325 = vrot.lane.b32.xlu0 %v6283_v8, %s5254_s0 }
 0x665   :  { %1331 = vrot.lane.b32.xlu1 %v6295_v24, %s5254_s0  ;;  %1315 = vrot.lane.b32.xlu0 %v6295_v24, %s5255_s5 }
 0x669   :  { %1329 = vrot.lane.b32.xlu1 %v6301_v49, %s5254_s0  ;;  %1313 = vrot.lane.b32.xlu0 %v6301_v49, %s5255_s5 }
 0x66d   :  { %1343 = vrot.lane.b32.xlu1 %v6285_v32, %s5256_s28  ;;  %1341 = vrot.lane.b32.xlu0 %v6283_v8, %s5256_s28 }
 0x671   :  { %1359 = vrot.lane.b32.xlu1 %v6285_v32, %s5257_s1  ;;  %1357 = vrot.lane.b32.xlu0 %v6283_v8, %s5257_s1 }
 0x675   :  { %1363 = vrot.lane.b32.xlu1 %v6295_v24, %s5257_s1  ;;  %1347 = vrot.lane.b32.xlu0 %v6295_v24, %s5256_s28 }
 0x679   :  { %1361 = vrot.lane.b32.xlu1 %v6301_v49, %s5257_s1  ;;  %1345 = vrot.lane.b32.xlu0 %v6301_v49, %s5256_s28 }
 0x67d   :  { %1381 = vrot.lane.b32.xlu1 %v6301_v49, %s5258_s2  ;;  %1379 = vrot.lane.b32.xlu0 %v6285_v32, %s5258_s2 }
 0x681   :  { %1383 = vrot.lane.b32.xlu1 %v6295_v24, %s5258_s2  ;;  %1377 = vrot.lane.b32.xlu0 %v6283_v8, %s5258_s2 }
 0x685   :  { %1397 = vrot.lane.b32.xlu1 %v6301_v49, %s5259_s7  ;;  %1395 = vrot.lane.b32.xlu0 %v6285_v32, %s5259_s7 }
 0x689   :  { %1413 = vrot.lane.b32.xlu1 %v6301_v49, %s5260_s10  ;;  %1411 = vrot.lane.b32.xlu0 %v6285_v32, %s5260_s10 }
 0x68d   :  { %1409 = vrot.lane.b32.xlu1 %v6283_v8, %s5260_s10  ;;  %1393 = vrot.lane.b32.xlu0 %v6283_v8, %s5259_s7 }
 0x691   :  { %1415 = vrot.lane.b32.xlu1 %v6295_v24, %s5260_s10  ;;  %1399 = vrot.lane.b32.xlu0 %v6295_v24, %s5259_s7 }
 0x695   :  { %1427 = vrot.lane.b32.xlu1 %v6285_v32, %s5262_s11  ;;  %1425 = vrot.lane.b32.xlu0 %v6283_v8, %s5262_s11 }
 0x699   :  { %1431 = vrot.lane.b32.xlu1 %v6295_v24, %s5262_s11  ;;  %1429 = vrot.lane.b32.xlu0 %v6301_v49, %s5262_s11 }
 0x6cf   :  { %v1312_v22 = vpop.permute.xlu1 %1311  ;;  %v1310_v9 = vpop.permute.xlu0 %1309 }
 0x6d0   :  { %v1319_v52 = vsel %vm282_vm4, %v1310_v9, %v1312_v22 }
 0x6d1   :  { %v1322_v20 = vmul.f32 %v1319_v52, %v5615_v61 }
 0x6d3   :  { %v1328_v10 = vpop.permute.xlu1 %1327  ;;  %v1326_v50 = vpop.permute.xlu0 %1325 }
 0x6d4   :  { %v1335_v5 = vsel %vm315_vm5, %v1326_v50, %v1328_v10 }
 0x6d5   :  { %v1338_v15 = vmul.f32 %v1335_v5, %v7915_v4 }
 0x6d7   :  { %v1332_v7 = vpop.permute.xlu1 %1331  ;;  %v1316_v41 = vpop.permute.xlu0 %1315  ;;  %v1442_v40 = vpack.c.bf16 %v1338_v15, %v1322_v20 }
 0x6d8   :  { %v1336_v31 = vsel %vm315_vm5, %v1332_v7, %v1326_v50  ;;  %v1320_v14 = vsel %vm282_vm4, %v1316_v41, %v1310_v9 }
 0x6d9   :  { %v1337_v29 = vmul.f32 %v1336_v31, %v5642_v18  ;;  %v1321_v45 = vmul.f32 %v1320_v14, %v5638_v17  ;;  %1477 = vmatprep.subr.bf16.mxu0 %v1442_v40 }
 0x6db   :  { %v1441_v38 = vpack.c.bf16 %v1337_v29, %v1321_v45  ;;  %v1330_v34 = vpop.permute.xlu1 %1329  ;;  %v1314_v60 = vpop.permute.xlu0 %1313 }
 0x6dc   :  { %v1333_v56 = vsel %vm315_vm5, %v1330_v34, %v1332_v7  ;;  %v1334_v25 = vsel %vm315_vm5, %v1328_v10, %v1330_v34  ;;  %v1317_v51 = vsel %vm282_vm4, %v1314_v60, %v1316_v41  ;;  %v1318_v37 = vsel %vm282_vm4, %v1312_v22, %v1314_v60 }
 0x6dd   :  { %v1339_v62 = vmul.f32 %v1334_v25, %v7916_v39  ;;  %v1340_v59 = vmul.f32 %v1333_v56, %v5652_v21  ;;  %v1323_v2 = vmul.f32 %v1318_v37, %v5656_v23  ;;  %v1324_v35 = vmul.f32 %v1317_v51, %v5646_v19  ;;  %1478 = vmatpush1.bf16.msra.mxu0 %v1441_v38 }
 0x6df   :  { %v1443_v9 = vpack.c.bf16 %v1339_v62, %v1323_v2  ;;  %v1344_v52 = vpop.permute.xlu1 %1343  ;;  %v1342_v50 = vpop.permute.xlu0 %1341  ;;  %v1444_v5 = vpack.c.bf16 %v1340_v59, %v1324_v35 }
 0x6e0   :  { %v1351_v10 = vsel %vm348_vm6, %v1342_v50, %v1344_v52 }
 0x6e1   :  { %1518 = vmatprep.subr.bf16.mxu1 %v1444_v5  ;;  %v1354_v7 = vmul.f32 %v1351_v10, %v5682_v47 }
 0x6e2   :  { %1519 = vmatpush1.bf16.msra.mxu1 %v1443_v9 }
 0x6e3   :  { %v1360_v20 = vpop.permute.xlu1 %1359  ;;  %v1358_v22 = vpop.permute.xlu0 %1357 }
 0x6e4   :  { %v1367_v15 = vsel %vm381_vm7, %v1358_v22, %v1360_v20 }
 0x6e5   :  { %v1370_v41 = vmul.f32 %v1367_v15, %v5686_v48 }
 0x6e7   :  { %v1364_v40 = vpop.permute.xlu1 %1363  ;;  %v1348_v31 = vpop.permute.xlu0 %1347  ;;  %v1446_v14 = vpack.c.bf16 %v1370_v41, %v1354_v7  ;;  %v1375_v41 = vmul.f32 %v6301_v49, %v5749_v46 }
 0x6e8   :  { %v1368_v29 = vsel %vm381_vm7, %v1364_v40, %v1358_v22  ;;  %v1352_v45 = vsel %vm348_vm6, %v1348_v31, %v1342_v50 }
 0x6e9   :  { %v1369_v38 = vmul.f32 %v1368_v29, %v5704_v6  ;;  %v1353_v34 = vmul.f32 %v1352_v45, %v5696_v1  ;;  %1479 = vmatprep.subr.bf16.mxu0 %v1446_v14  ;;  %v1373_v45 = vmul.f32 %v6283_v8, %v5753_v53 }
 0x6eb   :  { %v1445_v60 = vpack.c.bf16 %v1369_v38, %v1353_v34  ;;  %v1362_v56 = vpop.permute.xlu1 %1361  ;;  %v1346_v25 = vpop.permute.xlu0 %1345 }
 0x6ec   :  { %v1365_v51 = vsel %vm381_vm7, %v1362_v56, %v1364_v40  ;;  %v1366_v37 = vsel %vm381_vm7, %v1360_v20, %v1362_v56  ;;  %v1349_v62 = vsel %vm348_vm6, %v1346_v25, %v1348_v31  ;;  %v1350_v59 = vsel %vm348_vm6, %v1344_v52, %v1346_v25 }
 0x6ed   :  { %v1371_v2 = vmul.f32 %v1366_v37, %v5714_v13  ;;  %v1372_v35 = vmul.f32 %v1365_v51, %v5718_v16  ;;  %v1355_v9 = vmul.f32 %v1350_v59, %v5700_v3  ;;  %v1356_v50 = vmul.f32 %v1349_v62, %v5710_v12  ;;  %1480 = vmatpush1.bf16.msra.mxu0 %v1445_v60 }
 0x6ee   :  { %v1374_v52 = vmul.f32 %v6285_v32, %v5726_v27  ;;  %v1376_v56 = vmul.f32 %v6295_v24, %v5757_v54 }
 0x6ef   :  { %v1447_v5 = vpack.c.bf16 %v1371_v2, %v1355_v9  ;;  %v1382_v10 = vpop.permute.xlu1 %1381  ;;  %v1380_v22 = vpop.permute.xlu0 %1379  ;;  %v1448_v15 = vpack.c.bf16 %v1372_v35, %v1356_v50 }
 0x6f0   :  { %v1386_v20 = vsel %vm434_vm8, %v1380_v22, %v1382_v10 }
 0x6f1   :  { %v1390_v7 = vmul.f32 %v1386_v20, %v5733_v30  ;;  %1520 = vmatprep.subr.bf16.mxu1 %v1448_v15 }
 0x6f2   :  { %1521 = vmatpush1.bf16.msra.mxu1 %v1447_v5 }
 0x6f3   :  { %v1384_v40 = vpop.permute.xlu1 %1383  ;;  %v1378_v31 = vpop.permute.xlu0 %1377  ;;  %v1450_v14 = vpack.c.bf16 %v1390_v7, %v1374_v52 }
 0x6f4   :  { %v1385_v29 = vsel %vm434_vm8, %v1382_v10, %v1384_v40  ;;  %v1387_v38 = vsel %vm434_vm8, %v1378_v31, %v1380_v22  ;;  %v1388_v34 = vsel %vm434_vm8, %v1384_v40, %v1378_v31 }
 0x6f5   :  { %v1391_v32 = vmul.f32 %v1385_v29, %v5763_v43  ;;  %v1389_v60 = vmul.f32 %v1387_v38, %v5768_v63  ;;  %v1392_v49 = vmul.f32 %v1388_v34, %v5772_v0  ;;  %1481 = vmatprep.subr.bf16.mxu0 %v1450_v14 }
 0x6f7   :  { %v1451_v25 = vpack.c.bf16 %v1391_v32, %v1375_v41  ;;  %v1449_v51 = vpack.c.bf16 %v1389_v60, %v1373_v45  ;;  %v1398_v37 = vpop.permute.xlu1 %1397  ;;  %v1396_v8 = vpop.permute.xlu0 %1395  ;;  %v1452_v62 = vpack.c.bf16 %v1392_v49, %v1376_v56 }
 0x6f8   :  { %v1402_v59 = vsel %vm467_vm9, %v1396_v8, %v1398_v37 }
 0x6f9   :  { %1482 = vmatpush1.bf16.msra.mxu0 %v1449_v51  ;;  %1522 = vmatprep.subr.bf16.mxu1 %v1452_v62  ;;  %v1406_v50 = vmul.f32 %v1402_v59, %v5793_v42  ;;  %v6450_v62 = vld [vmem:[%s5281_s9 + $0x20] ss:$0 sm:$0xff] }
 0x6fa   :  { %1523 = vmatpush1.bf16.msra.mxu1 %v1451_v25 }
 0x6fb   :  { %v1414_v2 = vpop.permute.xlu1 %1413  ;;  %v1412_v35 = vpop.permute.xlu0 %1411 }
 0x6fc   :  { %v1418_v9 = vsel %vm500_vm10, %v1412_v35, %v1414_v2 }
 0x6fd   :  { %v1422_v24 = vmul.f32 %v1418_v9, %v5797_v44 }
 0x6ff   :  { %v1410_v5 = vpop.permute.xlu1 %1409  ;;  %v1394_v10 = vpop.permute.xlu0 %1393  ;;  %v1454_v22 = vpack.c.bf16 %v1422_v24, %v1406_v50 }
 0x700   :  { %v1419_v15 = vsel %vm500_vm10, %v1410_v5, %v1412_v35  ;;  %v1403_v20 = vsel %vm467_vm9, %v1394_v10, %v1396_v8 }
 0x701   :  { %v1421_v7 = vmul.f32 %v1419_v15, %v5825_v33  ;;  %v1405_v52 = vmul.f32 %v1403_v20, %v5811_v26  ;;  %1483 = vmatprep.subr.bf16.mxu0 %v1454_v22  ;;  %v6464_v15 = vld [vmem:[%s5281_s9 + $0x28] ss:$0 sm:$0xff] }
 0x703   :  { %v1453_v41 = vpack.c.bf16 %v1421_v7, %v1405_v52  ;;  %v1416_v40 = vpop.permute.xlu1 %1415  ;;  %v1400_v31 = vpop.permute.xlu0 %1399  ;;  %v6468_v7 = vld [vmem:[%s5281_s9 + $0x30] ss:$0 sm:$0xff] }
 0x704   :  { %v1417_v14 = vsel %vm500_vm10, %v1414_v2, %v1416_v40  ;;  %v1420_v29 = vsel %vm500_vm10, %v1416_v40, %v1410_v5  ;;  %v1401_v45 = vsel %vm467_vm9, %v1398_v37, %v1400_v31  ;;  %v1404_v38 = vsel %vm467_vm9, %v1400_v31, %v1394_v10  ;;  %v6460_v10 = vld [vmem:[%s5281_s9 + $0x38] ss:$0 sm:$0xff] }
 0x705   :  { %v1423_v34 = vmul.f32 %v1417_v14, %v5815_v28  ;;  %v1424_v32 = vmul.f32 %v1420_v29, %v5829_v36  ;;  %v1407_v60 = vmul.f32 %v1401_v45, %v5807_v58  ;;  %v1408_v49 = vmul.f32 %v1404_v38, %v7909_v11  ;;  %1484 = vmatpush1.bf16.msra.mxu0 %v1453_v41  ;;  %v1461_v45 = vld [vmem:[%s5301_s25] sm:$0xf]  ;;  %s7920_s25 = sld [smem:[#allocation11_spill]] }
 0x707   :  { %v1455_v56 = vpack.c.bf16 %v1423_v34, %v1407_v60  ;;  %v1428_v25 = vpop.permute.xlu1 %1427  ;;  %v1426_v51 = vpop.permute.xlu0 %1425  ;;  %v1456_v8 = vpack.c.bf16 %v1424_v32, %v1408_v49 }
 0x708   :  { %v1435_v37 = vsel %vm533_vm11, %v1426_v51, %v1428_v25 }
 0x709   :  { %v1437_v59 = vmul.f32 %v6450_v62, %v1435_v37  ;;  %1524 = vmatprep.subr.bf16.mxu1 %v1456_v8 }
 0x70a   :  { %1525 = vmatpush1.bf16.msra.mxu1 %v1455_v56 }
 0x70b   :  { %v1432_v2 = vpop.permute.xlu1 %1431  ;;  %v1430_v35 = vpop.permute.xlu0 %1429  ;;  %v1457_v5 = vpack.c.bf16 %v1437_v59, %v1437_v59 }
 0x70c   :  { %v1436_v9 = vsel %vm533_vm11, %v1432_v2, %v1426_v51  ;;  %v1433_v50 = vsel %vm533_vm11, %v1430_v35, %v1432_v2  ;;  %v1434_v24 = vsel %vm533_vm11, %v1428_v25, %v1430_v35 }
 0x70d   :  { %v1440_v22 = vmul.f32 %v6460_v10, %v1436_v9  ;;  %v1438_v20 = vmul.f32 %v6464_v15, %v1434_v24  ;;  %v1439_v52 = vmul.f32 %v6468_v7, %v1433_v50  ;;  %v1466_v14 = vsel %vm267_vm3, %v1457_v5, 0 }
 0x70f   :  { %v1460_v41 = vpack.c.bf16 %v1440_v22, %v1440_v22  ;;  %v1458_v40 = vpack.c.bf16 %v1438_v20, %v1438_v20  ;;  %v1459_v31 = vpack.c.bf16 %v1439_v52, %v1439_v52  ;;  %v1597_v20 = vld [vmem:[%s5336_s30] sm:$0xff]  ;;  %s7941_s30 = sld [smem:[#allocation16_spill]] }
 0x710   :  { %v1587_v52 = vld [vmem:[%s5331_s24] sm:$0xff]  ;;  %s7938_s24 = sld [smem:[#allocation20_spill]] }
 0x711   :  { %4763 = vmatprep.subr.msk.bf16.mxu0 %vm267_vm3, %v1458_v40  ;;  %4765 = vmatprep.subr.msk.bf16.mxu1 %vm267_vm3, %v1460_v41  ;;  %v1472_v29 = vsel %vm267_vm3, %v1459_v31, 0 }
 0x712   :  { %1486 = vmatpush1.bf16.msra.mxu0 %v1466_v14  ;;  %1527 = vmatpush1.bf16.msra.mxu1 %v1472_v29 }
 0x715   :  { %4764 = vmatmul.mubr.msk.bf16.vlgmr.msra.gmra.mrb[12].mxu0 %vm7868_vm12, %v1461_v45  ;;  %4766 = vmatmul.mubr.msk.bf16.vlgmr.msra.gmra.mrb[12].mxu1 %vm7868_vm12, %v1461_v45 }
 0x716   :  { %1819 = vmatprep.mubr.bf16.mxu0 %v7914_v55  ;;  %1860 = vmatprep.mubr.bf16.mxu1 %v7914_v55 }
 0x7e8   :  { %v1511_v38 = vpop.f32.mrb[12].mxu0  ;;  %v1552_v34 = vpop.f32.mrb[12].mxu1 }
 0x7e9   :  { %v1565_v32 = vmul.f32 %v1511_v38, %v1511_v38  ;;  %v1513_v60 = vpop.f32.mrb[13].mxu0  ;;  %v1554_v49 = vpop.f32.mrb[13].mxu1  ;;  %v1567_v56 = vmul.f32 %v1552_v34, %v1552_v34 }
 0x7ea   :  { %v1559_v25 = vadd.f32 %v1513_v60, %v1511_v38  ;;  %v1566_v51 = vmul.f32 %v1513_v60, %v1513_v60  ;;  %v1515_v8 = vpop.f32.mrb[14].mxu0  ;;  %v1556_v37 = vpop.f32.mrb[14].mxu1  ;;  %v1568_v24 = vmul.f32 %v1554_v49, %v1554_v49 }
 0x7eb   :  { %v1516_v59 = vpop.f32.mrb[15].mxu0  ;;  %v1557_v2 = vpop.f32.mrb[15].mxu1 }
 0x7ec   :  { %v1569_v35 = vadd.f32 %v1566_v51, %v1565_v32  ;;  %v1560_v9 = vadd.f32 %v1559_v25, %v1552_v34 }
 0x7ee   :  { %v1561_v50 = vadd.f32 %v1560_v9, %v1554_v49  ;;  %v1570_v5 = vadd.f32 %v1569_v35, %v1567_v56 }
 0x7f0   :  { %1562 = vadd.xlane.f32.xlu0 %v1561_v50  ;;  %v1571_v22 = vadd.f32 %v1570_v5, %v1568_v24 }
 0x7f2   :  { %1572 = vadd.xlane.f32.xlu1 %v1571_v22 }
 0x803   :  { %1600 = vperm.xlu1 %5037, %v1597_v20  }
 0x806   :  { %1590 = vperm.xlu0 %5036, %v1587_v52  }
 0x87d   :  { %v1563_v41 = vpop.xlane.xlu0 %1562 }
 0x87e   :  { %v1564_v40 = vmul.f32 0.001953125, %v1563_v41 }
 0x87f   :  { %v1573_v31 = vpop.xlane.xlu1 %1572 }
 0x880   :  { %v1574_v14 = vmul.f32 0.001953125, %v1573_v31  ;;  %v1575_v29 = vmul.f32 %v1564_v40, %v1564_v40  ;;  %v1577_v32 = vsub.f32 %v1511_v38, %v1564_v40  ;;  %v1578_v25 = vsub.f32 %v1513_v60, %v1564_v40 }
 0x881   :  { %v1580_v37 = vsub.f32 %v1554_v49, %v1564_v40  ;;  %v1579_v5 = vsub.f32 %v1552_v34, %v1564_v40 }
 0x882   :  { %v1576_v45 = vsub.f32 %v1574_v14, %v1575_v29 }
 0x883   :  { %v1601_v24 = vpop.permute.xlu1 %1600 }
 0x884   :  { %v1581_v8 = vadd.f32 1e-05, %v1576_v45 }
 0x885   :  { %v1591_v35 = vpop.permute.xlu0 %1590 }
 0x886   :  { %5106 = vrsqrt.f32 %v1581_v8 }
 0x890   :  { %v5107_v51 = vpop.eup %5106 }
 0x891   :  { %v1583_v56 = vmul.f32 %v5107_v51, %v1577_v32  ;;  %v1584_v59 = vmul.f32 %v5107_v51, %v1578_v25  ;;  %v1586_v2 = vmul.f32 %v5107_v51, %v1580_v37  ;;  %v1585_v52 = vmul.f32 %v5107_v51, %v1579_v5 }
 0x893   :  { %v1593_v9 = vmul.f32 %v1591_v35, %v1583_v56  ;;  %v1594_v50 = vmul.f32 %v1591_v35, %v1584_v59  ;;  %v1596_v41 = vmul.f32 %v1591_v35, %v1586_v2  ;;  %v1595_v38 = vmul.f32 %v1591_v35, %v1585_v52 }
 0x895   :  { %v1603_v22 = vadd.f32 %v1601_v24, %v1593_v9  ;;  %v1604_v20 = vadd.f32 %v1601_v24, %v1594_v50  ;;  %v1606_v60 = vadd.f32 %v1601_v24, %v1596_v41  ;;  %v1605_v34 = vadd.f32 %v1601_v24, %v1595_v38 }
 0x897   :  { %vm1607_vm13 = vcmp.gt.f32.partialorder %v1603_v22, 0.0  ;;  %vm1608_vm14 = vcmp.gt.f32.partialorder %v1604_v20, 0.0  ;;  %v1611_v31 = vmul.f32 0.2, %v1603_v22  ;;  %v1612_v14 = vmul.f32 0.2, %v1604_v20 }
 0x898   :  { %v1614_v40 = vmul.f32 0.2, %v1606_v60  ;;  %vm1610_vm15 = vcmp.gt.f32.partialorder %v1606_v60, 0.0  ;;  %v1613_v45 = vmul.f32 0.2, %v1605_v34 }
 0x899   :  { %v6482_v29 = vsel %vm1607_vm13, %v1603_v22, %v1611_v31  ;;  %v6484_v49 = vsel %vm1608_vm14, %v1604_v20, %v1612_v14  ;;  %vm1609_vm13 = vcmp.gt.f32.partialorder %v1605_v34, 0.0 }
 0x89a   :  { %1621 = vrot.lane.b32.xlu1 %v6484_v49, %s5255_s5  ;;  %1619 = vrot.lane.b32.xlu0 %v6482_v29, %s5255_s5  ;;  %v6494_v8 = vsel %vm1610_vm15, %v1606_v60, %v1614_v40  ;;  %v6500_v32 = vsel %vm1609_vm13, %v1605_v34, %v1613_v45 }
 0x89e   :  { %1637 = vrot.lane.b32.xlu1 %v6484_v49, %s5254_s0  ;;  %1635 = vrot.lane.b32.xlu0 %v6482_v29, %s5254_s0 }
 0x8a2   :  { %1641 = vrot.lane.b32.xlu1 %v6494_v8, %s5254_s0  ;;  %1625 = vrot.lane.b32.xlu0 %v6494_v8, %s5255_s5 }
 0x8a6   :  { %1639 = vrot.lane.b32.xlu1 %v6500_v32, %s5254_s0  ;;  %1623 = vrot.lane.b32.xlu0 %v6500_v32, %s5255_s5 }
 0x8aa   :  { %1653 = vrot.lane.b32.xlu1 %v6484_v49, %s5256_s28  ;;  %1651 = vrot.lane.b32.xlu0 %v6482_v29, %s5256_s28 }
 0x8ae   :  { %1669 = vrot.lane.b32.xlu1 %v6484_v49, %s5257_s1  ;;  %1667 = vrot.lane.b32.xlu0 %v6482_v29, %s5257_s1 }
 0x8b2   :  { %1673 = vrot.lane.b32.xlu1 %v6494_v8, %s5257_s1  ;;  %1657 = vrot.lane.b32.xlu0 %v6494_v8, %s5256_s28 }
 0x8b6   :  { %1671 = vrot.lane.b32.xlu1 %v6500_v32, %s5257_s1  ;;  %1655 = vrot.lane.b32.xlu0 %v6500_v32, %s5256_s28 }
 0x8ba   :  { %1691 = vrot.lane.b32.xlu1 %v6500_v32, %s5258_s2  ;;  %1689 = vrot.lane.b32.xlu0 %v6484_v49, %s5258_s2 }
 0x8be   :  { %1693 = vrot.lane.b32.xlu1 %v6494_v8, %s5258_s2  ;;  %1687 = vrot.lane.b32.xlu0 %v6482_v29, %s5258_s2 }
 0x8c2   :  { %1707 = vrot.lane.b32.xlu1 %v6500_v32, %s5259_s7  ;;  %1705 = vrot.lane.b32.xlu0 %v6484_v49, %s5259_s7 }
 0x8c6   :  { %1723 = vrot.lane.b32.xlu1 %v6500_v32, %s5260_s10  ;;  %1721 = vrot.lane.b32.xlu0 %v6484_v49, %s5260_s10 }
 0x8ca   :  { %1719 = vrot.lane.b32.xlu1 %v6482_v29, %s5260_s10  ;;  %1703 = vrot.lane.b32.xlu0 %v6482_v29, %s5259_s7 }
 0x8ce   :  { %1725 = vrot.lane.b32.xlu1 %v6494_v8, %s5260_s10  ;;  %1709 = vrot.lane.b32.xlu0 %v6494_v8, %s5259_s7 }
 0x8d2   :  { %1737 = vrot.lane.b32.xlu1 %v6484_v49, %s5262_s11  ;;  %1735 = vrot.lane.b32.xlu0 %v6482_v29, %s5262_s11 }
 0x8d6   :  { %1741 = vrot.lane.b32.xlu1 %v6494_v8, %s5262_s11  ;;  %1739 = vrot.lane.b32.xlu0 %v6500_v32, %s5262_s11 }
 0x90c   :  { %v1622_v25 = vpop.permute.xlu1 %1621  ;;  %v1620_v51 = vpop.permute.xlu0 %1619 }
 0x90d   :  { %v1629_v37 = vsel %vm282_vm4, %v1620_v51, %v1622_v25 }
 0x90e   :  { %v1632_v35 = vmul.f32 %v1629_v37, %v5615_v61 }
 0x910   :  { %v1638_v56 = vpop.permute.xlu1 %1637  ;;  %v1636_v59 = vpop.permute.xlu0 %1635 }
 0x911   :  { %v1645_v2 = vsel %vm315_vm5, %v1636_v59, %v1638_v56 }
 0x912   :  { %v1648_v9 = vmul.f32 %v1645_v2, %v7915_v4 }
 0x914   :  { %v1642_v50 = vpop.permute.xlu1 %1641  ;;  %v1626_v24 = vpop.permute.xlu0 %1625  ;;  %v1752_v5 = vpack.c.bf16 %v1648_v9, %v1632_v35 }
 0x915   :  { %v1646_v22 = vsel %vm315_vm5, %v1642_v50, %v1636_v59  ;;  %v1630_v20 = vsel %vm282_vm4, %v1626_v24, %v1620_v51 }
 0x916   :  { %v1647_v52 = vmul.f32 %v1646_v22, %v5642_v18  ;;  %v1631_v41 = vmul.f32 %v1630_v20, %v5638_v17  ;;  %1787 = vmatprep.subr.bf16.mxu0 %v1752_v5 }
 0x918   :  { %v1751_v31 = vpack.c.bf16 %v1647_v52, %v1631_v41  ;;  %v1640_v14 = vpop.permute.xlu1 %1639  ;;  %v1624_v38 = vpop.permute.xlu0 %1623 }
 0x919   :  { %v1643_v60 = vsel %vm315_vm5, %v1640_v14, %v1642_v50  ;;  %v1644_v34 = vsel %vm315_vm5, %v1638_v56, %v1640_v14  ;;  %v1627_v40 = vsel %vm282_vm4, %v1624_v38, %v1626_v24  ;;  %v1628_v45 = vsel %vm282_vm4, %v1622_v25, %v1624_v38 }
 0x91a   :  { %v1649_v51 = vmul.f32 %v1644_v34, %v7916_v39  ;;  %v1650_v37 = vmul.f32 %v1643_v60, %v5652_v21  ;;  %v1633_v59 = vmul.f32 %v1628_v45, %v5656_v23  ;;  %v1634_v2 = vmul.f32 %v1627_v40, %v5646_v19  ;;  %1788 = vmatpush1.bf16.msra.mxu0 %v1751_v31 }
 0x91c   :  { %v1753_v35 = vpack.c.bf16 %v1649_v51, %v1633_v59  ;;  %v1654_v9 = vpop.permute.xlu1 %1653  ;;  %v1652_v50 = vpop.permute.xlu0 %1651  ;;  %v1754_v5 = vpack.c.bf16 %v1650_v37, %v1634_v2 }
 0x91d   :  { %v1661_v56 = vsel %vm348_vm6, %v1652_v50, %v1654_v9 }
 0x91e   :  { %1828 = vmatprep.subr.bf16.mxu1 %v1754_v5  ;;  %v1664_v20 = vmul.f32 %v1661_v56, %v5682_v47 }
 0x91f   :  { %1829 = vmatpush1.bf16.msra.mxu1 %v1753_v35 }
 0x920   :  { %v1670_v24 = vpop.permute.xlu1 %1669  ;;  %v1668_v25 = vpop.permute.xlu0 %1667 }
 0x921   :  { %v1677_v22 = vsel %vm381_vm7, %v1668_v25, %v1670_v24 }
 0x922   :  { %v1680_v52 = vmul.f32 %v1677_v22, %v5686_v48 }
 0x924   :  { %v1674_v41 = vpop.permute.xlu1 %1673  ;;  %v1658_v31 = vpop.permute.xlu0 %1657  ;;  %v1756_v14 = vpack.c.bf16 %v1680_v52, %v1664_v20 }
 0x925   :  { %v1678_v38 = vsel %vm381_vm7, %v1674_v41, %v1668_v25  ;;  %v1662_v60 = vsel %vm348_vm6, %v1658_v31, %v1652_v50 }
 0x926   :  { %v1679_v34 = vmul.f32 %v1678_v38, %v5704_v6  ;;  %v1663_v40 = vmul.f32 %v1662_v60, %v5696_v1  ;;  %1789 = vmatprep.subr.bf16.mxu0 %v1756_v14  ;;  %v1685_v38 = vmul.f32 %v6500_v32, %v5749_v46 }
 0x928   :  { %v1755_v45 = vpack.c.bf16 %v1679_v34, %v1663_v40  ;;  %v1672_v51 = vpop.permute.xlu1 %1671  ;;  %v1656_v37 = vpop.permute.xlu0 %1655 }
 0x929   :  { %v1675_v59 = vsel %vm381_vm7, %v1672_v51, %v1674_v41  ;;  %v1676_v2 = vsel %vm381_vm7, %v1670_v24, %v1672_v51  ;;  %v1659_v35 = vsel %vm348_vm6, %v1656_v37, %v1658_v31  ;;  %v1660_v50 = vsel %vm348_vm6, %v1654_v9, %v1656_v37 }
 0x92a   :  { %v1681_v5 = vmul.f32 %v1676_v2, %v5714_v13  ;;  %v1682_v56 = vmul.f32 %v1675_v59, %v5718_v16  ;;  %v1665_v25 = vmul.f32 %v1660_v50, %v5700_v3  ;;  %v1666_v22 = vmul.f32 %v1659_v35, %v5710_v12  ;;  %1790 = vmatpush1.bf16.msra.mxu0 %v1755_v45 }
 0x92b   :  { %v1684_v9 = vmul.f32 %v6484_v49, %v5726_v27  ;;  %v1683_v51 = vmul.f32 %v6482_v29, %v5753_v53  ;;  %v1686_v35 = vmul.f32 %v6494_v8, %v5757_v54 }
 0x92c   :  { %v1757_v20 = vpack.c.bf16 %v1681_v5, %v1665_v25  ;;  %v1692_v52 = vpop.permute.xlu1 %1691  ;;  %v1690_v41 = vpop.permute.xlu0 %1689  ;;  %v1758_v14 = vpack.c.bf16 %v1682_v56, %v1666_v22 }
 0x92d   :  { %v1696_v24 = vsel %vm434_vm8, %v1690_v41, %v1692_v52 }
 0x92e   :  { %v1700_v31 = vmul.f32 %v1696_v24, %v5733_v30  ;;  %1830 = vmatprep.subr.bf16.mxu1 %v1758_v14 }
 0x92f   :  { %1831 = vmatpush1.bf16.msra.mxu1 %v1757_v20 }
 0x930   :  { %v1694_v60 = vpop.permute.xlu1 %1693  ;;  %v1688_v34 = vpop.permute.xlu0 %1687  ;;  %v1760_v40 = vpack.c.bf16 %v1700_v31, %v1684_v9 }
 0x931   :  { %v1695_v45 = vsel %vm434_vm8, %v1692_v52, %v1694_v60  ;;  %v1697_v37 = vsel %vm434_vm8, %v1688_v34, %v1690_v41  ;;  %v1698_v59 = vsel %vm434_vm8, %v1694_v60, %v1688_v34 }
 0x932   :  { %v1701_v49 = vmul.f32 %v1695_v45, %v5763_v43  ;;  %v1699_v2 = vmul.f32 %v1697_v37, %v5768_v63  ;;  %v1702_v32 = vmul.f32 %v1698_v59, %v5772_v0  ;;  %1791 = vmatprep.subr.bf16.mxu0 %v1760_v40 }
 0x934   :  { %v1761_v50 = vpack.c.bf16 %v1701_v49, %v1685_v38  ;;  %v1759_v5 = vpack.c.bf16 %v1699_v2, %v1683_v51  ;;  %v1708_v56 = vpop.permute.xlu1 %1707  ;;  %v1706_v29 = vpop.permute.xlu0 %1705  ;;  %v1762_v25 = vpack.c.bf16 %v1702_v32, %v1686_v35 }
 0x935   :  { %v1712_v22 = vsel %vm467_vm9, %v1706_v29, %v1708_v56 }
 0x936   :  { %1792 = vmatpush1.bf16.msra.mxu0 %v1759_v5  ;;  %1832 = vmatprep.subr.bf16.mxu1 %v1762_v25  ;;  %v1716_v14 = vmul.f32 %v1712_v22, %v5793_v42 }
 0x937   :  { %1833 = vmatpush1.bf16.msra.mxu1 %v1761_v50 }
 0x938   :  { %v1724_v20 = vpop.permute.xlu1 %1723  ;;  %v1722_v52 = vpop.permute.xlu0 %1721 }
 0x939   :  { %v1728_v41 = vsel %vm500_vm10, %v1722_v52, %v1724_v20 }
 0x93a   :  { %v1732_v8 = vmul.f32 %v1728_v41, %v5797_v44 }
 0x93c   :  { %v1720_v24 = vpop.permute.xlu1 %1719  ;;  %v1704_v31 = vpop.permute.xlu0 %1703  ;;  %v1764_v9 = vpack.c.bf16 %v1732_v8, %v1716_v14 }
 0x93d   :  { %v1729_v38 = vsel %vm500_vm10, %v1720_v24, %v1722_v52  ;;  %v1713_v60 = vsel %vm467_vm9, %v1704_v31, %v1706_v29 }
 0x93e   :  { %v1731_v34 = vmul.f32 %v1729_v38, %v5825_v33  ;;  %v1715_v40 = vmul.f32 %v1713_v60, %v5811_v26  ;;  %1793 = vmatprep.subr.bf16.mxu0 %v1764_v9 }
 0x940   :  { %v1763_v45 = vpack.c.bf16 %v1731_v34, %v1715_v40  ;;  %v1726_v51 = vpop.permute.xlu1 %1725  ;;  %v1710_v37 = vpop.permute.xlu0 %1709 }
 0x941   :  { %v1727_v59 = vsel %vm500_vm10, %v1724_v20, %v1726_v51  ;;  %v1730_v49 = vsel %vm500_vm10, %v1726_v51, %v1720_v24  ;;  %v1711_v2 = vsel %vm467_vm9, %v1708_v56, %v1710_v37  ;;  %v1714_v32 = vsel %vm467_vm9, %v1710_v37, %v1704_v31 }
 0x942   :  { %v1733_v35 = vmul.f32 %v1727_v59, %v5815_v28  ;;  %v1734_v50 = vmul.f32 %v1730_v49, %v5829_v36  ;;  %v1717_v5 = vmul.f32 %v1711_v2, %v5807_v58  ;;  %v1718_v29 = vmul.f32 %v1714_v32, %v7909_v11  ;;  %1794 = vmatpush1.bf16.msra.mxu0 %v1763_v45  ;;  %v1771_v49 = vld [vmem:[%s5306_s29] sm:$0x3]  ;;  %s7922_s29 = sld [smem:[#allocation12_spill]] }
 0x944   :  { %v1765_v25 = vpack.c.bf16 %v1733_v35, %v1717_v5  ;;  %v1738_v22 = vpop.permute.xlu1 %1737  ;;  %v1736_v20 = vpop.permute.xlu0 %1735  ;;  %v1766_v52 = vpack.c.bf16 %v1734_v50, %v1718_v29 }
 0x945   :  { %v1745_v41 = vsel %vm533_vm11, %v1736_v20, %v1738_v22 }
 0x946   :  { %v1747_v56 = vmul.f32 %v6450_v62, %v1745_v41  ;;  %1834 = vmatprep.subr.bf16.mxu1 %v1766_v52 }
 0x947   :  { %1835 = vmatpush1.bf16.msra.mxu1 %v1765_v25 }
 0x948   :  { %v1742_v14 = vpop.permute.xlu1 %1741  ;;  %v1740_v8 = vpop.permute.xlu0 %1739  ;;  %v1767_v38 = vpack.c.bf16 %v1747_v56, %v1747_v56 }
 0x949   :  { %v1746_v24 = vsel %vm533_vm11, %v1742_v14, %v1736_v20  ;;  %v1743_v31 = vsel %vm533_vm11, %v1740_v8, %v1742_v14  ;;  %v1744_v9 = vsel %vm533_vm11, %v1738_v22, %v1740_v8 }
 0x94a   :  { %v1750_v60 = vmul.f32 %v6460_v10, %v1746_v24  ;;  %v1748_v34 = vmul.f32 %v6464_v15, %v1744_v9  ;;  %v1749_v62 = vmul.f32 %v6468_v7, %v1743_v31  ;;  %v1776_v37 = vsel %vm267_vm3, %v1767_v38, 0 }
 0x94c   :  { %v1770_v40 = vpack.c.bf16 %v1750_v60, %v1750_v60  ;;  %v1768_v45 = vpack.c.bf16 %v1748_v34, %v1748_v34  ;;  %v1769_v51 = vpack.c.bf16 %v1749_v62, %v1749_v62 }
 0x94e   :  { %4767 = vmatprep.subr.msk.bf16.mxu0 %vm267_vm3, %v1768_v45  ;;  %4769 = vmatprep.subr.msk.bf16.mxu1 %vm267_vm3, %v1770_v40  ;;  %v1782_v59 = vsel %vm267_vm3, %v1769_v51, 0  ;;  %v5038_v51 = vld [vmem:[%s5351_s20 + $0x40] sm:$0xff]  }
 0x94f   :  { %1796 = vmatpush1.bf16.msra.mxu0 %v1776_v37  ;;  %1837 = vmatpush1.bf16.msra.mxu1 %v1782_v59  ;;  %v5039_v37 = vld [vmem:[%s5351_s20 + $0xc0] sm:$0xff]  }
 0x950   :  { %v5040_v59 = vld [vmem:[%s5351_s20] sm:$0xff]   ;;  %4898 = vmatprep.subr.bf16.mxu0 %v5038_v51  ;;  %4920 = vmatprep.subr.bf16.mxu1 %v5039_v37  ;;  %v5062_v51 = vld [vmem:[%s5351_s20 + $0x70] sm:$0xff]  }
 0x951   :  { %v5063_v37 = vld [vmem:[%s5351_s20 + $0xf0] sm:$0xff]  }
 0x952   :  { %4768 = vmatmul.mubr.msk.bf16.vlgmr.msra.gmra.mrb[16].mxu0 %vm7868_vm12, %v1771_v49  ;;  %4770 = vmatmul.mubr.msk.bf16.vlgmr.msra.gmra.mrb[16].mxu1 %vm7868_vm12, %v1771_v49  ;;  %v5041_v49 = vld [vmem:[%s5351_s20 + $0x80] sm:$0xff]  }
 0x953   :  { %4899 = vmatpush3.bf16.msra.mxu0 %v5040_v59  ;;  %4921 = vmatpush3.bf16.msra.mxu1 %v5041_v49  ;;  %v5064_v59 = vld [vmem:[%s5351_s20 + $0x30] sm:$0xff]  }
 0x954   :  { %v5065_v49 = vld [vmem:[%s5351_s20 + $0xb0] sm:$0xff]  }
 0xa25   :  { %v6665_v10 = vpop.f32.mrb[16].mxu0  ;;  %v6667_v15 = vpop.f32.mrb[16].mxu1 }
 0xa26   :  { %v1869_v7 = vsel %vm267_vm3, %v6665_v10, 0.0  ;;  %v1879_v2 = vmul.f32 %v6665_v10, %v6665_v10  ;;  %v1881_v32 = vmul.f32 %v6667_v15, %v6667_v15  ;;  %v6675_v35 = vpop.f32.mrb[17].mxu0  ;;  %v6677_v50 = vpop.f32.mrb[17].mxu1  ;;  %v1872_v5 = vsel %vm267_vm3, %v6667_v15, 0.0 }
 0xa27   :  { %v1870_v29 = vsel %vm267_vm3, %v6675_v35, 0.0  ;;  %v1880_v25 = vmul.f32 %v6675_v35, %v6675_v35  ;;  %v1825_v22 = vpop.f32.mrb[18].mxu0  ;;  %v1866_v20 = vpop.f32.mrb[18].mxu1  ;;  %v1882_v31 = vmul.f32 %v6677_v50, %v6677_v50  ;;  %v1874_v60 = vsel %vm267_vm3, %v6677_v50, 0.0 }
 0xa28   :  { %v1883_v52 = vsel %vm267_vm3, %v1879_v2, 0.0  ;;  %v1871_v41 = vadd.f32 %v1870_v29, %v1869_v7  ;;  %v1826_v56 = vpop.f32.mrb[19].mxu0  ;;  %v1867_v14 = vpop.f32.mrb[19].mxu1  ;;  %v1886_v8 = vsel %vm267_vm3, %v1881_v32, 0.0  ;;  %v1915_v7 = vld [vmem:[%s7917_s13] sm:$0xf] }
 0xa29   :  { %v1884_v24 = vsel %vm267_vm3, %v1880_v25, 0.0  ;;  %v1888_v40 = vsel %vm267_vm3, %v1882_v31, 0.0  ;;  %v5042_v2 = vld [vmem:[%s5351_s20 + $0x48] sm:$0xff]   ;;  %v5046_v22 = vld [vmem:[%s5351_s20 + $0x50] sm:$0xff]   ;;  %v5050_v56 = vld [vmem:[%s5351_s20 + $0x58] sm:$0xff]  }
 0xa2a   :  { %v1885_v9 = vadd.f32 %v1884_v24, %v1883_v52  ;;  %v1873_v38 = vadd.f32 %v1872_v5, %v1871_v41  ;;  %v5043_v32 = vld [vmem:[%s5351_s20 + $0xc8] sm:$0xff]   ;;  %v1905_v5 = vld [vmem:[%s7918_s17] sm:$0xf]  ;;  %4900 = vmatprep.subr.bf16.mxu0 %v5042_v2  ;;  %v5047_v20 = vld [vmem:[%s5351_s20 + $0xd0] sm:$0xff]  }
 0xa2b   :  { %v5044_v29 = vld [vmem:[%s5351_s20 + $0x8] sm:$0xff]   ;;  %4922 = vmatprep.subr.bf16.mxu1 %v5043_v32  ;;  %v5048_v52 = vld [vmem:[%s5351_s20 + $0x10] sm:$0xff]   ;;  %v5051_v14 = vld [vmem:[%s5351_s20 + $0xd8] sm:$0xff]  }
 0xa2c   :  { %v1875_v34 = vadd.f32 %v1874_v60, %v1873_v38  ;;  %v1887_v62 = vadd.f32 %v1886_v8, %v1885_v9  ;;  %v5045_v25 = vld [vmem:[%s5351_s20 + $0x88] sm:$0xff]   ;;  %4901 = vmatpush3.bf16.msra.mxu0 %v5044_v29  ;;  %v5049_v41 = vld [vmem:[%s5351_s20 + $0x90] sm:$0xff]   ;;  %v5052_v8 = vld [vmem:[%s5351_s20 + $0x18] sm:$0xff]  }
 0xa2d   :  { %4923 = vmatpush3.bf16.msra.mxu1 %v5045_v25  ;;  %4902 = vmatprep.subr.bf16.mxu0 %v5046_v22  ;;  %v5053_v24 = vld [vmem:[%s5351_s20 + $0x98] sm:$0xff]   ;;  %v5054_v31 = vld [vmem:[%s5351_s20 + $0x60] sm:$0xff]  }
 0xa2e   :  { %1876 = vadd.xlane.f32.xlu0 %v1875_v34  ;;  %v1889_v45 = vadd.f32 %v1888_v40, %v1887_v62  ;;  %4924 = vmatprep.subr.bf16.mxu1 %v5047_v20  ;;  %v5055_v9 = vld [vmem:[%s5351_s20 + $0xe0] sm:$0xff]   ;;  %v5058_v34 = vld [vmem:[%s5351_s20 + $0x68] sm:$0xff]   ;;  %v5067_v2 = vld [vmem:[%s5351_s20 + $0xf8] sm:$0xff]  }
 0xa2f   :  { %v5056_v38 = vld [vmem:[%s5351_s20 + $0x20] sm:$0xff]   ;;  %v5059_v62 = vld [vmem:[%s5351_s20 + $0xe8] sm:$0xff]   ;;  %v5068_v32 = vld [vmem:[%s5351_s20 + $0x38] sm:$0xff]  }
 0xa30   :  { %1890 = vadd.xlane.f32.xlu1 %v1889_v45  ;;  %4903 = vmatpush3.bf16.msra.mxu0 %v5048_v52  ;;  %v5057_v60 = vld [vmem:[%s5351_s20 + $0xa0] sm:$0xff]   ;;  %v5060_v40 = vld [vmem:[%s5351_s20 + $0x28] sm:$0xff]  }
 0xa31   :  { %4925 = vmatpush3.bf16.msra.mxu1 %v5049_v41  ;;  %4904 = vmatprep.subr.bf16.mxu0 %v5050_v56  ;;  %v5061_v45 = vld [vmem:[%s5351_s20 + $0xa8] sm:$0xff]   ;;  %v5070_v29 = vld [vmem:[%s5351_s20 + $0x140] sm:$0xff]  }
 0xa32   :  { %4926 = vmatprep.subr.bf16.mxu1 %v5051_v14  ;;  %v5071_v25 = vld [vmem:[%s5351_s20 + $0x1c0] sm:$0xff]  }
 0xa34   :  { %4905 = vmatpush3.bf16.msra.mxu0 %v5052_v8 }
 0xa35   :  { %4927 = vmatpush3.bf16.msra.mxu1 %v5053_v24  ;;  %4906 = vmatprep.subr.bf16.mxu0 %v5054_v31 }
 0xa36   :  { %4928 = vmatprep.subr.bf16.mxu1 %v5055_v9 }
 0xa38   :  { %4907 = vmatpush3.bf16.msra.mxu0 %v5056_v38 }
 0xa39   :  { %4929 = vmatpush3.bf16.msra.mxu1 %v5057_v60  ;;  %4908 = vmatprep.subr.bf16.mxu0 %v5058_v34 }
 0xa3a   :  { %4930 = vmatprep.subr.bf16.mxu1 %v5059_v62 }
 0xa3c   :  { %4909 = vmatpush3.bf16.msra.mxu0 %v5060_v40 }
 0xa3d   :  { %4931 = vmatpush3.bf16.msra.mxu1 %v5061_v45  ;;  %4910 = vmatprep.subr.bf16.mxu0 %v5062_v51 }
 0xa3e   :  { %4932 = vmatprep.subr.bf16.mxu1 %v5063_v37 }
 0xa40   :  { %4911 = vmatpush3.bf16.msra.mxu0 %v5064_v59 }
 0xa41   :  { %1918 = vperm.xlu1 %5037, %v1915_v7   ;;  %4933 = vmatpush3.bf16.msra.mxu1 %v5065_v49  ;;  %v5066_v7 = vld [vmem:[%s5351_s20 + $0x78] sm:$0xff]  }
 0xa42   :  { %4912 = vmatprep.subr.bf16.mxu0 %v5066_v7  ;;  %4934 = vmatprep.subr.bf16.mxu1 %v5067_v2 }
 0xa44   :  { %1908 = vperm.xlu0 %5036, %v1905_v5   ;;  %v5069_v5 = vld [vmem:[%s5351_s20 + $0xb8] sm:$0xff]   ;;  %4913 = vmatpush3.bf16.msra.mxu0 %v5068_v32 }
 0xa45   :  { %4935 = vmatpush3.bf16.msra.mxu1 %v5069_v5  ;;  %4942 = vmatprep.subr.bf16.mxu0 %v5070_v29 }
 0xa46   :  { %4964 = vmatprep.subr.bf16.mxu1 %v5071_v25 }
 0xabb   :  { %v1877_v22 = vpop.xlane.xlu0 %1876 }
 0xabc   :  { %v1878_v20 = vmul.f32 0.001953125, %v1877_v22 }
 0xabd   :  { %v1891_v52 = vpop.xlane.xlu1 %1890 }
 0xabe   :  { %v1892_v41 = vmul.f32 0.001953125, %v1891_v52  ;;  %v1893_v56 = vmul.f32 %v1878_v20, %v1878_v20  ;;  %v1895_v24 = vsub.f32 %v6665_v10, %v1878_v20  ;;  %v1896_v31 = vsub.f32 %v6675_v35, %v1878_v20 }
 0xabf   :  { %v1897_v9 = vsub.f32 %v6667_v15, %v1878_v20  ;;  %v1898_v38 = vsub.f32 %v6677_v50, %v1878_v20 }
 0xac0   :  { %v1894_v14 = vsub.f32 %v1892_v41, %v1893_v56 }
 0xac1   :  { %v1919_v2 = vpop.permute.xlu1 %1918 }
 0xac2   :  { %v1899_v8 = vadd.f32 1e-05, %v1894_v14 }
 0xac3   :  { %v1909_v51 = vpop.permute.xlu0 %1908 }
 0xac4   :  { %5108 = vrsqrt.f32 %v1899_v8 }
 0xace   :  { %v5109_v60 = vpop.eup %5108 }
 0xacf   :  { %v1901_v34 = vmul.f32 %v5109_v60, %v1895_v24  ;;  %v1902_v62 = vmul.f32 %v5109_v60, %v1896_v31  ;;  %v1903_v40 = vmul.f32 %v5109_v60, %v1897_v9  ;;  %v1904_v45 = vmul.f32 %v5109_v60, %v1898_v38 }
 0xad1   :  { %v1911_v37 = vmul.f32 %v1909_v51, %v1901_v34  ;;  %v1912_v59 = vmul.f32 %v1909_v51, %v1902_v62  ;;  %v1913_v49 = vmul.f32 %v1909_v51, %v1903_v40  ;;  %v1914_v7 = vmul.f32 %v1909_v51, %v1904_v45 }
 0xad3   :  { %v1921_v32 = vadd.f32 %v1919_v2, %v1911_v37  ;;  %v1922_v5 = vadd.f32 %v1919_v2, %v1912_v59  ;;  %v1923_v10 = vadd.f32 %v1919_v2, %v1913_v49  ;;  %v1924_v29 = vadd.f32 %v1919_v2, %v1914_v7  ;;  %v5072_v7 = vld [vmem:[%s5351_s20 + $0x100] sm:$0xff]  }
 0xad4   :  { %v5073_v2 = vld [vmem:[%s5351_s20 + $0x180] sm:$0xff]  }
 0xad5   :  { %vm1927_vm14 = vcmp.gt.f32.partialorder %v1923_v10, 0.0  ;;  %v1929_v35 = vmul.f32 0.2, %v1921_v32  ;;  %v1931_v15 = vmul.f32 0.2, %v1923_v10  ;;  %vm1926_vm15 = vcmp.gt.f32.partialorder %v1922_v5, 0.0 }
 0xad6   :  { %v1932_v50 = vmul.f32 0.2, %v1924_v29  ;;  %vm1928_vm13 = vcmp.gt.f32.partialorder %v1924_v29, 0.0  ;;  %v1930_v25 = vmul.f32 0.2, %v1922_v5  ;;  %vm1925_vm12 = vcmp.gt.f32.partialorder %v1921_v32, 0.0 }
 0xad7   :  { %v1935_v22 = vsel %vm1927_vm14, %v1923_v10, %v1931_v15  ;;  %v1933_v20 = vsel %vm1925_vm12, %v1921_v32, %v1929_v35  ;;  %v5074_v35 = vld [vmem:[%s5351_s20 + $0x148] sm:$0xff]   ;;  %vm2679_vm12 = vcmask 254976   ;;  %vm2826_vm14 = vcmask 261120  }
 0xad8   :  { %v1934_v52 = vsel %vm1926_vm15, %v1922_v5, %v1930_v25  ;;  %v1936_v41 = vsel %vm1928_vm13, %v1924_v29, %v1932_v50  ;;  %v1959_v56 = vrot.slane %v1935_v22, 7  ;;  %v1939_v14 = vrot.slane %v1933_v20, 1  ;;  %v5075_v15 = vld [vmem:[%s5351_s20 + $0x1c8] sm:$0xff]  }
 0xad9   :  { %v1960_v8 = vrot.slane %v1936_v41, 7  ;;  %v1940_v24 = vrot.slane %v1934_v52, 1  ;;  %v1944_v31 = vrot.slane %v1934_v52, 2  ;;  %v4774_v9 = vrot.slane %v1936_v41, 9 }
 0xada   :  { %v1975_v38 = vsel %vm252_vm0, %v1933_v20, %v1959_v56  ;;  %v1977_v60 = vsel %vm252_vm0, %v1939_v14, %v1935_v22  ;;  %v1948_v34 = vrot.slane %v1934_v52, 3  ;;  %v4776_v62 = vrot.slane %v1936_v41, 10  ;;  %v5076_v14 = vld [vmem:[%s5351_s20 + $0x108] sm:$0xff]  }
 0xadb   :  { %v1976_v40 = vsel %vm252_vm0, %v1934_v52, %v1960_v8  ;;  %v1978_v45 = vsel %vm252_vm0, %v1940_v24, %v1936_v41  ;;  %v1983_v51 = vpack.c.bf16 %v1975_v38, %v1975_v38  ;;  %v1985_v37 = vpack.c.bf16 %v1977_v60, %v1977_v60  ;;  %v5077_v8 = vld [vmem:[%s5351_s20 + $0x188] sm:$0xff]   ;;  %v5082_v38 = vld [vmem:[%s5351_s20 + $0x158] sm:$0xff]  }
 0xadc   :  { %v1984_v59 = vpack.c.bf16 %v1976_v40, %v1976_v40  ;;  %v1986_v49 = vpack.c.bf16 %v1978_v45, %v1978_v45  ;;  %v1980_v32 = vsel %vm252_vm0, %v1944_v31, %v4774_v9  ;;  %v1982_v5 = vsel %vm252_vm0, %v1948_v34, %v4776_v62  ;;  %v5080_v31 = vld [vmem:[%s5351_s20 + $0x110] sm:$0xff]   ;;  %v5083_v60 = vld [vmem:[%s5351_s20 + $0x1d8] sm:$0xff]   ;;  %v5086_v40 = vld [vmem:[%s5351_s20 + $0x160] sm:$0xff]  }
 0xadd   :  { %v1943_v10 = vrot.slane %v1933_v20, 2  ;;  %v4773_v29 = vrot.slane %v1935_v22, 9  ;;  %v1947_v50 = vrot.slane %v1933_v20, 3  ;;  %v4775_v25 = vrot.slane %v1935_v22, 10  ;;  %v5078_v22 = vld [vmem:[%s5351_s20 + $0x150] sm:$0xff]   ;;  %v5084_v34 = vld [vmem:[%s5351_s20 + $0x118] sm:$0xff]  }
 0xade   :  { %2542 = vmatprep.mubr.bf16.mxu0 %v1984_v59  ;;  %2582 = vmatprep.mubr.bf16.mxu1 %v1986_v49  ;;  %v1988_v52 = vpack.c.bf16 %v1980_v32, %v1980_v32  ;;  %v1990_v41 = vpack.c.bf16 %v1982_v5, %v1982_v5  ;;  %v5079_v20 = vld [vmem:[%s5351_s20 + $0x1d0] sm:$0xff]   ;;  %v5085_v62 = vld [vmem:[%s5351_s20 + $0x198] sm:$0xff]   ;;  %v5087_v45 = vld [vmem:[%s5351_s20 + $0x1e0] sm:$0xff]  }
 0xadf   :  { %2543 = vmatmul.mubr.bf16.vlgmr.msra.gmra.mrb[20].mxu0 %v1983_v51  ;;  %2583 = vmatmul.mubr.bf16.vlgmr.msra.gmra.mrb[20].mxu1 %v1985_v37  ;;  %v1979_v56 = vsel %vm252_vm0, %v1943_v10, %v4773_v29  ;;  %v1981_v24 = vsel %vm252_vm0, %v1947_v50, %v4775_v25  ;;  %v5081_v9 = vld [vmem:[%s5351_s20 + $0x190] sm:$0xff]   ;;  %v5088_v51 = vld [vmem:[%s5351_s20 + $0x120] sm:$0xff]   ;;  %v5090_v59 = vld [vmem:[%s5351_s20 + $0x168] sm:$0xff]  }
 0xae0   :  { %4943 = vmatpush3.bf16.msra.mxu0 %v5072_v7  ;;  %4965 = vmatpush3.bf16.msra.mxu1 %v5073_v2  ;;  %v5089_v37 = vld [vmem:[%s5351_s20 + $0x1a0] sm:$0xff]   ;;  %v5091_v49 = vld [vmem:[%s5351_s20 + $0x1e8] sm:$0xff]   ;;  %v5094_v32 = vld [vmem:[%s5351_s20 + $0x170] sm:$0xff]  }
 0xae1   :  { %2622 = vmatprep.mubr.bf16.mxu0 %v1988_v52  ;;  %2662 = vmatprep.mubr.bf16.mxu1 %v1990_v41  ;;  %v5092_v7 = vld [vmem:[%s5351_s20 + $0x128] sm:$0xff]   ;;  %v5095_v5 = vld [vmem:[%s5351_s20 + $0x1f0] sm:$0xff]   ;;  %v5100_v50 = vld [vmem:[%s5351_s20 + $0x138] sm:$0xff]   ;;  %v1987_v52 = vpack.c.bf16 %v1979_v56, %v1979_v56  ;;  %v1989_v41 = vpack.c.bf16 %v1981_v24, %v1981_v24 }
 0xae2   :  { %4944 = vmatprep.subr.bf16.mxu0 %v5074_v35  ;;  %4966 = vmatprep.subr.bf16.mxu1 %v5075_v15  ;;  %v5093_v2 = vld [vmem:[%s5351_s20 + $0x1a8] sm:$0xff]   ;;  %v5096_v10 = vld [vmem:[%s5351_s20 + $0x130] sm:$0xff]   ;;  %v5098_v35 = vld [vmem:[%s5351_s20 + $0x178] sm:$0xff]  }
 0xae3   :  { %v5097_v29 = vld [vmem:[%s5351_s20 + $0x1b0] sm:$0xff]   ;;  %v5099_v15 = vld [vmem:[%s5351_s20 + $0x1f8] sm:$0xff]  }
 0xae4   :  { %4945 = vmatpush3.bf16.msra.mxu0 %v5076_v14  ;;  %4967 = vmatpush3.bf16.msra.mxu1 %v5077_v8  ;;  %v5101_v25 = vld [vmem:[%s5351_s20 + $0x1b8] sm:$0xff]   ;;  %v2688_v14 = vld [vmem:[%s7919_s21] sm:$0xff]  ;;  %s7943_s20 = sld [smem:[#allocation23_spill]] }
 0xae5   :  { %4946 = vmatprep.subr.bf16.mxu0 %v5078_v22  ;;  %4968 = vmatprep.subr.bf16.mxu1 %v5079_v20  ;;  %v2692_v8 = vld [vmem:[%s7919_s21 + $0x20] sm:$0xff]  ;;  %v2689_v22 = vld [vmem:[%s7919_s21 + $0x8] sm:$0xff] }
 0xae6   :  { %v4842_v20 = vcombine.low %v2688_v14, %v2692_v8 }
 0xae8   :  { %4947 = vmatpush3.bf16.msra.mxu0 %v5080_v31  ;;  %4969 = vmatpush3.bf16.msra.mxu1 %v5081_v9  ;;  %v4843_v31 = vcombine.high %v2688_v14, %v2692_v8  ;;  %v2693_v9 = vld [vmem:[%s7919_s21 + $0x28] sm:$0xff] }
 0xae9   :  { %4948 = vmatprep.subr.bf16.mxu0 %v5082_v38  ;;  %4970 = vmatprep.subr.bf16.mxu1 %v5083_v60  ;;  %v4844_v38 = vcombine.low %v2689_v22, %v2693_v9  ;;  %v4845_v60 = vcombine.high %v2689_v22, %v2693_v9  ;;  %v2700_v9 = vld [vmem:[%s7919_s21 + $0x60] sm:$0xff] }
 0xaec   :  { %4949 = vmatpush3.bf16.msra.mxu0 %v5084_v34  ;;  %4971 = vmatpush3.bf16.msra.mxu1 %v5085_v62  ;;  %v4777_v34 = vld [vmem:[%s7920_s25] ss:$0 sm:$0xff] }
 0xaed   :  { %4950 = vmatprep.subr.bf16.mxu0 %v5086_v40  ;;  %4972 = vmatprep.subr.bf16.mxu1 %v5087_v45 }
 0xaf0   :  { %4951 = vmatpush3.bf16.msra.mxu0 %v5088_v51  ;;  %4973 = vmatpush3.bf16.msra.mxu1 %v5089_v37 }
 0xaf1   :  { %4952 = vmatprep.subr.bf16.mxu0 %v5090_v59  ;;  %4974 = vmatprep.subr.bf16.mxu1 %v5091_v49 }
 0xaf4   :  { %4953 = vmatpush3.bf16.msra.mxu0 %v5092_v7  ;;  %4975 = vmatpush3.bf16.msra.mxu1 %v5093_v2 }
 0xaf5   :  { %4954 = vmatprep.subr.bf16.mxu0 %v5094_v32  ;;  %4976 = vmatprep.subr.bf16.mxu1 %v5095_v5 }
 0xaf8   :  { %4955 = vmatpush3.bf16.msra.mxu0 %v5096_v10  ;;  %4977 = vmatpush3.bf16.msra.mxu1 %v5097_v29 }
 0xaf9   :  { %4956 = vmatprep.subr.bf16.mxu0 %v5098_v35  ;;  %4978 = vmatprep.subr.bf16.mxu1 %v5099_v15 }
 0xafc   :  { %4957 = vmatpush3.bf16.msra.mxu0 %v5100_v50  ;;  %4979 = vmatpush3.bf16.msra.mxu1 %v5101_v25 }
 0xafd   :  { %2830 = vmatprep.subr.bf16.mxu0 %v4843_v31  ;;  %2871 = vmatprep.subr.bf16.mxu1 %v4845_v60  ;;  %v2696_v31 = vld [vmem:[%s7919_s21 + $0x40] sm:$0xff] }
 0xafe   :  { %v4850_v60 = vcombine.low %v2696_v31, %v2700_v9 }
 0xaff   :  { %2623 = vmatmul.mubr.bf16.vlgmr.msra.gmra.mrb[24].mxu0 %v1987_v52  ;;  %2663 = vmatmul.mubr.bf16.vlgmr.msra.gmra.mrb[24].mxu1 %v1989_v41 }
 0xb00   :  { %2862 = vmatprep.mubr.bf16.mxu0 %v7914_v55  ;;  %2903 = vmatprep.mubr.bf16.mxu1 %v7914_v55 }
 0xb01   :  { %2831 = vmatpush1.bf16.msra.mxu0 %v4842_v20  ;;  %2872 = vmatpush1.bf16.msra.mxu1 %v4844_v38  ;;  %v2697_v38 = vld [vmem:[%s7919_s21 + $0x48] sm:$0xff] }
 0xbb2   :  { %v4914_v56 = vpop.f32.mrb[20].mxu0  ;;  %v4936_v24 = vpop.f32.mrb[20].mxu1 }
 0xbb3   :  { %v4915_v62 = vpop.f32.mrb[21].mxu0  ;;  %v4937_v40 = vpop.f32.mrb[21].mxu1 }
 0xbb4   :  { %v4916_v45 = vadd.f32 %v4915_v62, %v4914_v56  ;;  %v4938_v51 = vadd.f32 %v4937_v40, %v4936_v24  ;;  %v4917_v37 = vpop.f32.mrb[22].mxu0  ;;  %v4939_v59 = vpop.f32.mrb[22].mxu1  ;;  %v4851_v56 = vcombine.high %v2696_v31, %v2700_v9  ;;  %v2701_v24 = vld [vmem:[%s7919_s21 + $0x68] sm:$0xff]  ;;  %v2694_v62 = vld [vmem:[%s7919_s21 + $0x30] sm:$0xff]  ;;  %v2704_v9 = vld [vmem:[%s7923_s8] sm:$0xff] }
 0xbb5   :  { %v4918_v49 = vpop.f32.mrb[23].mxu0  ;;  %v4940_v7 = vpop.f32.mrb[23].mxu1  ;;  %v4852_v40 = vcombine.low %v2697_v38, %v2701_v24  ;;  %v2691_v59 = vld [vmem:[%s7919_s21 + $0x18] sm:$0xff] }
 0xbb6   :  { %v2545_v2 = vadd.f32 %v4916_v45, %v4777_v34  ;;  %v2690_v34 = vld [vmem:[%s7919_s21 + $0x10] sm:$0xff]  ;;  %v4853_v45 = vcombine.high %v2697_v38, %v2701_v24  ;;  %2832 = vmatprep.subr.bf16.mxu0 %v4851_v56  ;;  %v2695_v49 = vld [vmem:[%s7919_s21 + $0x38] sm:$0xff] }
 0xbb7   :  { %v4847_v37 = vcombine.high %v2690_v34, %v2694_v62  ;;  %2833 = vmatpush1.bf16.msra.mxu0 %v4850_v60  ;;  %v4848_v7 = vcombine.low %v2691_v59, %v2695_v49  ;;  %v7924_v38 = vld [vmem:[#allocation29_spill] sm:$0xff]  ;;  %v7925_v56 = vld [vmem:[#allocation31_spill] sm:$0xff] }
 0xbb8   :  { %v2585_v32 = vadd.f32 %v4938_v51, %v2545_v2  ;;  %v4846_v51 = vcombine.low %v2690_v34, %v2694_v62  ;;  %2873 = vmatprep.subr.bf16.mxu1 %v4853_v45  ;;  %v4849_v2 = vcombine.high %v2691_v59, %v2695_v49  ;;  %v2709_v60 = vrot.slane %v2704_v9, %v7924_v38  ;;  %v7926_v34 = vld [vmem:[#allocation35_spill] sm:$0xff]  ;;  %v7929_v38 = vld [vmem:[#allocation32_spill] sm:$0xff] }
 0xbb9   :  { %2874 = vmatpush1.bf16.msra.mxu1 %v4852_v40  ;;  %2912 = vmatprep.subr.bf16.mxu0 %v4847_v37  ;;  %v2717_v24 = vrot.slane %v2704_v9, %v7925_v56  ;;  %v2713_v62 = vrot.slane %v2704_v9, %v7926_v34  ;;  %v7927_v40 = vld [vmem:[#allocation33_spill] sm:$0xff]  ;;  %v2733_v56 = vrot.slane %v2704_v9, %v7929_v38  ;;  %v7930_v34 = vld [vmem:[#allocation36_spill] sm:$0xff] }
 0xbba   :  { %2953 = vmatprep.subr.bf16.mxu1 %v4849_v2  ;;  %v2721_v45 = vrot.slane %v2704_v9, %v7927_v40  ;;  %v2729_v40 = vrot.slane %v2704_v9, %v7930_v34 }
 0xbd2   :  { %v4958_v5 = vpop.f32.mrb[24].mxu0  ;;  %v4980_v10 = vpop.f32.mrb[24].mxu1 }
 0xbd3   :  { %v4959_v29 = vpop.f32.mrb[25].mxu0  ;;  %v4981_v35 = vpop.f32.mrb[25].mxu1 }
 0xbd4   :  { %v4960_v15 = vadd.f32 %v4959_v29, %v4958_v5  ;;  %v4982_v50 = vadd.f32 %v4981_v35, %v4980_v10  ;;  %v4961_v25 = vpop.f32.mrb[26].mxu0  ;;  %v4983_v52 = vpop.f32.mrb[26].mxu1  ;;  %v2670_v5 = vld [vmem:[%s7922_s29] sm:$0x3]  ;;  %v2698_v35 = vld [vmem:[%s7919_s21 + $0x50] sm:$0xff] }
 0xbd5   :  { %v4962_v41 = vpop.f32.mrb[27].mxu0  ;;  %v4984_v14 = vpop.f32.mrb[27].mxu1  ;;  %v2703_v25 = vld [vmem:[%s7919_s21 + $0x78] sm:$0xff] }
 0xbd6   :  { %v2625_v8 = vadd.f32 %v4960_v15, %v2585_v32  ;;  %v2702_v15 = vld [vmem:[%s7919_s21 + $0x70] sm:$0xff] }
 0xbd7   :  { %v4855_v14 = vcombine.high %v2698_v35, %v2702_v15 }
 0xbd8   :  { %v6778_v22 = vadd.f32 %v4982_v50, %v2625_v8  ;;  %v2699_v50 = vld [vmem:[%s7919_s21 + $0x58] sm:$0xff] }
 0xbd9   :  { %v4857_v8 = vcombine.high %v2699_v50, %v2703_v25  ;;  %v4856_v31 = vcombine.low %v2699_v50, %v2703_v25 }
 0xbda   :  { %7921 = vst [vmem:[#allocation40_spill] sm:$0xff] %v6778_v22  ;;  %v2671_v20 = vmul.f32 1.442695, %v6778_v22  ;;  %2680 = vst.msk [vmem:[#allocation2] sm:$0x3] %vm2679_vm12, %v6778_v22 }
 0xbdc   :  { %5110 = vpow2.f32 %v2671_v20  ;;  %v4854_v20 = vcombine.low %v2698_v35, %v2702_v15 }
 0xbe6   :  { %v5111_v32 = vpop.eup %5110 }
 0xbe7   :  { %2674 = vrot.lane.b32.xlu0 %v5111_v32, %s5263_s3 }
 0xc59   :  { %v2675_v10 = vpop.permute.xlu0 %2674 }
 0xc5a   :  { %v2677_v29 = vmul.f32 %v2675_v10, %v2670_v5 }
 0xc5c   :  { %v2678_v52 = vadd.f32 %v2677_v29, %v6778_v22 }
 0xc5e   :  { %v2687_v41 = vpack.c.bf16 %v2678_v52, %v2678_v52  ;;  %2686 = vst.msk [vmem:[#allocation6] sm:$0x3] %vm2679_vm12, %v2678_v52 }
 0xc60   :  { %4858 = vmatmul.mubr.msk.bf16.vlgmr.msra.gmra.mrb[28].mxu0 %vm2826_vm14, %v2687_v41  ;;  %4859 = vmatmul.mubr.msk.bf16.vlgmr.msra.gmra.mrb[28].mxu1 %vm2826_vm14, %v2687_v41 }
 0xc61   :  { %2913 = vmatpush1.bf16.msra.mxu0 %v4846_v51  ;;  %2954 = vmatpush1.bf16.msra.mxu1 %v4848_v7 }
 0xc62   :  { %2914 = vmatprep.subr.bf16.mxu0 %v4855_v14  ;;  %2955 = vmatprep.subr.bf16.mxu1 %v4857_v8 }
 0xc63   :  { %2944 = vmatprep.mubr.bf16.mxu0 %v7914_v55  ;;  %2985 = vmatprep.mubr.bf16.mxu1 %v7914_v55 }
 0xc65   :  { %2915 = vmatpush1.bf16.msra.mxu0 %v4854_v20  ;;  %2956 = vmatpush1.bf16.msra.mxu1 %v4856_v31  ;;  %v7928_v20 = vld [vmem:[#allocation30_spill] sm:$0xff] }
 0xc66   :  { %v2725_v31 = vrot.slane %v2704_v9, %v7928_v20 }
 0xc68   :  { %4860 = vmatmul.mubr.msk.bf16.vlgmr.msra.gmra.mrb[32].mxu0 %vm2826_vm14, %v2687_v41  ;;  %4861 = vmatmul.mubr.msk.bf16.vlgmr.msra.gmra.mrb[32].mxu1 %vm2826_vm14, %v2687_v41 }
 0xc69   :  { %3260 = vmatprep.mubr.bf16.mxu0 %v7914_v55  ;;  %3301 = vmatprep.mubr.bf16.mxu1 %v7914_v55 }
 0xd33   :  { %v2864_v51 = vpop.f32.mrb[28].mxu0  ;;  %v2905_v37 = vpop.f32.mrb[28].mxu1 }
 0xd34   :  { %v2865_v59 = vadd.f32 %v2864_v51, %v2709_v60  ;;  %v2906_v49 = vadd.f32 %v2905_v37, %v2717_v24  ;;  %v2866_v7 = vpop.f32.mrb[29].mxu0  ;;  %v2907_v2 = vpop.f32.mrb[29].mxu1 }
 0xd35   :  { %v2867_v32 = vadd.f32 %v2866_v7, %v2713_v62  ;;  %v2908_v5 = vadd.f32 %v2907_v2, %v2721_v45  ;;  %v2868_v10 = vpop.f32.mrb[30].mxu0  ;;  %v2909_v29 = vpop.f32.mrb[30].mxu1  ;;  %v7931_v62 = vld [vmem:[#allocation34_spill] sm:$0xff] }
 0xd36   :  { %v2994_v35 = vmax.f32 %v2865_v59, 0.0  ;;  %v2996_v15 = vmax.f32 %v2906_v49, 0.0  ;;  %v2869_v50 = vpop.f32.mrb[31].mxu0  ;;  %v2910_v25 = vpop.f32.mrb[31].mxu1  ;;  %v2737_v45 = vrot.slane %v2704_v9, %v7931_v62 }
 0xd37   :  { %v2995_v52 = vmax.f32 %v2867_v32, 0.0  ;;  %v2997_v41 = vmax.f32 %v2908_v5, 0.0 }
 0xd38   :  { %v3004_v14 = vrot.slane %v2994_v35, 1  ;;  %v3020_v8 = vrot.slane %v2996_v15, 7 }
 0xd39   :  { %v3005_v60 = vrot.slane %v2995_v52, 1  ;;  %v3021_v24 = vrot.slane %v2997_v41, 7 }
 0xd3a   :  { %v3044_v51 = vsel %vm252_vm0, %v2994_v35, %v3020_v8  ;;  %v3046_v37 = vsel %vm252_vm0, %v3004_v14, %v2996_v15 }
 0xd3b   :  { %v3045_v59 = vsel %vm252_vm0, %v2995_v52, %v3021_v24  ;;  %v3047_v49 = vsel %vm252_vm0, %v3005_v60, %v2997_v41  ;;  %v2946_v7 = vpop.f32.mrb[32].mxu0  ;;  %v2987_v2 = vpop.f32.mrb[32].mxu1 }
 0xd3c   :  { %v2947_v32 = vadd.f32 %v2946_v7, %v2725_v31  ;;  %v2988_v5 = vadd.f32 %v2987_v2, %v2733_v56  ;;  %v2948_v10 = vpop.f32.mrb[33].mxu0  ;;  %v2989_v29 = vpop.f32.mrb[33].mxu1 }
 0xd3d   :  { %v2949_v50 = vadd.f32 %v2948_v10, %v2729_v40  ;;  %v2990_v25 = vadd.f32 %v2989_v29, %v2737_v45  ;;  %v2950_v20 = vpop.f32.mrb[34].mxu0  ;;  %v2991_v38 = vpop.f32.mrb[34].mxu1 }
 0xd3e   :  { %v2998_v34 = vmax.f32 %v2947_v32, 0.0  ;;  %v3000_v9 = vmax.f32 %v2988_v5, 0.0  ;;  %v2951_v62 = vpop.f32.mrb[35].mxu0  ;;  %v2992_v35 = vpop.f32.mrb[35].mxu1 }
 0xd3f   :  { %v2999_v8 = vmax.f32 %v2949_v50, 0.0  ;;  %v3001_v15 = vmax.f32 %v2990_v25, 0.0 }
 0xd40   :  { %v3028_v14 = vrot.slane %v2998_v34, 6  ;;  %v4864_v52 = vrot.slane %v2998_v34, 7  ;;  %v3036_v24 = vrot.slane %v3000_v9, 5  ;;  %v4866_v41 = vrot.slane %v3000_v9, 6 }
 0xd41   :  { %v3029_v60 = vrot.slane %v2999_v8, 6  ;;  %v4865_v22 = vrot.slane %v2999_v8, 7  ;;  %v3037_v31 = vrot.slane %v3001_v15, 5  ;;  %v4867_v56 = vrot.slane %v3001_v15, 6 }
 0xd42   :  { %v3048_v7 = vsel %vm257_vm1, %v3044_v51, %v3028_v14  ;;  %v3050_v40 = vsel %vm257_vm1, %v3046_v37, %v4864_v52 }
 0xd43   :  { %v3052_v45 = vsel %vm262_vm2, %v3048_v7, %v3036_v24  ;;  %v3054_v2 = vsel %vm262_vm2, %v3050_v40, %v4866_v41  ;;  %v3049_v32 = vsel %vm257_vm1, %v3045_v59, %v3029_v60  ;;  %v3051_v5 = vsel %vm257_vm1, %v3047_v49, %v4865_v22 }
 0xd44   :  { %v6827_v10 = vsel %vm267_vm3, %v3052_v45, 0.0  ;;  %v6830_v29 = vsel %vm267_vm3, %v3054_v2, 0.0  ;;  %v3053_v50 = vsel %vm262_vm2, %v3049_v32, %v3037_v31  ;;  %v3055_v51 = vsel %vm262_vm2, %v3051_v5, %v4867_v56 }
 0xd45   :  { %3060 = vrot.lane.b32.xlu1 %v6827_v10, %s5255_s5  ;;  %3080 = vrot.lane.b32.xlu0 %v6830_v29, %s5254_s0  ;;  %v6859_v22 = vsel %vm267_vm3, %v3053_v50, 0.0  ;;  %v6870_v37 = vsel %vm267_vm3, %v3055_v51, 0.0  ;;  %vm7934_vm1 = vcmask 588800  }
 0xd46   :  { %vm7935_vm2 = vmmov %vm7934_vm1 }
 0xd49   :  { %3076 = vrot.lane.b32.xlu1 %v6827_v10, %s5254_s0  ;;  %3112 = vrot.lane.b32.xlu0 %v6830_v29, %s5257_s1 }
 0xd4d   :  { %3132 = vrot.lane.b32.xlu0 %v6830_v29, %s5258_s2  ;;  %3064 = vrot.lane.b32.xlu1 %v6830_v29, %s5255_s5 }
 0xd51   :  { %3148 = vrot.lane.b32.xlu0 %v6830_v29, %s5259_s7  ;;  %3092 = vrot.lane.b32.xlu1 %v6827_v10, %s5256_s28 }
 0xd55   :  { %3164 = vrot.lane.b32.xlu0 %v6830_v29, %s5260_s10  ;;  %3108 = vrot.lane.b32.xlu1 %v6827_v10, %s5257_s1 }
 0xd59   :  { %3160 = vrot.lane.b32.xlu0 %v6827_v10, %s5260_s10  ;;  %3096 = vrot.lane.b32.xlu1 %v6830_v29, %s5256_s28 }
 0xd5d   :  { %3062 = vrot.lane.b32.xlu0 %v6859_v22, %s5255_s5  ;;  %3128 = vrot.lane.b32.xlu1 %v6827_v10, %s5258_s2 }
 0xd61   :  { %3078 = vrot.lane.b32.xlu0 %v6859_v22, %s5254_s0  ;;  %3144 = vrot.lane.b32.xlu1 %v6827_v10, %s5259_s7 }
 0xd65   :  { %3082 = vrot.lane.b32.xlu0 %v6870_v37, %s5254_s0  ;;  %3176 = vrot.lane.b32.xlu1 %v6827_v10, %s5262_s11 }
 0xd69   :  { %3094 = vrot.lane.b32.xlu0 %v6859_v22, %s5256_s28  ;;  %3066 = vrot.lane.b32.xlu1 %v6870_v37, %s5255_s5 }
 0xd6d   :  { %3110 = vrot.lane.b32.xlu0 %v6859_v22, %s5257_s1  ;;  %3098 = vrot.lane.b32.xlu1 %v6870_v37, %s5256_s28 }
 0xd71   :  { %3114 = vrot.lane.b32.xlu0 %v6870_v37, %s5257_s1  ;;  %3130 = vrot.lane.b32.xlu1 %v6859_v22, %s5258_s2 }
 0xd75   :  { %3134 = vrot.lane.b32.xlu0 %v6870_v37, %s5258_s2  ;;  %3146 = vrot.lane.b32.xlu1 %v6859_v22, %s5259_s7 }
 0xd79   :  { %3166 = vrot.lane.b32.xlu0 %v6870_v37, %s5260_s10  ;;  %3162 = vrot.lane.b32.xlu1 %v6859_v22, %s5260_s10 }
 0xd7d   :  { %3178 = vrot.lane.b32.xlu0 %v6859_v22, %s5262_s11  ;;  %3150 = vrot.lane.b32.xlu1 %v6870_v37, %s5259_s7 }
 0xd81   :  { %3182 = vrot.lane.b32.xlu0 %v6870_v37, %s5262_s11  ;;  %3180 = vrot.lane.b32.xlu1 %v6830_v29, %s5262_s11 }
 0xdb7   :  { %v3061_v59 = vpop.permute.xlu1 %3060  ;;  %v3081_v49 = vpop.permute.xlu0 %3080 }
 0xdbb   :  { %v3077_v25 = vpop.permute.xlu1 %3076  ;;  %v3113_v20 = vpop.permute.xlu0 %3112 }
 0xdbf   :  { %v6904_v38 = vpop.permute.xlu0 %3132  ;;  %v3065_v34 = vpop.permute.xlu1 %3064 }
 0xdc3   :  { %v6906_v9 = vpop.permute.xlu0 %3148  ;;  %v3093_v62 = vpop.permute.xlu1 %3092 }
 0xdc7   :  { %v6908_v35 = vpop.permute.xlu0 %3164  ;;  %v3109_v8 = vpop.permute.xlu1 %3108 }
 0xdcb   :  { %v6910_v15 = vpop.permute.xlu0 %3160  ;;  %v3097_v14 = vpop.permute.xlu1 %3096 }
 0xdcf   :  { %v3063_v52 = vpop.permute.xlu0 %3062  ;;  %v6912_v24 = vpop.permute.xlu1 %3128 }
 0xdd0   :  { %v3070_v41 = vsel %vm282_vm4, %v3061_v59, %v3063_v52 }
 0xdd1   :  { %v3073_v7 = vmul.f32 %v3070_v41, %v5615_v61  ;;  %v3069_v41 = vsel %vm282_vm4, %v3063_v52, %v3065_v34 }
 0xdd2   :  { %v3074_v52 = vmul.f32 %v3069_v41, %v5656_v23 }
 0xdd3   :  { %v3079_v60 = vpop.permute.xlu0 %3078  ;;  %v6916_v31 = vpop.permute.xlu1 %3144 }
 0xdd4   :  { %v3086_v56 = vsel %vm315_vm5, %v3077_v25, %v3079_v60  ;;  %v3085_v5 = vsel %vm315_vm5, %v3079_v60, %v3081_v49 }
 0xdd5   :  { %v3089_v40 = vmul.f32 %v3086_v56, %v7915_v4  ;;  %v3090_v56 = vmul.f32 %v3085_v5, %v7916_v39 }
 0xdd7   :  { %v3083_v45 = vpop.permute.xlu0 %3082  ;;  %v6922_v2 = vpop.permute.xlu1 %3176  ;;  %v3193_v32 = vpack.c.bf16 %v3089_v40, %v3073_v7 }
 0xdd8   :  { %v3084_v50 = vsel %vm315_vm5, %v3081_v49, %v3083_v45  ;;  %v3087_v51 = vsel %vm315_vm5, %v3083_v45, %v3077_v25 }
 0xdd9   :  { %3228 = vmatprep.subr.bf16.mxu0 %v3193_v32  ;;  %v3088_v40 = vmul.f32 %v3087_v51, %v5642_v18  ;;  %v3091_v49 = vmul.f32 %v3084_v50, %v5652_v21  ;;  %v3194_v51 = vpack.c.bf16 %v3090_v56, %v3074_v52 }
 0xddb   :  { %v3095_v55 = vpop.permute.xlu0 %3094  ;;  %v3067_v11 = vpop.permute.xlu1 %3066 }
 0xddc   :  { %v3068_v7 = vsel %vm282_vm4, %v3065_v34, %v3067_v11  ;;  %v3071_v60 = vsel %vm282_vm4, %v3067_v11, %v3061_v59  ;;  %v3102_v45 = vsel %vm348_vm6, %v3093_v62, %v3095_v55 }
 0xddd   :  { %v3072_v32 = vmul.f32 %v3071_v60, %v5638_v17  ;;  %v3075_v25 = vmul.f32 %v3068_v7, %v5646_v19  ;;  %v3105_v7 = vmul.f32 %v3102_v45, %v5682_v47 }
 0xddf   :  { %v3192_v5 = vpack.c.bf16 %v3088_v40, %v3072_v32  ;;  %v3111_v39 = vpop.permute.xlu0 %3110  ;;  %v3099_v4 = vpop.permute.xlu1 %3098  ;;  %v3195_v34 = vpack.c.bf16 %v3091_v49, %v3075_v25  ;;  %v3125_v40 = vmul.f32 %v6859_v22, %v5726_v27  ;;  %v3101_v49 = vsel %vm348_vm6, %v3095_v55, %v3097_v14 }
 0xde0   :  { %v3117_v11 = vsel %vm381_vm7, %v3111_v39, %v3113_v20  ;;  %v3118_v59 = vsel %vm381_vm7, %v3109_v8, %v3111_v39  ;;  %v3103_v50 = vsel %vm348_vm6, %v3099_v4, %v3093_v62  ;;  %v3100_v41 = vsel %vm348_vm6, %v3097_v14, %v3099_v4 }
 0xde1   :  { %v3121_v60 = vmul.f32 %v3118_v59, %v5686_v48  ;;  %3229 = vmatpush1.bf16.msra.mxu0 %v3192_v5  ;;  %3269 = vmatprep.subr.bf16.mxu1 %v3195_v34  ;;  %v3122_v39 = vmul.f32 %v3117_v11, %v5714_v13  ;;  %v3104_v62 = vmul.f32 %v3103_v50, %v5696_v1 }
 0xde2   :  { %3270 = vmatpush1.bf16.msra.mxu1 %v3194_v51  ;;  %v3107_v14 = vmul.f32 %v3100_v41, %v5710_v12  ;;  %v3126_v41 = vmul.f32 %v6830_v29, %v5749_v46 }
 0xde3   :  { %v3115_v56 = vpop.permute.xlu0 %3114  ;;  %v3131_v32 = vpop.permute.xlu1 %3130  ;;  %v3197_v25 = vpack.c.bf16 %v3121_v60, %v3105_v7 }
 0xde4   :  { %v3116_v45 = vsel %vm381_vm7, %v3113_v20, %v3115_v56  ;;  %v3119_v4 = vsel %vm381_vm7, %v3115_v56, %v3109_v8  ;;  %v3137_v22 = vsel %vm434_vm8, %v3131_v32, %v6904_v38  ;;  %v3138_v55 = vsel %vm434_vm8, %v6912_v24, %v3131_v32 }
 0xde5   :  { %v3120_v52 = vmul.f32 %v3119_v4, %v5704_v6  ;;  %v3123_v5 = vmul.f32 %v3116_v45, %v5718_v16  ;;  %v3141_v34 = vmul.f32 %v3137_v22, %v5733_v30  ;;  %3230 = vmatprep.subr.bf16.mxu0 %v3197_v25  ;;  %v3106_v20 = vmul.f32 %v3101_v49, %v5700_v3 }
 0xde6   :  { %v3124_v8 = vmul.f32 %v6827_v10, %v5753_v53  ;;  %v3140_v59 = vmul.f32 %v3138_v55, %v5768_v63  ;;  %v3127_v10 = vmul.f32 %v6870_v37, %v5757_v54 }
 0xde7   :  { %v3196_v11 = vpack.c.bf16 %v3120_v52, %v3104_v62  ;;  %v3135_v50 = vpop.permute.xlu0 %3134  ;;  %v3147_v51 = vpop.permute.xlu1 %3146  ;;  %v3199_v7 = vpack.c.bf16 %v3123_v5, %v3107_v14  ;;  %v3201_v60 = vpack.c.bf16 %v3141_v34, %v3125_v40  ;;  %v3198_v62 = vpack.c.bf16 %v3122_v39, %v3106_v20 }
 0xde8   :  { %v3136_v56 = vsel %vm434_vm8, %v6904_v38, %v3135_v50  ;;  %v3139_v49 = vsel %vm434_vm8, %v3135_v50, %v6912_v24  ;;  %v3154_v29 = vsel %vm467_vm9, %v6916_v31, %v3147_v51  ;;  %v3153_v38 = vsel %vm467_vm9, %v3147_v51, %v6906_v9 }
 0xde9   :  { %v3142_v32 = vmul.f32 %v3136_v56, %v5763_v43  ;;  %v3143_v25 = vmul.f32 %v3139_v49, %v5772_v0  ;;  %3231 = vmatpush1.bf16.msra.mxu0 %v3196_v11  ;;  %3271 = vmatprep.subr.bf16.mxu1 %v3199_v7  ;;  %v3200_v24 = vpack.c.bf16 %v3140_v59, %v3124_v8 }
 0xdea   :  { %3232 = vmatprep.subr.bf16.mxu0 %v3201_v60  ;;  %3272 = vmatpush1.bf16.msra.mxu1 %v3198_v62  ;;  %v3156_v4 = vmul.f32 %v3154_v29, %v5811_v26  ;;  %v3157_v14 = vmul.f32 %v3153_v38, %v5793_v42 }
 0xdeb   :  { %v3202_v40 = vpack.c.bf16 %v3142_v32, %v3126_v41  ;;  %v3167_v37 = vpop.permute.xlu0 %3166  ;;  %v3163_v39 = vpop.permute.xlu1 %3162  ;;  %v3203_v45 = vpack.c.bf16 %v3143_v25, %v3127_v10  ;;  %v7024_v41 = vld [vmem:[%s5281_s9 + $0x20] ss:$0 sm:$0xff] }
 0xdec   :  { %v3169_v22 = vsel %vm500_vm10, %v3163_v39, %v6908_v35  ;;  %v3170_v55 = vsel %vm500_vm10, %v6910_v15, %v3163_v39  ;;  %v3168_v52 = vsel %vm500_vm10, %v6908_v35, %v3167_v37  ;;  %v3171_v20 = vsel %vm500_vm10, %v3167_v37, %v6910_v15  ;;  %v7932_v10 = vld [vmem:[#allocation39_spill] sm:$0xff]  ;;  %v7037_v37 = vld [vmem:[%s5281_s9 + $0x38] ss:$0 sm:$0xff] }
 0xded   :  { %v3172_v5 = vmul.f32 %v3170_v55, %v5825_v33  ;;  %v3173_v34 = vmul.f32 %v3169_v22, %v5797_v44  ;;  %3233 = vmatpush1.bf16.msra.mxu0 %v3200_v24  ;;  %3273 = vmatprep.subr.bf16.mxu1 %v3203_v45  ;;  %v3174_v51 = vmul.f32 %v3168_v52, %v5815_v28  ;;  %v7041_v45 = vld [vmem:[%s5281_s9 + $0x28] ss:$0 sm:$0xff]  ;;  %v7045_v22 = vld [vmem:[%s5281_s9 + $0x30] ss:$0 sm:$0xff] }
 0xdee   :  { %3274 = vmatpush1.bf16.msra.mxu1 %v3202_v40  ;;  %v3175_v60 = vmul.f32 %v3171_v20, %v5829_v36  ;;  %v3212_v20 = vld [vmem:[%s7933_s14] sm:$0xf] }
 0xdef   :  { %v3204_v8 = vpack.c.bf16 %v3172_v5, %v3156_v4  ;;  %v3179_v11 = vpop.permute.xlu0 %3178  ;;  %v3151_v59 = vpop.permute.xlu1 %3150  ;;  %v3205_v50 = vpack.c.bf16 %v3173_v34, %v3157_v14 }
 0xdf0   :  { %v3186_v35 = vsel %vm533_vm11, %v6922_v2, %v3179_v11  ;;  %v3152_v7 = vsel %vm467_vm9, %v6906_v9, %v3151_v59  ;;  %v3155_v15 = vsel %vm467_vm9, %v3151_v59, %v6916_v31 }
 0xdf1   :  { %v3188_v56 = vmul.f32 %v7024_v41, %v3186_v35  ;;  %v3158_v49 = vmul.f32 %v3152_v7, %v5807_v58  ;;  %v3159_v62 = vmul.f32 %v3155_v15, %v7932_v10  ;;  %3234 = vmatprep.subr.bf16.mxu0 %v3205_v50 }
 0xdf2   :  { %3235 = vmatpush1.bf16.msra.mxu0 %v3204_v8  ;;  %v7936_v8 = vmov 0  }
 0xdf3   :  { %v3206_v9 = vpack.c.bf16 %v3174_v51, %v3158_v49  ;;  %v3183_v32 = vpop.permute.xlu0 %3182  ;;  %v3181_v25 = vpop.permute.xlu1 %3180  ;;  %v3207_v29 = vpack.c.bf16 %v3175_v60, %v3159_v62  ;;  %v3208_v40 = vpack.c.bf16 %v3188_v56, %v3188_v56 }
 0xdf4   :  { %v3187_v31 = vsel %vm533_vm11, %v3183_v32, %v6922_v2  ;;  %v3184_v38 = vsel %vm533_vm11, %v3181_v25, %v3183_v32  ;;  %v3185_v24 = vsel %vm533_vm11, %v3179_v11, %v3181_v25 }
 0xdf5   :  { %v3191_v39 = vmul.f32 %v7037_v37, %v3187_v31  ;;  %v3189_v4 = vmul.f32 %v7041_v45, %v3185_v24  ;;  %v3190_v2 = vmul.f32 %v7045_v22, %v3184_v38  ;;  %3275 = vmatprep.subr.bf16.mxu1 %v3207_v29  ;;  %v3217_v5 = vsel %vm267_vm3, %v3208_v40, 0  ;;  %v3348_v40 = vld [vmem:[%s7937_s19] sm:$0xff] }
 0xdf6   :  { %3276 = vmatpush1.bf16.msra.mxu1 %v3206_v9 }
 0xdf7   :  { %v3211_v55 = vpack.c.bf16 %v3191_v39, %v3191_v39  ;;  %v3209_v14 = vpack.c.bf16 %v3189_v4, %v3189_v4  ;;  %v3210_v52 = vpack.c.bf16 %v3190_v2, %v3190_v2  ;;  %v3338_v39 = vld [vmem:[%s7938_s24] sm:$0xff] }
 0xdf9   :  { %4868 = vmatprep.subr.msk.bf16.mxu0 %vm267_vm3, %v3209_v14  ;;  %4870 = vmatprep.subr.msk.bf16.mxu1 %vm267_vm3, %v3211_v55  ;;  %v3223_v34 = vsel %vm267_vm3, %v3210_v52, 0 }
 0xdfa   :  { %3237 = vmatpush1.bf16.msra.mxu0 %v3217_v5  ;;  %3278 = vmatpush1.bf16.msra.mxu1 %v3223_v34 }
 0xdfd   :  { %4869 = vmatmul.mubr.msk.bf16.vlgmr.msra.gmra.mrb[36].mxu0 %vm7934_vm1, %v3212_v20  ;;  %4871 = vmatmul.mubr.msk.bf16.vlgmr.msra.gmra.mrb[36].mxu1 %vm7935_vm2, %v3212_v20 }
 0xdfe   :  { %3570 = vmatprep.mubr.bf16.mxu0 %v7936_v8  ;;  %3611 = vmatprep.mubr.bf16.mxu1 %v7936_v8 }
 0xed0   :  { %v3262_v11 = vpop.f32.mrb[36].mxu0  ;;  %v3303_v59 = vpop.f32.mrb[36].mxu1 }
 0xed1   :  { %v3316_v50 = vmul.f32 %v3262_v11, %v3262_v11  ;;  %v3264_v51 = vpop.f32.mrb[37].mxu0  ;;  %v3305_v35 = vpop.f32.mrb[37].mxu1  ;;  %v3318_v7 = vmul.f32 %v3303_v59, %v3303_v59 }
 0xed2   :  { %v3310_v15 = vadd.f32 %v3264_v51, %v3262_v11  ;;  %v3317_v60 = vmul.f32 %v3264_v51, %v3264_v51  ;;  %v3266_v56 = vpop.f32.mrb[38].mxu0  ;;  %v3307_v49 = vpop.f32.mrb[38].mxu1  ;;  %v3319_v31 = vmul.f32 %v3305_v35, %v3305_v35 }
 0xed3   :  { %v3267_v62 = vpop.f32.mrb[39].mxu0  ;;  %v3308_v9 = vpop.f32.mrb[39].mxu1 }
 0xed4   :  { %v3320_v32 = vadd.f32 %v3317_v60, %v3316_v50  ;;  %v3311_v25 = vadd.f32 %v3310_v15, %v3303_v59 }
 0xed6   :  { %v3312_v29 = vadd.f32 %v3311_v25, %v3305_v35  ;;  %v3321_v38 = vadd.f32 %v3320_v32, %v3318_v7 }
 0xed8   :  { %3313 = vadd.xlane.f32.xlu1 %v3312_v29  ;;  %v3322_v24 = vadd.f32 %v3321_v38, %v3319_v31 }
 0xeda   :  { %3323 = vadd.xlane.f32.xlu0 %v3322_v24 }
 0xee9   :  { %3351 = vperm.xlu1 %5037, %v3348_v40  }
 0xef0   :  { %3341 = vperm.xlu0 %5036, %v3338_v39  }
 0xf65   :  { %v3314_v4 = vpop.xlane.xlu1 %3313 }
 0xf66   :  { %v3315_v2 = vmul.f32 0.001953125, %v3314_v4 }
 0xf67   :  { %v3324_v55 = vpop.xlane.xlu0 %3323 }
 0xf68   :  { %v3325_v14 = vmul.f32 0.001953125, %v3324_v55  ;;  %v3326_v52 = vmul.f32 %v3315_v2, %v3315_v2  ;;  %v3328_v20 = vsub.f32 %v3262_v11, %v3315_v2  ;;  %v3329_v50 = vsub.f32 %v3264_v51, %v3315_v2 }
 0xf69   :  { %v3331_v60 = vsub.f32 %v3305_v35, %v3315_v2  ;;  %v3352_v25 = vpop.permute.xlu1 %3351  ;;  %v3330_v29 = vsub.f32 %v3303_v59, %v3315_v2 }
 0xf6a   :  { %v3327_v5 = vsub.f32 %v3325_v14, %v3326_v52 }
 0xf6c   :  { %v3332_v34 = vadd.f32 1e-05, %v3327_v5 }
 0xf6e   :  { %5112 = vrsqrt.f32 %v3332_v34 }
 0xf6f   :  { %v3342_v49 = vpop.permute.xlu0 %3341 }
 0xf78   :  { %v5113_v15 = vpop.eup %5112 }
 0xf79   :  { %v3334_v7 = vmul.f32 %v5113_v15, %v3328_v20  ;;  %v3335_v56 = vmul.f32 %v5113_v15, %v3329_v50  ;;  %v3337_v62 = vmul.f32 %v5113_v15, %v3331_v60  ;;  %v3336_v24 = vmul.f32 %v5113_v15, %v3330_v29 }
 0xf7b   :  { %v3344_v9 = vmul.f32 %v3342_v49, %v3334_v7  ;;  %v3345_v32 = vmul.f32 %v3342_v49, %v3335_v56  ;;  %v3347_v40 = vmul.f32 %v3342_v49, %v3337_v62  ;;  %v3346_v11 = vmul.f32 %v3342_v49, %v3336_v24  ;;  %v7939_v49 = vld [vmem:[#allocation37_spill] sm:$0xff] }
 0xf7d   :  { %v3354_v31 = vadd.f32 %v3352_v25, %v3344_v9  ;;  %v3355_v38 = vadd.f32 %v3352_v25, %v3345_v32  ;;  %v3357_v51 = vadd.f32 %v3352_v25, %v3347_v40  ;;  %v3356_v59 = vadd.f32 %v3352_v25, %v3346_v11 }
 0xf7f   :  { %vm3358_vm15 = vcmp.gt.f32.partialorder %v3354_v31, 0.0  ;;  %vm3359_vm13 = vcmp.gt.f32.partialorder %v3355_v38, 0.0  ;;  %v3362_v39 = vmul.f32 0.2, %v3354_v31  ;;  %v3363_v4 = vmul.f32 0.2, %v3355_v38 }
 0xf80   :  { %v3365_v2 = vmul.f32 0.2, %v3357_v51  ;;  %vm3361_vm14 = vcmp.gt.f32.partialorder %v3357_v51, 0.0  ;;  %v3364_v14 = vmul.f32 0.2, %v3356_v59  ;;  %vm3360_vm1 = vcmp.gt.f32.partialorder %v3356_v59, 0.0 }
 0xf81   :  { %v7059_v55 = vsel %vm3358_vm15, %v3354_v31, %v3362_v39  ;;  %v7061_v35 = vsel %vm3359_vm13, %v3355_v38, %v3363_v4  ;;  %vm7942_vm15 = vmmov %vm7935_vm2 }
 0xf82   :  { %3372 = vrot.lane.b32.xlu0 %v7061_v35, %s5255_s5  ;;  %3370 = vrot.lane.b32.xlu1 %v7059_v55, %s5255_s5  ;;  %v7071_v52 = vsel %vm3361_vm14, %v3357_v51, %v3365_v2  ;;  %v7077_v5 = vsel %vm3360_vm1, %v3356_v59, %v3364_v14  ;;  %v7940_v14 = vld [vmem:[#allocation38_spill] sm:$0xff] }
 0xf86   :  { %3388 = vrot.lane.b32.xlu0 %v7061_v35, %s5254_s0  ;;  %3386 = vrot.lane.b32.xlu1 %v7059_v55, %s5254_s0 }
 0xf8a   :  { %3392 = vrot.lane.b32.xlu0 %v7071_v52, %s5254_s0  ;;  %3376 = vrot.lane.b32.xlu1 %v7071_v52, %s5255_s5 }
 0xf8e   :  { %3390 = vrot.lane.b32.xlu0 %v7077_v5, %s5254_s0  ;;  %3374 = vrot.lane.b32.xlu1 %v7077_v5, %s5255_s5 }
 0xf92   :  { %3404 = vrot.lane.b32.xlu0 %v7061_v35, %s5256_s28  ;;  %3402 = vrot.lane.b32.xlu1 %v7059_v55, %s5256_s28 }
 0xf96   :  { %3420 = vrot.lane.b32.xlu0 %v7061_v35, %s5257_s1  ;;  %3418 = vrot.lane.b32.xlu1 %v7059_v55, %s5257_s1 }
 0xf9a   :  { %3424 = vrot.lane.b32.xlu0 %v7071_v52, %s5257_s1  ;;  %3408 = vrot.lane.b32.xlu1 %v7071_v52, %s5256_s28 }
 0xf9e   :  { %3422 = vrot.lane.b32.xlu0 %v7077_v5, %s5257_s1  ;;  %3406 = vrot.lane.b32.xlu1 %v7077_v5, %s5256_s28 }
 0xfa2   :  { %3442 = vrot.lane.b32.xlu0 %v7077_v5, %s5258_s2  ;;  %3440 = vrot.lane.b32.xlu1 %v7061_v35, %s5258_s2 }
 0xfa6   :  { %3444 = vrot.lane.b32.xlu0 %v7071_v52, %s5258_s2  ;;  %3438 = vrot.lane.b32.xlu1 %v7059_v55, %s5258_s2 }
 0xfaa   :  { %3458 = vrot.lane.b32.xlu0 %v7077_v5, %s5259_s7  ;;  %3456 = vrot.lane.b32.xlu1 %v7061_v35, %s5259_s7 }
 0xfae   :  { %3474 = vrot.lane.b32.xlu0 %v7077_v5, %s5260_s10  ;;  %3472 = vrot.lane.b32.xlu1 %v7061_v35, %s5260_s10 }
 0xfb2   :  { %3470 = vrot.lane.b32.xlu0 %v7059_v55, %s5260_s10  ;;  %3454 = vrot.lane.b32.xlu1 %v7059_v55, %s5259_s7 }
 0xfb6   :  { %3476 = vrot.lane.b32.xlu0 %v7071_v52, %s5260_s10  ;;  %3460 = vrot.lane.b32.xlu1 %v7071_v52, %s5259_s7 }
 0xfba   :  { %3488 = vrot.lane.b32.xlu0 %v7061_v35, %s5262_s11  ;;  %3486 = vrot.lane.b32.xlu1 %v7059_v55, %s5262_s11 }
 0xfbe   :  { %3492 = vrot.lane.b32.xlu0 %v7071_v52, %s5262_s11  ;;  %3490 = vrot.lane.b32.xlu1 %v7077_v5, %s5262_s11 }
 0xff4   :  { %v3373_v34 = vpop.permute.xlu0 %3372  ;;  %v3371_v20 = vpop.permute.xlu1 %3370 }
 0xff5   :  { %v3380_v50 = vsel %vm282_vm4, %v3371_v20, %v3373_v34 }
 0xff6   :  { %v3383_v56 = vmul.f32 %v3380_v50, %v5615_v61 }
 0xff8   :  { %v3389_v15 = vpop.permute.xlu0 %3388  ;;  %v3387_v60 = vpop.permute.xlu1 %3386 }
 0xff9   :  { %v3396_v7 = vsel %vm315_vm5, %v3387_v60, %v3389_v15 }
 0xffa   :  { %v3399_v62 = vmul.f32 %v3396_v7, %v7939_v49 }
 0xffc   :  { %v3393_v9 = vpop.permute.xlu0 %3392  ;;  %v3377_v32 = vpop.permute.xlu1 %3376  ;;  %v3503_v25 = vpack.c.bf16 %v3399_v62, %v3383_v56 }
 0xffd   :  { %v3397_v29 = vsel %vm315_vm5, %v3393_v9, %v3387_v60  ;;  %v3381_v31 = vsel %vm282_vm4, %v3377_v32, %v3371_v20 }
 0xffe   :  { %v3398_v38 = vmul.f32 %v3397_v29, %v5642_v18  ;;  %v3382_v24 = vmul.f32 %v3381_v31, %v5638_v17  ;;  %3538 = vmatprep.subr.bf16.mxu0 %v3503_v25 }
0x1000   :  { %v3502_v40 = vpack.c.bf16 %v3398_v38, %v3382_v24  ;;  %v3391_v39 = vpop.permute.xlu0 %3390  ;;  %v3375_v4 = vpop.permute.xlu1 %3374 }
0x1001   :  { %v3394_v11 = vsel %vm315_vm5, %v3391_v39, %v3393_v9  ;;  %v3395_v51 = vsel %vm315_vm5, %v3389_v15, %v3391_v39  ;;  %v3378_v59 = vsel %vm282_vm4, %v3375_v4, %v3377_v32  ;;  %v3379_v2 = vsel %vm282_vm4, %v3373_v34, %v3375_v4 }
0x1002   :  { %v3400_v20 = vmul.f32 %v3395_v51, %v7940_v14  ;;  %v3401_v50 = vmul.f32 %v3394_v11, %v5652_v21  ;;  %v3384_v60 = vmul.f32 %v3379_v2, %v5656_v23  ;;  %v3385_v7 = vmul.f32 %v3378_v59, %v5646_v19  ;;  %3539 = vmatpush1.bf16.msra.mxu0 %v3502_v40 }
0x1004   :  { %v3504_v56 = vpack.c.bf16 %v3400_v20, %v3384_v60  ;;  %v3405_v62 = vpop.permute.xlu0 %3404  ;;  %v3403_v9 = vpop.permute.xlu1 %3402  ;;  %v3505_v25 = vpack.c.bf16 %v3401_v50, %v3385_v7 }
0x1005   :  { %v3412_v15 = vsel %vm348_vm6, %v3403_v9, %v3405_v62 }
0x1006   :  { %3579 = vmatprep.subr.bf16.mxu1 %v3505_v25  ;;  %v3415_v31 = vmul.f32 %v3412_v15, %v5682_v47 }
0x1007   :  { %3580 = vmatpush1.bf16.msra.mxu1 %v3504_v56 }
0x1008   :  { %v3421_v32 = vpop.permute.xlu0 %3420  ;;  %v3419_v34 = vpop.permute.xlu1 %3418 }
0x1009   :  { %v3428_v29 = vsel %vm381_vm7, %v3419_v34, %v3421_v32 }
0x100a   :  { %v3431_v38 = vmul.f32 %v3428_v29, %v5686_v48 }
0x100c   :  { %v3425_v24 = vpop.permute.xlu0 %3424  ;;  %v3409_v40 = vpop.permute.xlu1 %3408  ;;  %v3507_v39 = vpack.c.bf16 %v3431_v38, %v3415_v31 }
0x100d   :  { %v3429_v4 = vsel %vm381_vm7, %v3425_v24, %v3419_v34  ;;  %v3413_v11 = vsel %vm348_vm6, %v3409_v40, %v3403_v9 }
0x100e   :  { %v3430_v51 = vmul.f32 %v3429_v4, %v5704_v6  ;;  %v3414_v59 = vmul.f32 %v3413_v11, %v5696_v1  ;;  %3540 = vmatprep.subr.bf16.mxu0 %v3507_v39  ;;  %v3436_v4 = vmul.f32 %v7077_v5, %v5749_v46 }
0x1010   :  { %v3506_v2 = vpack.c.bf16 %v3430_v51, %v3414_v59  ;;  %v3423_v20 = vpop.permute.xlu0 %3422  ;;  %v3407_v50 = vpop.permute.xlu1 %3406 }
0x1011   :  { %v3426_v60 = vsel %vm381_vm7, %v3423_v20, %v3425_v24  ;;  %v3427_v7 = vsel %vm381_vm7, %v3421_v32, %v3423_v20  ;;  %v3410_v56 = vsel %vm348_vm6, %v3407_v50, %v3409_v40  ;;  %v3411_v9 = vsel %vm348_vm6, %v3405_v62, %v3407_v50 }
0x1012   :  { %v3432_v25 = vmul.f32 %v3427_v7, %v5714_v13  ;;  %v3433_v15 = vmul.f32 %v3426_v60, %v5718_v16  ;;  %v3416_v34 = vmul.f32 %v3411_v9, %v5700_v3  ;;  %v3417_v29 = vmul.f32 %v3410_v56, %v5710_v12  ;;  %3541 = vmatpush1.bf16.msra.mxu0 %v3506_v2 }
0x1013   :  { %v3435_v62 = vmul.f32 %v7061_v35, %v5726_v27  ;;  %v3434_v20 = vmul.f32 %v7059_v55, %v5753_v53  ;;  %v3437_v56 = vmul.f32 %v7071_v52, %v5757_v54 }
0x1014   :  { %v3508_v31 = vpack.c.bf16 %v3432_v25, %v3416_v34  ;;  %v3443_v38 = vpop.permute.xlu0 %3442  ;;  %v3441_v24 = vpop.permute.xlu1 %3440  ;;  %v3509_v39 = vpack.c.bf16 %v3433_v15, %v3417_v29 }
0x1015   :  { %v3447_v32 = vsel %vm434_vm8, %v3441_v24, %v3443_v38 }
0x1016   :  { %v3451_v40 = vmul.f32 %v3447_v32, %v5733_v30  ;;  %3581 = vmatprep.subr.bf16.mxu1 %v3509_v39 }
0x1017   :  { %3582 = vmatpush1.bf16.msra.mxu1 %v3508_v31 }
0x1018   :  { %v3445_v11 = vpop.permute.xlu0 %3444  ;;  %v3439_v51 = vpop.permute.xlu1 %3438  ;;  %v3511_v59 = vpack.c.bf16 %v3451_v40, %v3435_v62 }
0x1019   :  { %v3446_v2 = vsel %vm434_vm8, %v3443_v38, %v3445_v11  ;;  %v3448_v50 = vsel %vm434_vm8, %v3439_v51, %v3441_v24  ;;  %v3449_v60 = vsel %vm434_vm8, %v3445_v11, %v3439_v51 }
0x101a   :  { %v3452_v35 = vmul.f32 %v3446_v2, %v5763_v43  ;;  %v3450_v7 = vmul.f32 %v3448_v50, %v5768_v63  ;;  %v3453_v5 = vmul.f32 %v3449_v60, %v5772_v0  ;;  %3542 = vmatprep.subr.bf16.mxu0 %v3511_v59 }
0x101c   :  { %v3512_v9 = vpack.c.bf16 %v3452_v35, %v3436_v4  ;;  %v3510_v25 = vpack.c.bf16 %v3450_v7, %v3434_v20  ;;  %v3459_v15 = vpop.permute.xlu0 %3458  ;;  %v3457_v55 = vpop.permute.xlu1 %3456  ;;  %v3513_v34 = vpack.c.bf16 %v3453_v5, %v3437_v56 }
0x101d   :  { %v3463_v29 = vsel %vm467_vm9, %v3457_v55, %v3459_v15 }
0x101e   :  { %3543 = vmatpush1.bf16.msra.mxu0 %v3510_v25  ;;  %3583 = vmatprep.subr.bf16.mxu1 %v3513_v34  ;;  %v3467_v39 = vmul.f32 %v3463_v29, %v5793_v42 }
0x101f   :  { %3584 = vmatpush1.bf16.msra.mxu1 %v3512_v9 }
0x1020   :  { %v3475_v31 = vpop.permute.xlu0 %3474  ;;  %v3473_v38 = vpop.permute.xlu1 %3472 }
0x1021   :  { %v3479_v24 = vsel %vm500_vm10, %v3473_v38, %v3475_v31 }
0x1022   :  { %v3483_v52 = vmul.f32 %v3479_v24, %v5797_v44 }
0x1024   :  { %v3471_v32 = vpop.permute.xlu0 %3470  ;;  %v3455_v40 = vpop.permute.xlu1 %3454  ;;  %v3515_v62 = vpack.c.bf16 %v3483_v52, %v3467_v39 }
0x1025   :  { %v3480_v4 = vsel %vm500_vm10, %v3471_v32, %v3473_v38  ;;  %v3464_v11 = vsel %vm467_vm9, %v3455_v40, %v3457_v55 }
0x1026   :  { %v3482_v51 = vmul.f32 %v3480_v4, %v5825_v33  ;;  %v3466_v59 = vmul.f32 %v3464_v11, %v5811_v26  ;;  %3544 = vmatprep.subr.bf16.mxu0 %v3515_v62 }
0x1028   :  { %v3514_v2 = vpack.c.bf16 %v3482_v51, %v3466_v59  ;;  %v3477_v20 = vpop.permute.xlu0 %3476  ;;  %v3461_v50 = vpop.permute.xlu1 %3460 }
0x1029   :  { %v3478_v60 = vsel %vm500_vm10, %v3475_v31, %v3477_v20  ;;  %v3481_v35 = vsel %vm500_vm10, %v3477_v20, %v3471_v32  ;;  %v3462_v7 = vsel %vm467_vm9, %v3459_v15, %v3461_v50  ;;  %v3465_v5 = vsel %vm467_vm9, %v3461_v50, %v3455_v40 }
0x102a   :  { %v3484_v56 = vmul.f32 %v3478_v60, %v5815_v28  ;;  %v3485_v9 = vmul.f32 %v3481_v35, %v5829_v36  ;;  %v3468_v25 = vmul.f32 %v3462_v7, %v5807_v58  ;;  %v3469_v55 = vmul.f32 %v3465_v5, %v7932_v10  ;;  %3545 = vmatpush1.bf16.msra.mxu0 %v3514_v2  ;;  %v3522_v7 = vld [vmem:[%s7941_s30] sm:$0xf] }
0x102c   :  { %v3516_v34 = vpack.c.bf16 %v3484_v56, %v3468_v25  ;;  %v3489_v29 = vpop.permute.xlu0 %3488  ;;  %v3487_v31 = vpop.permute.xlu1 %3486  ;;  %v3517_v38 = vpack.c.bf16 %v3485_v9, %v3469_v55 }
0x102d   :  { %v3496_v24 = vsel %vm533_vm11, %v3487_v31, %v3489_v29 }
0x102e   :  { %v3498_v15 = vmul.f32 %v7024_v41, %v3496_v24  ;;  %3585 = vmatprep.subr.bf16.mxu1 %v3517_v38 }
0x102f   :  { %3586 = vmatpush1.bf16.msra.mxu1 %v3516_v34 }
0x1030   :  { %v3493_v39 = vpop.permute.xlu0 %3492  ;;  %v3491_v52 = vpop.permute.xlu1 %3490  ;;  %v3518_v4 = vpack.c.bf16 %v3498_v15, %v3498_v15 }
0x1031   :  { %v3497_v32 = vsel %vm533_vm11, %v3493_v39, %v3487_v31  ;;  %v3494_v40 = vsel %vm533_vm11, %v3491_v52, %v3493_v39  ;;  %v3495_v62 = vsel %vm533_vm11, %v3489_v29, %v3491_v52 }
0x1032   :  { %v3501_v11 = vmul.f32 %v7037_v37, %v3497_v32  ;;  %v3499_v51 = vmul.f32 %v7041_v45, %v3495_v62  ;;  %v3500_v59 = vmul.f32 %v7045_v22, %v3494_v40  ;;  %v3527_v60 = vsel %vm267_vm3, %v3518_v4, 0 }
0x1034   :  { %v3521_v2 = vpack.c.bf16 %v3501_v11, %v3501_v11  ;;  %v3519_v20 = vpack.c.bf16 %v3499_v51, %v3499_v51  ;;  %v3520_v50 = vpack.c.bf16 %v3500_v59, %v3500_v59  ;;  %v3658_v51 = vld [vmem:[%s7943_s20] sm:$0xff] }
0x1035   :  { %v3648_v59 = vld [vmem:[%s7944_s15] sm:$0xff] }
0x1036   :  { %4872 = vmatprep.subr.msk.bf16.mxu0 %vm267_vm3, %v3519_v20  ;;  %4874 = vmatprep.subr.msk.bf16.mxu1 %vm267_vm3, %v3521_v2  ;;  %v3533_v35 = vsel %vm267_vm3, %v3520_v50, 0 }
0x1037   :  { %3547 = vmatpush1.bf16.msra.mxu0 %v3527_v60  ;;  %3588 = vmatpush1.bf16.msra.mxu1 %v3533_v35 }
0x103a   :  { %4873 = vmatmul.mubr.msk.bf16.vlgmr.msra.gmra.mrb[40].mxu0 %vm7935_vm2, %v3522_v7  ;;  %4875 = vmatmul.mubr.msk.bf16.vlgmr.msra.gmra.mrb[40].mxu1 %vm7942_vm15, %v3522_v7 }
0x103b   :  { %3880 = vmatprep.mubr.bf16.mxu0 %v7936_v8  ;;  %3921 = vmatprep.mubr.bf16.mxu1 %v7936_v8 }
0x110d   :  { %v3572_v5 = vpop.f32.mrb[40].mxu0  ;;  %v3613_v56 = vpop.f32.mrb[40].mxu1 }
0x110e   :  { %v3626_v9 = vmul.f32 %v3572_v5, %v3572_v5  ;;  %v3574_v25 = vpop.f32.mrb[41].mxu0  ;;  %v3615_v55 = vpop.f32.mrb[41].mxu1  ;;  %v3628_v34 = vmul.f32 %v3613_v56, %v3613_v56 }
0x110f   :  { %v3620_v29 = vadd.f32 %v3574_v25, %v3572_v5  ;;  %v3627_v31 = vmul.f32 %v3574_v25, %v3574_v25  ;;  %v3576_v38 = vpop.f32.mrb[42].mxu0  ;;  %v3617_v24 = vpop.f32.mrb[42].mxu1  ;;  %v3629_v62 = vmul.f32 %v3615_v55, %v3615_v55 }
0x1110   :  { %v3577_v15 = vpop.f32.mrb[43].mxu0  ;;  %v3618_v39 = vpop.f32.mrb[43].mxu1 }
0x1111   :  { %v3630_v52 = vadd.f32 %v3627_v31, %v3626_v9  ;;  %v3621_v32 = vadd.f32 %v3620_v29, %v3613_v56 }
0x1113   :  { %v3622_v40 = vadd.f32 %v3621_v32, %v3615_v55  ;;  %v3631_v4 = vadd.f32 %v3630_v52, %v3628_v34 }
0x1115   :  { %3623 = vadd.xlane.f32.xlu1 %v3622_v40  ;;  %v3632_v11 = vadd.f32 %v3631_v4, %v3629_v62 }
0x1117   :  { %3633 = vadd.xlane.f32.xlu0 %v3632_v11 }
0x1126   :  { %3661 = vperm.xlu1 %5037, %v3658_v51  }
0x112d   :  { %3651 = vperm.xlu0 %5036, %v3648_v59  }
0x11a2   :  { %v3624_v2 = vpop.xlane.xlu1 %3623 }
0x11a3   :  { %v3625_v20 = vmul.f32 0.001953125, %v3624_v2 }
0x11a4   :  { %v3634_v50 = vpop.xlane.xlu0 %3633 }
0x11a5   :  { %v3635_v60 = vmul.f32 0.001953125, %v3634_v50  ;;  %v3636_v35 = vmul.f32 %v3625_v20, %v3625_v20  ;;  %v3638_v9 = vsub.f32 %v3572_v5, %v3625_v20  ;;  %v3639_v29 = vsub.f32 %v3574_v25, %v3625_v20 }
0x11a6   :  { %v3641_v24 = vsub.f32 %v3615_v55, %v3625_v20  ;;  %v3662_v62 = vpop.permute.xlu1 %3661  ;;  %v3640_v4 = vsub.f32 %v3613_v56, %v3625_v20 }
0x11a7   :  { %v3637_v7 = vsub.f32 %v3635_v60, %v3636_v35 }
0x11a9   :  { %v3642_v38 = vadd.f32 1e-05, %v3637_v7 }
0x11ab   :  { %5114 = vrsqrt.f32 %v3642_v38 }
0x11ac   :  { %v3652_v39 = vpop.permute.xlu0 %3651 }
0x11b5   :  { %v5115_v31 = vpop.eup %5114 }
0x11b6   :  { %v3644_v34 = vmul.f32 %v5115_v31, %v3638_v9  ;;  %v3645_v15 = vmul.f32 %v5115_v31, %v3639_v29  ;;  %v3647_v52 = vmul.f32 %v5115_v31, %v3641_v24  ;;  %v3646_v59 = vmul.f32 %v5115_v31, %v3640_v4 }
0x11b8   :  { %v3654_v32 = vmul.f32 %v3652_v39, %v3644_v34  ;;  %v3655_v40 = vmul.f32 %v3652_v39, %v3645_v15  ;;  %v3657_v2 = vmul.f32 %v3652_v39, %v3647_v52  ;;  %v3656_v5 = vmul.f32 %v3652_v39, %v3646_v59 }
0x11ba   :  { %v3664_v11 = vadd.f32 %v3662_v62, %v3654_v32  ;;  %v3665_v51 = vadd.f32 %v3662_v62, %v3655_v40  ;;  %v3667_v25 = vadd.f32 %v3662_v62, %v3657_v2  ;;  %v3666_v56 = vadd.f32 %v3662_v62, %v3656_v5 }
0x11bc   :  { %vm3668_vm13 = vcmp.gt.f32.partialorder %v3664_v11, 0.0  ;;  %vm3669_vm14 = vcmp.gt.f32.partialorder %v3665_v51, 0.0  ;;  %v3672_v50 = vmul.f32 0.2, %v3664_v11  ;;  %v3673_v60 = vmul.f32 0.2, %v3665_v51 }
0x11bd   :  { %v3675_v20 = vmul.f32 0.2, %v3667_v25  ;;  %vm3671_vm1 = vcmp.gt.f32.partialorder %v3667_v25, 0.0  ;;  %v3674_v7 = vmul.f32 0.2, %v3666_v56  ;;  %vm3670_vm2 = vcmp.gt.f32.partialorder %v3666_v56, 0.0 }
0x11be   :  { %v7246_v35 = vsel %vm3668_vm13, %v3664_v11, %v3672_v50  ;;  %v7248_v55 = vsel %vm3669_vm14, %v3665_v51, %v3673_v60  ;;  %vm7946_vm13 = vmmov %vm7942_vm15 }
0x11bf   :  { %3682 = vrot.lane.b32.xlu0 %v7248_v55, %s5255_s5  ;;  %3680 = vrot.lane.b32.xlu1 %v7246_v35, %s5255_s5  ;;  %v7258_v38 = vsel %vm3671_vm1, %v3667_v25, %v3675_v20  ;;  %v7264_v9 = vsel %vm3670_vm2, %v3666_v56, %v3674_v7 }
0x11c3   :  { %3698 = vrot.lane.b32.xlu0 %v7248_v55, %s5254_s0  ;;  %3696 = vrot.lane.b32.xlu1 %v7246_v35, %s5254_s0 }
0x11c7   :  { %3702 = vrot.lane.b32.xlu0 %v7258_v38, %s5254_s0  ;;  %3686 = vrot.lane.b32.xlu1 %v7258_v38, %s5255_s5 }
0x11cb   :  { %3700 = vrot.lane.b32.xlu0 %v7264_v9, %s5254_s0  ;;  %3684 = vrot.lane.b32.xlu1 %v7264_v9, %s5255_s5 }
0x11cf   :  { %3714 = vrot.lane.b32.xlu0 %v7248_v55, %s5256_s28  ;;  %3712 = vrot.lane.b32.xlu1 %v7246_v35, %s5256_s28 }
0x11d3   :  { %3730 = vrot.lane.b32.xlu0 %v7248_v55, %s5257_s1  ;;  %3728 = vrot.lane.b32.xlu1 %v7246_v35, %s5257_s1 }
0x11d7   :  { %3734 = vrot.lane.b32.xlu0 %v7258_v38, %s5257_s1  ;;  %3718 = vrot.lane.b32.xlu1 %v7258_v38, %s5256_s28 }
0x11db   :  { %3732 = vrot.lane.b32.xlu0 %v7264_v9, %s5257_s1  ;;  %3716 = vrot.lane.b32.xlu1 %v7264_v9, %s5256_s28 }
0x11df   :  { %3752 = vrot.lane.b32.xlu0 %v7264_v9, %s5258_s2  ;;  %3750 = vrot.lane.b32.xlu1 %v7248_v55, %s5258_s2 }
0x11e3   :  { %3754 = vrot.lane.b32.xlu0 %v7258_v38, %s5258_s2  ;;  %3748 = vrot.lane.b32.xlu1 %v7246_v35, %s5258_s2 }
0x11e7   :  { %3768 = vrot.lane.b32.xlu0 %v7264_v9, %s5259_s7  ;;  %3766 = vrot.lane.b32.xlu1 %v7248_v55, %s5259_s7 }
0x11eb   :  { %3784 = vrot.lane.b32.xlu0 %v7264_v9, %s5260_s10  ;;  %3782 = vrot.lane.b32.xlu1 %v7248_v55, %s5260_s10 }
0x11ef   :  { %3780 = vrot.lane.b32.xlu0 %v7246_v35, %s5260_s10  ;;  %3764 = vrot.lane.b32.xlu1 %v7246_v35, %s5259_s7 }
0x11f3   :  { %3786 = vrot.lane.b32.xlu0 %v7258_v38, %s5260_s10  ;;  %3770 = vrot.lane.b32.xlu1 %v7258_v38, %s5259_s7 }
0x11f7   :  { %3798 = vrot.lane.b32.xlu0 %v7248_v55, %s5262_s11  ;;  %3796 = vrot.lane.b32.xlu1 %v7246_v35, %s5262_s11 }
0x11fb   :  { %3802 = vrot.lane.b32.xlu0 %v7258_v38, %s5262_s11  ;;  %3800 = vrot.lane.b32.xlu1 %v7264_v9, %s5262_s11 }
0x1231   :  { %v3683_v29 = vpop.permute.xlu0 %3682  ;;  %v3681_v31 = vpop.permute.xlu1 %3680 }
0x1232   :  { %v3690_v24 = vsel %vm282_vm4, %v3681_v31, %v3683_v29 }
0x1233   :  { %v3693_v52 = vmul.f32 %v3690_v24, %v5615_v61 }
0x1235   :  { %v3699_v34 = vpop.permute.xlu0 %3698  ;;  %v3697_v15 = vpop.permute.xlu1 %3696 }
0x1236   :  { %v3706_v39 = vsel %vm315_vm5, %v3697_v15, %v3699_v34 }
0x1237   :  { %v3709_v32 = vmul.f32 %v3706_v39, %v7939_v49 }
0x1239   :  { %v3703_v40 = vpop.permute.xlu0 %3702  ;;  %v3687_v62 = vpop.permute.xlu1 %3686  ;;  %v3813_v4 = vpack.c.bf16 %v3709_v32, %v3693_v52 }
0x123a   :  { %v3707_v11 = vsel %vm315_vm5, %v3703_v40, %v3697_v15  ;;  %v3691_v51 = vsel %vm282_vm4, %v3687_v62, %v3681_v31 }
0x123b   :  { %v3708_v59 = vmul.f32 %v3707_v11, %v5642_v18  ;;  %v3692_v2 = vmul.f32 %v3691_v51, %v5638_v17  ;;  %3848 = vmatprep.subr.bf16.mxu0 %v3813_v4 }
0x123d   :  { %v3812_v50 = vpack.c.bf16 %v3708_v59, %v3692_v2  ;;  %v3701_v60 = vpop.permute.xlu0 %3700  ;;  %v3685_v5 = vpop.permute.xlu1 %3684 }
0x123e   :  { %v3704_v25 = vsel %vm315_vm5, %v3701_v60, %v3703_v40  ;;  %v3705_v56 = vsel %vm315_vm5, %v3699_v34, %v3701_v60  ;;  %v3688_v20 = vsel %vm282_vm4, %v3685_v5, %v3687_v62  ;;  %v3689_v7 = vsel %vm282_vm4, %v3683_v29, %v3685_v5 }
0x123f   :  { %v3710_v31 = vmul.f32 %v3705_v56, %v7940_v14  ;;  %v3711_v24 = vmul.f32 %v3704_v25, %v5652_v21  ;;  %v3694_v15 = vmul.f32 %v3689_v7, %v5656_v23  ;;  %v3695_v39 = vmul.f32 %v3688_v20, %v5646_v19  ;;  %3849 = vmatpush1.bf16.msra.mxu0 %v3812_v50 }
0x1241   :  { %v3814_v52 = vpack.c.bf16 %v3710_v31, %v3694_v15  ;;  %v3715_v32 = vpop.permute.xlu0 %3714  ;;  %v3713_v40 = vpop.permute.xlu1 %3712  ;;  %v3815_v4 = vpack.c.bf16 %v3711_v24, %v3695_v39 }
0x1242   :  { %v3722_v34 = vsel %vm348_vm6, %v3713_v40, %v3715_v32 }
0x1243   :  { %3889 = vmatprep.subr.bf16.mxu1 %v3815_v4  ;;  %v3725_v51 = vmul.f32 %v3722_v34, %v5682_v47 }
0x1244   :  { %3890 = vmatpush1.bf16.msra.mxu1 %v3814_v52 }
0x1245   :  { %v3731_v62 = vpop.permute.xlu0 %3730  ;;  %v3729_v29 = vpop.permute.xlu1 %3728 }
0x1246   :  { %v3738_v11 = vsel %vm381_vm7, %v3729_v29, %v3731_v62 }
0x1247   :  { %v3741_v59 = vmul.f32 %v3738_v11, %v5686_v48 }
0x1249   :  { %v3735_v2 = vpop.permute.xlu0 %3734  ;;  %v3719_v50 = vpop.permute.xlu1 %3718  ;;  %v3817_v60 = vpack.c.bf16 %v3741_v59, %v3725_v51 }
0x124a   :  { %v3739_v5 = vsel %vm381_vm7, %v3735_v2, %v3729_v29  ;;  %v3723_v25 = vsel %vm348_vm6, %v3719_v50, %v3713_v40 }
0x124b   :  { %v3740_v56 = vmul.f32 %v3739_v5, %v5704_v6  ;;  %v3724_v20 = vmul.f32 %v3723_v25, %v5696_v1  ;;  %3850 = vmatprep.subr.bf16.mxu0 %v3817_v60  ;;  %v3746_v5 = vmul.f32 %v7264_v9, %v5749_v46 }
0x124d   :  { %v3816_v7 = vpack.c.bf16 %v3740_v56, %v3724_v20  ;;  %v3733_v31 = vpop.permute.xlu0 %3732  ;;  %v3717_v24 = vpop.permute.xlu1 %3716 }
0x124e   :  { %v3736_v15 = vsel %vm381_vm7, %v3733_v31, %v3735_v2  ;;  %v3737_v39 = vsel %vm381_vm7, %v3731_v62, %v3733_v31  ;;  %v3720_v52 = vsel %vm348_vm6, %v3717_v24, %v3719_v50  ;;  %v3721_v40 = vsel %vm348_vm6, %v3715_v32, %v3717_v24 }
0x124f   :  { %v3742_v4 = vmul.f32 %v3737_v39, %v5714_v13  ;;  %v3743_v34 = vmul.f32 %v3736_v15, %v5718_v16  ;;  %v3726_v29 = vmul.f32 %v3721_v40, %v5700_v3  ;;  %v3727_v11 = vmul.f32 %v3720_v52, %v5710_v12  ;;  %3851 = vmatpush1.bf16.msra.mxu0 %v3816_v7 }
0x1250   :  { %v3745_v32 = vmul.f32 %v7248_v55, %v5726_v27  ;;  %v3744_v31 = vmul.f32 %v7246_v35, %v5753_v53  ;;  %v3747_v52 = vmul.f32 %v7258_v38, %v5757_v54 }
0x1251   :  { %v3818_v51 = vpack.c.bf16 %v3742_v4, %v3726_v29  ;;  %v3753_v59 = vpop.permute.xlu0 %3752  ;;  %v3751_v2 = vpop.permute.xlu1 %3750  ;;  %v3819_v60 = vpack.c.bf16 %v3743_v34, %v3727_v11 }
0x1252   :  { %v3757_v62 = vsel %vm434_vm8, %v3751_v2, %v3753_v59 }
0x1253   :  { %v3761_v50 = vmul.f32 %v3757_v62, %v5733_v30  ;;  %3891 = vmatprep.subr.bf16.mxu1 %v3819_v60 }
0x1254   :  { %3892 = vmatpush1.bf16.msra.mxu1 %v3818_v51 }
0x1255   :  { %v3755_v25 = vpop.permute.xlu0 %3754  ;;  %v3749_v56 = vpop.permute.xlu1 %3748  ;;  %v3821_v20 = vpack.c.bf16 %v3761_v50, %v3745_v32 }
0x1256   :  { %v3756_v7 = vsel %vm434_vm8, %v3753_v59, %v3755_v25  ;;  %v3758_v24 = vsel %vm434_vm8, %v3749_v56, %v3751_v2  ;;  %v3759_v15 = vsel %vm434_vm8, %v3755_v25, %v3749_v56 }
0x1257   :  { %v3762_v55 = vmul.f32 %v3756_v7, %v5763_v43  ;;  %v3760_v39 = vmul.f32 %v3758_v24, %v5768_v63  ;;  %v3763_v9 = vmul.f32 %v3759_v15, %v5772_v0  ;;  %3852 = vmatprep.subr.bf16.mxu0 %v3821_v20 }
0x1259   :  { %v3822_v40 = vpack.c.bf16 %v3762_v55, %v3746_v5  ;;  %v3820_v4 = vpack.c.bf16 %v3760_v39, %v3744_v31  ;;  %v3769_v34 = vpop.permute.xlu0 %3768  ;;  %v3767_v35 = vpop.permute.xlu1 %3766  ;;  %v3823_v29 = vpack.c.bf16 %v3763_v9, %v3747_v52 }
0x125a   :  { %v3773_v11 = vsel %vm467_vm9, %v3767_v35, %v3769_v34 }
0x125b   :  { %3853 = vmatpush1.bf16.msra.mxu0 %v3820_v4  ;;  %3893 = vmatprep.subr.bf16.mxu1 %v3823_v29  ;;  %v3777_v60 = vmul.f32 %v3773_v11, %v5793_v42 }
0x125c   :  { %3894 = vmatpush1.bf16.msra.mxu1 %v3822_v40 }
0x125d   :  { %v3785_v51 = vpop.permute.xlu0 %3784  ;;  %v3783_v59 = vpop.permute.xlu1 %3782 }
0x125e   :  { %v3789_v2 = vsel %vm500_vm10, %v3783_v59, %v3785_v51 }
0x125f   :  { %v3793_v38 = vmul.f32 %v3789_v2, %v5797_v44 }
0x1261   :  { %v3781_v62 = vpop.permute.xlu0 %3780  ;;  %v3765_v50 = vpop.permute.xlu1 %3764  ;;  %v3825_v32 = vpack.c.bf16 %v3793_v38, %v3777_v60 }
0x1262   :  { %v3790_v5 = vsel %vm500_vm10, %v3781_v62, %v3783_v59  ;;  %v3774_v25 = vsel %vm467_vm9, %v3765_v50, %v3767_v35 }
0x1263   :  { %v3792_v56 = vmul.f32 %v3790_v5, %v5825_v33  ;;  %v3776_v20 = vmul.f32 %v3774_v25, %v5811_v26  ;;  %3854 = vmatprep.subr.bf16.mxu0 %v3825_v32 }
0x1265   :  { %v3824_v7 = vpack.c.bf16 %v3792_v56, %v3776_v20  ;;  %v3787_v31 = vpop.permute.xlu0 %3786  ;;  %v3771_v24 = vpop.permute.xlu1 %3770 }
0x1266   :  { %v3788_v15 = vsel %vm500_vm10, %v3785_v51, %v3787_v31  ;;  %v3791_v55 = vsel %vm500_vm10, %v3787_v31, %v3781_v62  ;;  %v3772_v39 = vsel %vm467_vm9, %v3769_v34, %v3771_v24  ;;  %v3775_v9 = vsel %vm467_vm9, %v3771_v24, %v3765_v50 }
0x1267   :  { %v3794_v52 = vmul.f32 %v3788_v15, %v5815_v28  ;;  %v3795_v40 = vmul.f32 %v3791_v55, %v5829_v36  ;;  %v3778_v4 = vmul.f32 %v3772_v39, %v5807_v58  ;;  %v3779_v35 = vmul.f32 %v3775_v9, %v7932_v10  ;;  %3855 = vmatpush1.bf16.msra.mxu0 %v3824_v7  ;;  %v3832_v55 = vld [vmem:[%s7945_s16] sm:$0xf] }
0x1269   :  { %v3826_v29 = vpack.c.bf16 %v3794_v52, %v3778_v4  ;;  %v3799_v11 = vpop.permute.xlu0 %3798  ;;  %v3797_v51 = vpop.permute.xlu1 %3796  ;;  %v3827_v59 = vpack.c.bf16 %v3795_v40, %v3779_v35 }
0x126a   :  { %v3806_v2 = vsel %vm533_vm11, %v3797_v51, %v3799_v11 }
0x126b   :  { %v3808_v34 = vmul.f32 %v7024_v41, %v3806_v2  ;;  %3895 = vmatprep.subr.bf16.mxu1 %v3827_v59 }
0x126c   :  { %3896 = vmatpush1.bf16.msra.mxu1 %v3826_v29 }
0x126d   :  { %v3803_v60 = vpop.permute.xlu0 %3802  ;;  %v3801_v38 = vpop.permute.xlu1 %3800  ;;  %v3828_v5 = vpack.c.bf16 %v3808_v34, %v3808_v34 }
0x126e   :  { %v3807_v62 = vsel %vm533_vm11, %v3803_v60, %v3797_v51  ;;  %v3804_v50 = vsel %vm533_vm11, %v3801_v38, %v3803_v60  ;;  %v3805_v32 = vsel %vm533_vm11, %v3799_v11, %v3801_v38 }
0x126f   :  { %v3811_v25 = vmul.f32 %v7037_v37, %v3807_v62  ;;  %v3809_v56 = vmul.f32 %v7041_v45, %v3805_v32  ;;  %v3810_v41 = vmul.f32 %v7045_v22, %v3804_v50  ;;  %v3837_v24 = vsel %vm267_vm3, %v3828_v5, 0  ;;  %v3968_v50 = vld [vmem:[%s7947_s18] sm:$0xff] }
0x1270   :  { %v3958_v32 = vld [vmem:[%s7948_s22] sm:$0xff] }
0x1271   :  { %v3831_v20 = vpack.c.bf16 %v3811_v25, %v3811_v25  ;;  %v3829_v7 = vpack.c.bf16 %v3809_v56, %v3809_v56  ;;  %v3830_v31 = vpack.c.bf16 %v3810_v41, %v3810_v41 }
0x1273   :  { %4876 = vmatprep.subr.msk.bf16.mxu0 %vm267_vm3, %v3829_v7  ;;  %4878 = vmatprep.subr.msk.bf16.mxu1 %vm267_vm3, %v3831_v20  ;;  %v3843_v15 = vsel %vm267_vm3, %v3830_v31, 0 }
0x1274   :  { %3857 = vmatpush1.bf16.msra.mxu0 %v3837_v24  ;;  %3898 = vmatpush1.bf16.msra.mxu1 %v3843_v15 }
0x1277   :  { %4877 = vmatmul.mubr.msk.bf16.vlgmr.msra.gmra.mrb[44].mxu0 %vm7942_vm15, %v3832_v55  ;;  %4879 = vmatmul.mubr.msk.bf16.vlgmr.msra.gmra.mrb[44].mxu1 %vm7946_vm13, %v3832_v55 }
0x1278   :  { %4190 = vmatprep.mubr.bf16.mxu0 %v7936_v8  ;;  %4231 = vmatprep.mubr.bf16.mxu1 %v7936_v8 }
0x134a   :  { %v3882_v37 = vpop.f32.mrb[44].mxu0  ;;  %v3923_v45 = vpop.f32.mrb[44].mxu1 }
0x134b   :  { %v3936_v22 = vmul.f32 %v3882_v37, %v3882_v37  ;;  %v3884_v39 = vpop.f32.mrb[45].mxu0  ;;  %v3925_v9 = vpop.f32.mrb[45].mxu1  ;;  %v3938_v52 = vmul.f32 %v3923_v45, %v3923_v45 }
0x134c   :  { %v3930_v40 = vadd.f32 %v3884_v39, %v3882_v37  ;;  %v3937_v4 = vmul.f32 %v3884_v39, %v3884_v39  ;;  %v3886_v35 = vpop.f32.mrb[46].mxu0  ;;  %v3927_v29 = vpop.f32.mrb[46].mxu1  ;;  %v3939_v60 = vmul.f32 %v3925_v9, %v3925_v9 }
0x134d   :  { %v3887_v11 = vpop.f32.mrb[47].mxu0  ;;  %v3928_v51 = vpop.f32.mrb[47].mxu1 }
0x134e   :  { %v3940_v59 = vadd.f32 %v3937_v4, %v3936_v22  ;;  %v3931_v2 = vadd.f32 %v3930_v40, %v3923_v45 }
0x1350   :  { %v3932_v34 = vadd.f32 %v3931_v2, %v3925_v9  ;;  %v3941_v38 = vadd.f32 %v3940_v59, %v3938_v52 }
0x1352   :  { %3933 = vadd.xlane.f32.xlu1 %v3932_v34  ;;  %v3942_v62 = vadd.f32 %v3941_v38, %v3939_v60 }
0x1354   :  { %3943 = vadd.xlane.f32.xlu0 %v3942_v62 }
0x1363   :  { %3971 = vperm.xlu1 %5037, %v3968_v50  }
0x136a   :  { %3961 = vperm.xlu0 %5036, %v3958_v32  }
0x13df   :  { %v3934_v5 = vpop.xlane.xlu1 %3933 }
0x13e0   :  { %v3935_v25 = vmul.f32 0.001953125, %v3934_v5 }
0x13e1   :  { %v3944_v56 = vpop.xlane.xlu0 %3943 }
0x13e2   :  { %v3945_v41 = vmul.f32 0.001953125, %v3944_v56  ;;  %v3946_v20 = vmul.f32 %v3935_v25, %v3935_v25  ;;  %v3948_v24 = vsub.f32 %v3882_v37, %v3935_v25  ;;  %v3949_v15 = vsub.f32 %v3884_v39, %v3935_v25 }
0x13e3   :  { %v3951_v22 = vsub.f32 %v3925_v9, %v3935_v25  ;;  %v3972_v51 = vpop.permute.xlu1 %3971  ;;  %v3950_v59 = vsub.f32 %v3923_v45, %v3935_v25 }
0x13e4   :  { %v3947_v7 = vsub.f32 %v3945_v41, %v3946_v20 }
0x13e6   :  { %v3952_v31 = vadd.f32 1e-05, %v3947_v7 }
0x13e8   :  { %5116 = vrsqrt.f32 %v3952_v31 }
0x13e9   :  { %v3962_v4 = vpop.permute.xlu0 %3961 }
0x13f2   :  { %v5117_v55 = vpop.eup %5116 }
0x13f3   :  { %v3954_v52 = vmul.f32 %v5117_v55, %v3948_v24  ;;  %v3955_v40 = vmul.f32 %v5117_v55, %v3949_v15  ;;  %v3957_v35 = vmul.f32 %v5117_v55, %v3951_v22  ;;  %v3956_v60 = vmul.f32 %v5117_v55, %v3950_v59 }
0x13f5   :  { %v3964_v29 = vmul.f32 %v3962_v4, %v3954_v52  ;;  %v3965_v11 = vmul.f32 %v3962_v4, %v3955_v40  ;;  %v3967_v38 = vmul.f32 %v3962_v4, %v3957_v35  ;;  %v3966_v37 = vmul.f32 %v3962_v4, %v3956_v60 }
0x13f7   :  { %v3974_v2 = vadd.f32 %v3972_v51, %v3964_v29  ;;  %v3975_v34 = vadd.f32 %v3972_v51, %v3965_v11  ;;  %v3977_v39 = vadd.f32 %v3972_v51, %v3967_v38  ;;  %v3976_v45 = vadd.f32 %v3972_v51, %v3966_v37 }
0x13f9   :  { %vm3978_vm14 = vcmp.gt.f32.partialorder %v3974_v2, 0.0  ;;  %vm3979_vm1 = vcmp.gt.f32.partialorder %v3975_v34, 0.0  ;;  %v3982_v62 = vmul.f32 0.2, %v3974_v2  ;;  %v3983_v50 = vmul.f32 0.2, %v3975_v34 }
0x13fa   :  { %v3985_v5 = vmul.f32 0.2, %v3977_v39  ;;  %vm3981_vm2 = vcmp.gt.f32.partialorder %v3977_v39, 0.0  ;;  %v3984_v25 = vmul.f32 0.2, %v3976_v45  ;;  %vm3980_vm15 = vcmp.gt.f32.partialorder %v3976_v45, 0.0 }
0x13fb   :  { %v7433_v32 = vsel %vm3978_vm14, %v3974_v2, %v3982_v62  ;;  %v7435_v9 = vsel %vm3979_vm1, %v3975_v34, %v3983_v50  ;;  %vm7950_vm14 = vmmov %vm7946_vm13 }
0x13fc   :  { %3992 = vrot.lane.b32.xlu0 %v7435_v9, %s5255_s5  ;;  %3990 = vrot.lane.b32.xlu1 %v7433_v32, %s5255_s5  ;;  %v7445_v56 = vsel %vm3981_vm2, %v3977_v39, %v3985_v5  ;;  %v7451_v41 = vsel %vm3980_vm15, %v3976_v45, %v3984_v25 }
0x1400   :  { %4008 = vrot.lane.b32.xlu0 %v7435_v9, %s5254_s0  ;;  %4006 = vrot.lane.b32.xlu1 %v7433_v32, %s5254_s0 }
0x1404   :  { %4012 = vrot.lane.b32.xlu0 %v7445_v56, %s5254_s0  ;;  %3996 = vrot.lane.b32.xlu1 %v7445_v56, %s5255_s5 }
0x1408   :  { %4010 = vrot.lane.b32.xlu0 %v7451_v41, %s5254_s0  ;;  %3994 = vrot.lane.b32.xlu1 %v7451_v41, %s5255_s5 }
0x140c   :  { %4024 = vrot.lane.b32.xlu0 %v7435_v9, %s5256_s28  ;;  %4022 = vrot.lane.b32.xlu1 %v7433_v32, %s5256_s28 }
0x1410   :  { %4040 = vrot.lane.b32.xlu0 %v7435_v9, %s5257_s1  ;;  %4038 = vrot.lane.b32.xlu1 %v7433_v32, %s5257_s1 }
0x1414   :  { %4044 = vrot.lane.b32.xlu0 %v7445_v56, %s5257_s1  ;;  %4028 = vrot.lane.b32.xlu1 %v7445_v56, %s5256_s28 }
0x1418   :  { %4042 = vrot.lane.b32.xlu0 %v7451_v41, %s5257_s1  ;;  %4026 = vrot.lane.b32.xlu1 %v7451_v41, %s5256_s28 }
0x141c   :  { %4062 = vrot.lane.b32.xlu0 %v7451_v41, %s5258_s2  ;;  %4060 = vrot.lane.b32.xlu1 %v7435_v9, %s5258_s2 }
0x1420   :  { %4064 = vrot.lane.b32.xlu0 %v7445_v56, %s5258_s2  ;;  %4058 = vrot.lane.b32.xlu1 %v7433_v32, %s5258_s2 }
0x1424   :  { %4078 = vrot.lane.b32.xlu0 %v7451_v41, %s5259_s7  ;;  %4076 = vrot.lane.b32.xlu1 %v7435_v9, %s5259_s7 }
0x1428   :  { %4094 = vrot.lane.b32.xlu0 %v7451_v41, %s5260_s10  ;;  %4092 = vrot.lane.b32.xlu1 %v7435_v9, %s5260_s10 }
0x142c   :  { %4090 = vrot.lane.b32.xlu0 %v7433_v32, %s5260_s10  ;;  %4074 = vrot.lane.b32.xlu1 %v7433_v32, %s5259_s7 }
0x1430   :  { %4096 = vrot.lane.b32.xlu0 %v7445_v56, %s5260_s10  ;;  %4080 = vrot.lane.b32.xlu1 %v7445_v56, %s5259_s7 }
0x1434   :  { %4108 = vrot.lane.b32.xlu0 %v7435_v9, %s5262_s11  ;;  %4106 = vrot.lane.b32.xlu1 %v7433_v32, %s5262_s11 }
0x1438   :  { %4112 = vrot.lane.b32.xlu0 %v7445_v56, %s5262_s11  ;;  %4110 = vrot.lane.b32.xlu1 %v7451_v41, %s5262_s11 }
0x146e   :  { %v3993_v20 = vpop.permute.xlu0 %3992  ;;  %v3991_v7 = vpop.permute.xlu1 %3990 }
0x146f   :  { %v4000_v31 = vsel %vm282_vm4, %v3991_v7, %v3993_v20 }
0x1470   :  { %v4003_v22 = vmul.f32 %v4000_v31, %v5615_v61 }
0x1472   :  { %v4009_v24 = vpop.permute.xlu0 %4008  ;;  %v4007_v15 = vpop.permute.xlu1 %4006 }
0x1473   :  { %v4016_v55 = vsel %vm315_vm5, %v4007_v15, %v4009_v24 }
0x1474   :  { %v4019_v52 = vmul.f32 %v4016_v55, %v7939_v49 }
0x1476   :  { %v4013_v40 = vpop.permute.xlu0 %4012  ;;  %v3997_v4 = vpop.permute.xlu1 %3996  ;;  %v4123_v35 = vpack.c.bf16 %v4019_v52, %v4003_v22 }
0x1477   :  { %v4017_v29 = vsel %vm315_vm5, %v4013_v40, %v4007_v15  ;;  %v4001_v11 = vsel %vm282_vm4, %v3997_v4, %v3991_v7 }
0x1478   :  { %v4018_v51 = vmul.f32 %v4017_v29, %v5642_v18  ;;  %v4002_v59 = vmul.f32 %v4001_v11, %v5638_v17  ;;  %4158 = vmatprep.subr.bf16.mxu0 %v4123_v35 }
0x147a   :  { %v4122_v2 = vpack.c.bf16 %v4018_v51, %v4002_v59  ;;  %v4011_v34 = vpop.permute.xlu0 %4010  ;;  %v3995_v60 = vpop.permute.xlu1 %3994 }
0x147b   :  { %v4014_v38 = vsel %vm315_vm5, %v4011_v34, %v4013_v40  ;;  %v4015_v62 = vsel %vm315_vm5, %v4009_v24, %v4011_v34  ;;  %v3998_v50 = vsel %vm282_vm4, %v3995_v60, %v3997_v4  ;;  %v3999_v37 = vsel %vm282_vm4, %v3993_v20, %v3995_v60 }
0x147c   :  { %v4020_v39 = vmul.f32 %v4015_v62, %v7940_v14  ;;  %v4021_v45 = vmul.f32 %v4014_v38, %v5652_v21  ;;  %v4004_v5 = vmul.f32 %v3999_v37, %v5656_v23  ;;  %v4005_v25 = vmul.f32 %v3998_v50, %v5646_v19  ;;  %4159 = vmatpush1.bf16.msra.mxu0 %v4122_v2 }
0x147e   :  { %v4124_v7 = vpack.c.bf16 %v4020_v39, %v4004_v5  ;;  %v4025_v31 = vpop.permute.xlu0 %4024  ;;  %v4023_v15 = vpop.permute.xlu1 %4022  ;;  %v4125_v55 = vpack.c.bf16 %v4021_v45, %v4005_v25 }
0x147f   :  { %v4032_v24 = vsel %vm348_vm6, %v4023_v15, %v4025_v31 }
0x1480   :  { %4199 = vmatprep.subr.bf16.mxu1 %v4125_v55  ;;  %v4035_v40 = vmul.f32 %v4032_v24, %v5682_v47 }
0x1481   :  { %4200 = vmatpush1.bf16.msra.mxu1 %v4124_v7 }
0x1482   :  { %v4041_v22 = vpop.permute.xlu0 %4040  ;;  %v4039_v20 = vpop.permute.xlu1 %4038 }
0x1483   :  { %v4048_v52 = vsel %vm381_vm7, %v4039_v20, %v4041_v22 }
0x1484   :  { %v4051_v4 = vmul.f32 %v4048_v52, %v5686_v48 }
0x1486   :  { %v4045_v35 = vpop.permute.xlu0 %4044  ;;  %v4029_v29 = vpop.permute.xlu1 %4028  ;;  %v4127_v11 = vpack.c.bf16 %v4051_v4, %v4035_v40  ;;  %v4056_v4 = vmul.f32 %v7451_v41, %v5749_v46 }
0x1487   :  { %v4049_v51 = vsel %vm381_vm7, %v4045_v35, %v4039_v20  ;;  %v4033_v59 = vsel %vm348_vm6, %v4029_v29, %v4023_v15 }
0x1488   :  { %v4050_v2 = vmul.f32 %v4049_v51, %v5704_v6  ;;  %v4034_v34 = vmul.f32 %v4033_v59, %v5696_v1  ;;  %4160 = vmatprep.subr.bf16.mxu0 %v4127_v11  ;;  %v4054_v59 = vmul.f32 %v7433_v32, %v5753_v53 }
0x148a   :  { %v4126_v60 = vpack.c.bf16 %v4050_v2, %v4034_v34  ;;  %v4043_v38 = vpop.permute.xlu0 %4042  ;;  %v4027_v62 = vpop.permute.xlu1 %4026 }
0x148b   :  { %v4046_v50 = vsel %vm381_vm7, %v4043_v38, %v4045_v35  ;;  %v4047_v37 = vsel %vm381_vm7, %v4041_v22, %v4043_v38  ;;  %v4030_v39 = vsel %vm348_vm6, %v4027_v62, %v4029_v29  ;;  %v4031_v45 = vsel %vm348_vm6, %v4025_v31, %v4027_v62 }
0x148c   :  { %v4052_v5 = vmul.f32 %v4047_v37, %v5714_v13  ;;  %v4053_v25 = vmul.f32 %v4046_v50, %v5718_v16  ;;  %v4036_v7 = vmul.f32 %v4031_v45, %v5700_v3  ;;  %v4037_v15 = vmul.f32 %v4030_v39, %v5710_v12  ;;  %4161 = vmatpush1.bf16.msra.mxu0 %v4126_v60 }
0x148d   :  { %v4055_v31 = vmul.f32 %v7435_v9, %v5726_v27  ;;  %v4057_v38 = vmul.f32 %v7445_v56, %v5757_v54 }
0x148e   :  { %v4128_v55 = vpack.c.bf16 %v4052_v5, %v4036_v7  ;;  %v4063_v24 = vpop.permute.xlu0 %4062  ;;  %v4061_v20 = vpop.permute.xlu1 %4060  ;;  %v4129_v52 = vpack.c.bf16 %v4053_v25, %v4037_v15 }
0x148f   :  { %v4067_v22 = vsel %vm434_vm8, %v4061_v20, %v4063_v24 }
0x1490   :  { %v4071_v40 = vmul.f32 %v4067_v22, %v5733_v30  ;;  %4201 = vmatprep.subr.bf16.mxu1 %v4129_v52 }
0x1491   :  { %4202 = vmatpush1.bf16.msra.mxu1 %v4128_v55 }
0x1492   :  { %v4065_v35 = vpop.permute.xlu0 %4064  ;;  %v4059_v29 = vpop.permute.xlu1 %4058  ;;  %v4131_v11 = vpack.c.bf16 %v4071_v40, %v4055_v31 }
0x1493   :  { %v4066_v51 = vsel %vm434_vm8, %v4063_v24, %v4065_v35  ;;  %v4068_v2 = vsel %vm434_vm8, %v4059_v29, %v4061_v20  ;;  %v4069_v34 = vsel %vm434_vm8, %v4065_v35, %v4059_v29 }
0x1494   :  { %v4072_v9 = vmul.f32 %v4066_v51, %v5763_v43  ;;  %v4070_v60 = vmul.f32 %v4068_v2, %v5768_v63  ;;  %v4073_v41 = vmul.f32 %v4069_v34, %v5772_v0  ;;  %4162 = vmatprep.subr.bf16.mxu0 %v4131_v11 }
0x1496   :  { %v4132_v62 = vpack.c.bf16 %v4072_v9, %v4056_v4  ;;  %v4130_v50 = vpack.c.bf16 %v4070_v60, %v4054_v59  ;;  %v4079_v37 = vpop.permute.xlu0 %4078  ;;  %v4077_v32 = vpop.permute.xlu1 %4076  ;;  %v4133_v39 = vpack.c.bf16 %v4073_v41, %v4057_v38 }
0x1497   :  { %v4083_v45 = vsel %vm467_vm9, %v4077_v32, %v4079_v37 }
0x1498   :  { %4163 = vmatpush1.bf16.msra.mxu0 %v4130_v50  ;;  %4203 = vmatprep.subr.bf16.mxu1 %v4133_v39  ;;  %v4087_v15 = vmul.f32 %v4083_v45, %v5793_v42  ;;  %v7600_v39 = vld [vmem:[%s5281_s9 + $0x20] ss:$0 sm:$0xff] }
0x1499   :  { %4204 = vmatpush1.bf16.msra.mxu1 %v4132_v62 }
0x149a   :  { %v4095_v5 = vpop.permute.xlu0 %4094  ;;  %v4093_v25 = vpop.permute.xlu1 %4092 }
0x149b   :  { %v4099_v7 = vsel %vm500_vm10, %v4093_v25, %v4095_v5 }
0x149c   :  { %v4103_v56 = vmul.f32 %v4099_v7, %v5797_v44 }
0x149e   :  { %v4091_v55 = vpop.permute.xlu0 %4090  ;;  %v4075_v24 = vpop.permute.xlu1 %4074  ;;  %v4135_v20 = vpack.c.bf16 %v4103_v56, %v4087_v15 }
0x149f   :  { %v4100_v52 = vsel %vm500_vm10, %v4091_v55, %v4093_v25  ;;  %v4084_v22 = vsel %vm467_vm9, %v4075_v24, %v4077_v32 }
0x14a0   :  { %v4102_v40 = vmul.f32 %v4100_v52, %v5825_v33  ;;  %v4086_v31 = vmul.f32 %v4084_v22, %v5811_v26  ;;  %4164 = vmatprep.subr.bf16.mxu0 %v4135_v20  ;;  %v7614_v52 = vld [vmem:[%s5281_s9 + $0x28] ss:$0 sm:$0xff] }
0x14a2   :  { %v4134_v4 = vpack.c.bf16 %v4102_v40, %v4086_v31  ;;  %v4097_v35 = vpop.permute.xlu0 %4096  ;;  %v4081_v29 = vpop.permute.xlu1 %4080  ;;  %v7618_v40 = vld [vmem:[%s5281_s9 + $0x30] ss:$0 sm:$0xff] }
0x14a3   :  { %v4098_v11 = vsel %vm500_vm10, %v4095_v5, %v4097_v35  ;;  %v4101_v51 = vsel %vm500_vm10, %v4097_v35, %v4091_v55  ;;  %v4082_v59 = vsel %vm467_vm9, %v4079_v37, %v4081_v29  ;;  %v4085_v2 = vsel %vm467_vm9, %v4081_v29, %v4075_v24  ;;  %v7610_v24 = vld [vmem:[%s5281_s9 + $0x38] ss:$0 sm:$0xff]  ;;  %s7951_s9 = sld [smem:[#allocation27_spill]] }
0x14a4   :  { %v4104_v34 = vmul.f32 %v4098_v11, %v5815_v28  ;;  %v4105_v9 = vmul.f32 %v4101_v51, %v5829_v36  ;;  %v4088_v60 = vmul.f32 %v4082_v59, %v5807_v58  ;;  %v4089_v41 = vmul.f32 %v4085_v2, %v7932_v10  ;;  %4165 = vmatpush1.bf16.msra.mxu0 %v4134_v4  ;;  %v4142_v59 = vld [vmem:[%s7949_s23] sm:$0xf] }
0x14a6   :  { %v4136_v38 = vpack.c.bf16 %v4104_v34, %v4088_v60  ;;  %v4109_v62 = vpop.permute.xlu0 %4108  ;;  %v4107_v50 = vpop.permute.xlu1 %4106  ;;  %v4137_v32 = vpack.c.bf16 %v4105_v9, %v4089_v41 }
0x14a7   :  { %v4116_v37 = vsel %vm533_vm11, %v4107_v50, %v4109_v62 }
0x14a8   :  { %v4118_v45 = vmul.f32 %v7600_v39, %v4116_v37  ;;  %4205 = vmatprep.subr.bf16.mxu1 %v4137_v32 }
0x14a9   :  { %4206 = vmatpush1.bf16.msra.mxu1 %v4136_v38 }
0x14aa   :  { %v4113_v5 = vpop.permute.xlu0 %4112  ;;  %v4111_v25 = vpop.permute.xlu1 %4110  ;;  %v4138_v55 = vpack.c.bf16 %v4118_v45, %v4118_v45 }
0x14ab   :  { %v4117_v7 = vsel %vm533_vm11, %v4113_v5, %v4107_v50  ;;  %v4114_v15 = vsel %vm533_vm11, %v4111_v25, %v4113_v5  ;;  %v4115_v56 = vsel %vm533_vm11, %v4109_v62, %v4111_v25 }
0x14ac   :  { %v4121_v20 = vmul.f32 %v7610_v24, %v4117_v7  ;;  %v4119_v22 = vmul.f32 %v7614_v52, %v4115_v56  ;;  %v4120_v31 = vmul.f32 %v7618_v40, %v4114_v15  ;;  %v4147_v11 = vsel %vm267_vm3, %v4138_v55, 0 }
0x14ae   :  { %v4141_v4 = vpack.c.bf16 %v4121_v20, %v4121_v20  ;;  %v4139_v35 = vpack.c.bf16 %v4119_v22, %v4119_v22  ;;  %v4140_v29 = vpack.c.bf16 %v4120_v31, %v4120_v31  ;;  %v4278_v20 = vld [vmem:[%s7951_s9] sm:$0xff] }
0x14af   :  { %v4268_v22 = vld [vmem:[%s7952_s26] sm:$0xff] }
0x14b0   :  { %4880 = vmatprep.subr.msk.bf16.mxu0 %vm267_vm3, %v4139_v35  ;;  %4882 = vmatprep.subr.msk.bf16.mxu1 %vm267_vm3, %v4141_v4  ;;  %v4153_v51 = vsel %vm267_vm3, %v4140_v29, 0 }
0x14b1   :  { %4167 = vmatpush1.bf16.msra.mxu0 %v4147_v11  ;;  %4208 = vmatpush1.bf16.msra.mxu1 %v4153_v51 }
0x14b4   :  { %4881 = vmatmul.mubr.msk.bf16.vlgmr.msra.gmra.mrb[48].mxu0 %vm7946_vm13, %v4142_v59  ;;  %4883 = vmatmul.mubr.msk.bf16.vlgmr.msra.gmra.mrb[48].mxu1 %vm7950_vm14, %v4142_v59 }
0x14b5   :  { %4500 = vmatprep.mubr.bf16.mxu0 %v7936_v8  ;;  %4541 = vmatprep.mubr.bf16.mxu1 %v7936_v8 }
0x1587   :  { %v4192_v2 = vpop.f32.mrb[48].mxu0  ;;  %v4233_v34 = vpop.f32.mrb[48].mxu1 }
0x1588   :  { %v4246_v9 = vmul.f32 %v4192_v2, %v4192_v2  ;;  %v4194_v60 = vpop.f32.mrb[49].mxu0  ;;  %v4235_v41 = vpop.f32.mrb[49].mxu1  ;;  %v4248_v38 = vmul.f32 %v4233_v34, %v4233_v34 }
0x1589   :  { %v4240_v62 = vadd.f32 %v4194_v60, %v4192_v2  ;;  %v4247_v50 = vmul.f32 %v4194_v60, %v4194_v60  ;;  %v4196_v32 = vpop.f32.mrb[50].mxu0  ;;  %v4237_v37 = vpop.f32.mrb[50].mxu1  ;;  %v4249_v56 = vmul.f32 %v4235_v41, %v4235_v41 }
0x158a   :  { %v4197_v45 = vpop.f32.mrb[51].mxu0  ;;  %v4238_v5 = vpop.f32.mrb[51].mxu1 }
0x158b   :  { %v4250_v25 = vadd.f32 %v4247_v50, %v4246_v9  ;;  %v4241_v7 = vadd.f32 %v4240_v62, %v4233_v34 }
0x158d   :  { %v4242_v15 = vadd.f32 %v4241_v7, %v4235_v41  ;;  %v4251_v55 = vadd.f32 %v4250_v25, %v4248_v38 }
0x158f   :  { %4243 = vadd.xlane.f32.xlu1 %v4242_v15  ;;  %v4252_v8 = vadd.f32 %v4251_v55, %v4249_v56 }
0x1591   :  { %4253 = vadd.xlane.f32.xlu0 %v4252_v8 }
0x15a0   :  { %4281 = vperm.xlu1 %5037, %v4278_v20  }
0x15a7   :  { %4271 = vperm.xlu0 %5036, %v4268_v22  }
0x161c   :  { %v4244_v31 = vpop.xlane.xlu1 %4243 }
0x161d   :  { %v4245_v4 = vmul.f32 0.001953125, %v4244_v31 }
0x161e   :  { %v4254_v35 = vpop.xlane.xlu0 %4253 }
0x161f   :  { %v4255_v29 = vmul.f32 0.001953125, %v4254_v35  ;;  %v4256_v11 = vmul.f32 %v4245_v4, %v4245_v4  ;;  %v4258_v9 = vsub.f32 %v4192_v2, %v4245_v4  ;;  %v4259_v62 = vsub.f32 %v4194_v60, %v4245_v4 }
0x1620   :  { %v4260_v50 = vsub.f32 %v4233_v34, %v4245_v4  ;;  %v4261_v32 = vsub.f32 %v4235_v41, %v4245_v4  ;;  %v4282_v20 = vpop.permute.xlu1 %4281 }
0x1621   :  { %v4257_v51 = vsub.f32 %v4255_v29, %v4256_v11 }
0x1623   :  { %v4262_v59 = vadd.f32 1e-05, %v4257_v51 }
0x1625   :  { %5118 = vrsqrt.f32 %v4262_v59 }
0x1626   :  { %v4272_v7 = vpop.permute.xlu0 %4271 }
0x162f   :  { %v5119_v38 = vpop.eup %5118 }
0x1630   :  { %v4264_v37 = vmul.f32 %v5119_v38, %v4258_v9  ;;  %v4265_v45 = vmul.f32 %v5119_v38, %v4259_v62  ;;  %v4266_v5 = vmul.f32 %v5119_v38, %v4260_v50  ;;  %v4267_v25 = vmul.f32 %v5119_v38, %v4261_v32  ;;  %v7953_v9 = vld [vmem:[#allocation40_spill] sm:$0xff] }
0x1632   :  { %v4274_v15 = vmul.f32 %v4272_v7, %v4264_v37  ;;  %v4275_v56 = vmul.f32 %v4272_v7, %v4265_v45  ;;  %v4276_v55 = vmul.f32 %v4272_v7, %v4266_v5  ;;  %v4277_v8 = vmul.f32 %v4272_v7, %v4267_v25 }
0x1634   :  { %v4284_v22 = vadd.f32 %v4282_v20, %v4274_v15  ;;  %v4285_v31 = vadd.f32 %v4282_v20, %v4275_v56  ;;  %v4286_v35 = vadd.f32 %v4282_v20, %v4276_v55  ;;  %v4287_v29 = vadd.f32 %v4282_v20, %v4277_v8 }
0x1636   :  { %vm4288_vm1 = vcmp.gt.f32.partialorder %v4284_v22, 0.0  ;;  %vm4289_vm2 = vcmp.gt.f32.partialorder %v4285_v31, 0.0  ;;  %v4292_v2 = vmul.f32 0.2, %v4284_v22  ;;  %v4293_v34 = vmul.f32 0.2, %v4285_v31 }
0x1637   :  { %v4294_v60 = vmul.f32 0.2, %v4286_v35  ;;  %v4295_v41 = vmul.f32 0.2, %v4287_v29  ;;  %vm4290_vm15 = vcmp.gt.f32.partialorder %v4286_v35, 0.0  ;;  %vm4291_vm13 = vcmp.gt.f32.partialorder %v4287_v29, 0.0 }
0x1638   :  { %v7632_v4 = vsel %vm4288_vm1, %v4284_v22, %v4292_v2  ;;  %v7634_v11 = vsel %vm4289_vm2, %v4285_v31, %v4293_v34 }
0x1639   :  { %4302 = vrot.lane.b32.xlu0 %v7634_v11, %s5255_s5  ;;  %4300 = vrot.lane.b32.xlu1 %v7632_v4, %s5255_s5  ;;  %v7640_v51 = vsel %vm4290_vm15, %v4286_v35, %v4294_v60  ;;  %v7642_v59 = vsel %vm4291_vm13, %v4287_v29, %v4295_v41 }
0x163d   :  { %4306 = vrot.lane.b32.xlu0 %v7642_v59, %s5255_s5  ;;  %4304 = vrot.lane.b32.xlu1 %v7640_v51, %s5255_s5  ;;  %s5264_s5 = smov [#allocation4]  }
0x1641   :  { %4318 = vrot.lane.b32.xlu0 %v7634_v11, %s5254_s0  ;;  %4316 = vrot.lane.b32.xlu1 %v7632_v4, %s5254_s0 }
0x1645   :  { %4322 = vrot.lane.b32.xlu0 %v7642_v59, %s5254_s0  ;;  %4320 = vrot.lane.b32.xlu1 %v7640_v51, %s5254_s0  ;;  %s7954_s0 = sld [smem:[#allocation19_spill]] }
0x1649   :  { %4334 = vrot.lane.b32.xlu0 %v7634_v11, %s5256_s28  ;;  %4332 = vrot.lane.b32.xlu1 %v7632_v4, %s5256_s28 }
0x164d   :  { %4338 = vrot.lane.b32.xlu0 %v7642_v59, %s5256_s28  ;;  %4336 = vrot.lane.b32.xlu1 %v7640_v51, %s5256_s28  ;;  %s4684_s28 = sshll.u32 %s5264_s5, 4  ;;  %s4685_s28 = int_to_ptr.vmem [resolvable:$true] %s4684_s28 }
0x164e   :  { %p5153_p1 = scmp.lt.s32.totalorder %s4685_s28, %s4685_s28 }
0x1651   :  { %4350 = vrot.lane.b32.xlu0 %v7634_v11, %s5257_s1  ;;  %4348 = vrot.lane.b32.xlu1 %v7632_v4, %s5257_s1 }
0x1655   :  { %4354 = vrot.lane.b32.xlu0 %v7642_v59, %s5257_s1  ;;  %4352 = vrot.lane.b32.xlu1 %v7640_v51, %s5257_s1  ;;  %s5265_s1 = smov [#allocation2]  }
0x1659   :  { %4370 = vrot.lane.b32.xlu0 %v7634_v11, %s5258_s2  ;;  %4368 = vrot.lane.b32.xlu1 %v7632_v4, %s5258_s2 }
0x165d   :  { %4374 = vrot.lane.b32.xlu0 %v7642_v59, %s5258_s2  ;;  %4372 = vrot.lane.b32.xlu1 %v7640_v51, %s5258_s2  ;;  %s4674_s2 = sshll.u32 %s5265_s1, 4  ;;  %s4675_s2 = int_to_ptr.vmem [resolvable:$true] %s4674_s2 }
0x1661   :  { %4386 = vrot.lane.b32.xlu0 %v7634_v11, %s5259_s7  ;;  %4384 = vrot.lane.b32.xlu1 %v7632_v4, %s5259_s7 }
0x1665   :  { %4390 = vrot.lane.b32.xlu0 %v7642_v59, %s5259_s7  ;;  %4388 = vrot.lane.b32.xlu1 %v7640_v51, %s5259_s7  ;;  %s5148_s7 = scalar_lea.vmem %s4685_s28, 32 }
0x1666   :  { %p5149_p0 = scmp.ne.s32.totalorder %s4685_s28, %s5148_s7  ;;  %p5154_p2 = scmp.lt.s32.totalorder %s5148_s7, %s5148_s7 }
0x1668   :  { %p5155_p3 = por %p5154_p2, %p5153_p1 }
0x1669   :  { %4402 = vrot.lane.b32.xlu0 %v7634_v11, %s5260_s10  ;;  %4400 = vrot.lane.b32.xlu1 %v7632_v4, %s5260_s10 }
0x166a   :  { %p5156_p4 = pnand %p5155_p3, %p5149_p0 }
0x166d   :  { %4406 = vrot.lane.b32.xlu0 %v7642_v59, %s5260_s10  ;;  %4404 = vrot.lane.b32.xlu1 %v7640_v51, %s5260_s10 }
0x1671   :  { %4418 = vrot.lane.b32.xlu0 %v7634_v11, %s5262_s11  ;;  %4416 = vrot.lane.b32.xlu1 %v7632_v4, %s5262_s11 }
0x1675   :  { %4422 = vrot.lane.b32.xlu0 %v7642_v59, %s5262_s11  ;;  %4420 = vrot.lane.b32.xlu1 %v7640_v51, %s5262_s11 }
0x1679   :  { %2682 = vrot.lane.b32.xlu1 %v7953_v9, %s5263_s3 }
0x16ab   :  { %v4303_v62 = vpop.permute.xlu0 %4302  ;;  %v4301_v50 = vpop.permute.xlu1 %4300 }
0x16ac   :  { %v4310_v37 = vsel %vm282_vm4, %v4301_v50, %v4303_v62 }
0x16ad   :  { %v4313_v15 = vmul.f32 %v4310_v37, %v5615_v61 }
0x16af   :  { %v4307_v32 = vpop.permute.xlu0 %4306  ;;  %v4305_v38 = vpop.permute.xlu1 %4304 }
0x16b0   :  { %v4311_v25 = vsel %vm282_vm4, %v4307_v32, %v4301_v50  ;;  %v4309_v56 = vsel %vm282_vm4, %v4303_v62, %v4305_v38  ;;  %v4308_v8 = vsel %vm282_vm4, %v4305_v38, %v4307_v32  ;;  %vm7955_vm4 = vmmov %vm7950_vm14 }
0x16b1   :  { %v4312_v20 = vmul.f32 %v4311_v25, %v5638_v17  ;;  %v4314_v29 = vmul.f32 %v4309_v56, %v5656_v23 }
0x16b3   :  { %v4319_v45 = vpop.permute.xlu0 %4318  ;;  %v4317_v5 = vpop.permute.xlu1 %4316 }
0x16b4   :  { %v4326_v7 = vsel %vm315_vm5, %v4317_v5, %v4319_v45 }
0x16b5   :  { %v4329_v55 = vmul.f32 %v4326_v7, %v7939_v49  ;;  %v4315_v49 = vmul.f32 %v4308_v8, %v5646_v19 }
0x16b7   :  { %v4323_v22 = vpop.permute.xlu0 %4322  ;;  %v4321_v31 = vpop.permute.xlu1 %4320  ;;  %v4433_v35 = vpack.c.bf16 %v4329_v55, %v4313_v15 }
0x16b8   :  { %v4327_v2 = vsel %vm315_vm5, %v4323_v22, %v4317_v5  ;;  %v4324_v61 = vsel %vm315_vm5, %v4321_v31, %v4323_v22  ;;  %v4325_v34 = vsel %vm315_vm5, %v4319_v45, %v4321_v31  ;;  %vm7956_vm5 = vmmov %vm7955_vm4 }
0x16b9   :  { %v4328_v60 = vmul.f32 %v4327_v2, %v5642_v18  ;;  %v4330_v17 = vmul.f32 %v4325_v34, %v7940_v14  ;;  %v4331_v41 = vmul.f32 %v4324_v61, %v5652_v21  ;;  %4468 = vmatprep.subr.bf16.mxu0 %v4433_v35 }
0x16bb   :  { %v4432_v9 = vpack.c.bf16 %v4328_v60, %v4312_v20  ;;  %v4434_v23 = vpack.c.bf16 %v4330_v17, %v4314_v29  ;;  %v4335_v62 = vpop.permute.xlu0 %4334  ;;  %v4333_v50 = vpop.permute.xlu1 %4332  ;;  %v4435_v32 = vpack.c.bf16 %v4331_v41, %v4315_v49 }
0x16bc   :  { %v4342_v19 = vsel %vm348_vm6, %v4333_v50, %v4335_v62 }
0x16bd   :  { %4469 = vmatpush1.bf16.msra.mxu0 %v4432_v9  ;;  %4509 = vmatprep.subr.bf16.mxu1 %v4435_v32  ;;  %v4345_v5 = vmul.f32 %v4342_v19, %v5682_v47 }
0x16be   :  { %4510 = vmatpush1.bf16.msra.mxu1 %v4434_v23 }
0x16bf   :  { %v4339_v38 = vpop.permute.xlu0 %4338  ;;  %v4337_v37 = vpop.permute.xlu1 %4336 }
0x16c0   :  { %v4343_v14 = vsel %vm348_vm6, %v4339_v38, %v4333_v50  ;;  %v4341_v25 = vsel %vm348_vm6, %v4335_v62, %v4337_v37  ;;  %v4340_v15 = vsel %vm348_vm6, %v4337_v37, %v4339_v38 }
0x16c1   :  { %v4344_v56 = vmul.f32 %v4343_v14, %v5696_v1  ;;  %v4346_v22 = vmul.f32 %v4341_v25, %v5700_v3 }
0x16c3   :  { %v4351_v45 = vpop.permute.xlu0 %4350  ;;  %v4349_v18 = vpop.permute.xlu1 %4348 }
0x16c4   :  { %v4358_v21 = vsel %vm381_vm7, %v4349_v18, %v4351_v45 }
0x16c5   :  { %v4361_v7 = vmul.f32 %v4358_v21, %v5686_v48  ;;  %v4347_v48 = vmul.f32 %v4340_v15, %v5710_v12 }
0x16c7   :  { %v4355_v55 = vpop.permute.xlu0 %4354  ;;  %v4353_v8 = vpop.permute.xlu1 %4352  ;;  %v4437_v20 = vpack.c.bf16 %v4361_v7, %v4345_v5 }
0x16c8   :  { %v4359_v31 = vsel %vm381_vm7, %v4355_v55, %v4349_v18  ;;  %v4356_v47 = vsel %vm381_vm7, %v4353_v8, %v4355_v55  ;;  %v4357_v35 = vsel %vm381_vm7, %v4351_v45, %v4353_v8 }
0x16c9   :  { %v4360_v29 = vmul.f32 %v4359_v31, %v5704_v6  ;;  %v4362_v1 = vmul.f32 %v4357_v35, %v5714_v13  ;;  %v4363_v2 = vmul.f32 %v4356_v47, %v5718_v16  ;;  %4470 = vmatprep.subr.bf16.mxu0 %v4437_v20  ;;  %v4366_v6 = vmul.f32 %v7640_v51, %v5749_v46 }
0x16ca   :  { %v4365_v13 = vmul.f32 %v7634_v11, %v5726_v27  ;;  %v4367_v27 = vmul.f32 %v7642_v59, %v5757_v54 }
0x16cb   :  { %v4436_v61 = vpack.c.bf16 %v4360_v29, %v4344_v56  ;;  %v4438_v3 = vpack.c.bf16 %v4362_v1, %v4346_v22  ;;  %v4371_v34 = vpop.permute.xlu0 %4370  ;;  %v4369_v49 = vpop.permute.xlu1 %4368  ;;  %v4439_v60 = vpack.c.bf16 %v4363_v2, %v4347_v48 }
0x16cc   :  { %v4378_v17 = vsel %vm434_vm8, %v4369_v49, %v4371_v34 }
0x16cd   :  { %4471 = vmatpush1.bf16.msra.mxu0 %v4436_v61  ;;  %4511 = vmatprep.subr.bf16.mxu1 %v4439_v60  ;;  %v4380_v16 = vmul.f32 %v4378_v17, %v5768_v63  ;;  %v4364_v63 = vmul.f32 %v7632_v4, %v5753_v53 }
0x16ce   :  { %4512 = vmatpush1.bf16.msra.mxu1 %v4438_v3 }
0x16cf   :  { %v4375_v41 = vpop.permute.xlu0 %4374  ;;  %v4373_v12 = vpop.permute.xlu1 %4372  ;;  %v4440_v45 = vpack.c.bf16 %v4380_v16, %v4364_v63 }
0x16d0   :  { %v4379_v9 = vsel %vm434_vm8, %v4375_v41, %v4369_v49  ;;  %v4376_v23 = vsel %vm434_vm8, %v4373_v12, %v4375_v41  ;;  %v4377_v62 = vsel %vm434_vm8, %v4371_v34, %v4373_v12 }
0x16d1   :  { %v4383_v50 = vmul.f32 %v4379_v9, %v5772_v0  ;;  %v4381_v32 = vmul.f32 %v4377_v62, %v5733_v30  ;;  %v4382_v46 = vmul.f32 %v4376_v23, %v5763_v43 }
0x16d3   :  { %v4442_v11 = vpack.c.bf16 %v4382_v46, %v4366_v6  ;;  %v4387_v51 = vpop.permute.xlu0 %4386  ;;  %v4385_v38 = vpop.permute.xlu1 %4384  ;;  %v4441_v37 = vpack.c.bf16 %v4381_v32, %v4365_v13  ;;  %v4443_v19 = vpack.c.bf16 %v4383_v50, %v4367_v27 }
0x16d4   :  { %v4394_v14 = vsel %vm467_vm9, %v4385_v38, %v4387_v51 }
0x16d5   :  { %4472 = vmatprep.subr.bf16.mxu0 %v4441_v37  ;;  %4513 = vmatprep.subr.bf16.mxu1 %v4443_v19  ;;  %v4396_v31 = vmul.f32 %v4394_v14, %v5811_v26 }
0x16d6   :  { %4473 = vmatpush1.bf16.msra.mxu0 %v4440_v45  ;;  %4514 = vmatpush1.bf16.msra.mxu1 %v4442_v11 }
0x16d7   :  { %v4391_v0 = vpop.permute.xlu0 %4390  ;;  %v4389_v30 = vpop.permute.xlu1 %4388 }
0x16d8   :  { %v4395_v54 = vsel %vm467_vm9, %v4391_v0, %v4385_v38  ;;  %v4393_v53 = vsel %vm467_vm9, %v4387_v51, %v4389_v30  ;;  %v4392_v59 = vsel %vm467_vm9, %v4389_v30, %v4391_v0 }
0x16d9   :  { %v4399_v21 = vmul.f32 %v4395_v54, %v7932_v10  ;;  %v4397_v5 = vmul.f32 %v4393_v53, %v5793_v42  ;;  %v4398_v20 = vmul.f32 %v4392_v59, %v5807_v58 }
0x16db   :  { %v4403_v18 = vpop.permute.xlu0 %4402  ;;  %v4401_v43 = vpop.permute.xlu1 %4400 }
0x16dc   :  { %v4410_v4 = vsel %vm500_vm10, %v4401_v43, %v4403_v18 }
0x16dd   :  { %v4412_v15 = vmul.f32 %v4410_v4, %v5825_v33 }
0x16df   :  { %v4407_v25 = vpop.permute.xlu0 %4406  ;;  %v4405_v7 = vpop.permute.xlu1 %4404  ;;  %v4444_v1 = vpack.c.bf16 %v4412_v15, %v4396_v31 }
0x16e0   :  { %v4411_v56 = vsel %vm500_vm10, %v4407_v25, %v4401_v43  ;;  %v4408_v55 = vsel %vm500_vm10, %v4405_v7, %v4407_v25  ;;  %v4409_v8 = vsel %vm500_vm10, %v4403_v18, %v4405_v7 }
0x16e1   :  { %v4415_v22 = vmul.f32 %v4411_v56, %v5829_v36  ;;  %v4413_v10 = vmul.f32 %v4409_v8, %v5797_v44  ;;  %v4414_v42 = vmul.f32 %v4408_v55, %v5815_v28 }
0x16e3   :  { %v4446_v33 = vpack.c.bf16 %v4414_v42, %v4398_v20  ;;  %v4419_v47 = vpop.permute.xlu0 %4418  ;;  %v4417_v35 = vpop.permute.xlu1 %4416  ;;  %v4445_v48 = vpack.c.bf16 %v4413_v10, %v4397_v5  ;;  %v4447_v29 = vpack.c.bf16 %v4415_v22, %v4399_v21 }
0x16e4   :  { %v4426_v2 = vsel %vm533_vm11, %v4417_v35, %v4419_v47 }
0x16e5   :  { %v4428_v61 = vmul.f32 %v7600_v39, %v4426_v2  ;;  %4474 = vmatprep.subr.bf16.mxu0 %v4445_v48  ;;  %4515 = vmatprep.subr.bf16.mxu1 %v4447_v29 }
0x16e6   :  { %4475 = vmatpush1.bf16.msra.mxu0 %v4444_v1  ;;  %4516 = vmatpush1.bf16.msra.mxu1 %v4446_v33 }
0x16e7   :  { %v4423_v44 = vpop.permute.xlu0 %4422  ;;  %v4421_v58 = vpop.permute.xlu1 %4420  ;;  %v4448_v3 = vpack.c.bf16 %v4428_v61, %v4428_v61 }
0x16e8   :  { %v4427_v26 = vsel %vm533_vm11, %v4423_v44, %v4417_v35  ;;  %v4424_v28 = vsel %vm533_vm11, %v4421_v58, %v4423_v44  ;;  %v4425_v36 = vsel %vm533_vm11, %v4419_v47, %v4421_v58 }
0x16e9   :  { %v4431_v34 = vmul.f32 %v7610_v24, %v4427_v26  ;;  %v4429_v39 = vmul.f32 %v7614_v52, %v4425_v36  ;;  %v4430_v49 = vmul.f32 %v7618_v40, %v4424_v28  ;;  %v4457_v57 = vsel %vm267_vm3, %v4448_v3, 0  ;;  %v4452_v24 = vld [vmem:[%s7954_s0] sm:$0x3] }
0x16eb   :  { %v4451_v60 = vpack.c.bf16 %v4431_v34, %v4431_v34  ;;  %v4449_v17 = vpack.c.bf16 %v4429_v39, %v4429_v39  ;;  %v4450_v41 = vpack.c.bf16 %v4430_v49, %v4430_v49  ;;  %v2683_v6 = vpop.permute.xlu1 %2682 }
0x16ec   :  { %2685 = vst.msk [vmem:[#allocation4] sm:$0x3] %vm2679_vm12, %v2683_v6 }
0x16ed   :  { %4884 = vmatprep.subr.msk.bf16.mxu0 %vm267_vm3, %v4449_v17  ;;  %4886 = vmatprep.subr.msk.bf16.mxu1 %vm267_vm3, %v4451_v60  ;;  %v4463_v12 = vsel %vm267_vm3, %v4450_v41, 0 }
0x16ee   :  { %4477 = vmatpush1.bf16.msra.mxu0 %v4457_v57  ;;  %4518 = vmatpush1.bf16.msra.mxu1 %v4463_v12 }
0x16f1   :  { %4885 = vmatmul.mubr.msk.bf16.vlgmr.msra.gmra.mrb[52].mxu0 %vm7955_vm4, %v4452_v24  ;;  %4887 = vmatmul.mubr.msk.bf16.vlgmr.msra.gmra.mrb[52].mxu1 %vm7956_vm5, %v4452_v24 }
0x16f2   :  { %5159 = shalt.err (!%p5156_p4)
}
0x16f3   :  { %s5160_s10 = scalar_lea.hbm %s5451_s12, 32 }
0x16f4   :  { %p5161_p5 = scmp.ne.s32.totalorder %s5451_s12, %s5160_s10  ;;  %p5164_p6 = scmp.lt.u32.totalorder %s5160_s10, %s5451_s12 }
0x16f6   :  { %p5166_p7 = pnand %p5164_p6, %p5161_p5 }
0x16f8   :  { %5169 = shalt.err (!%p5166_p7)
}
0x16f9   :  { %4687 = dma.vmem_to_hbm [thread:$0]  %s4685_s28, 32, %s5451_s12, [#allocation5]  }
0x16fa   :  { %s5170_s11 = scalar_lea.vmem %s4675_s2, 32  ;;  %p5175_p9 = scmp.lt.s32.totalorder %s4675_s2, %s4675_s2 }
0x16fb   :  { %p5171_p8 = scmp.ne.s32.totalorder %s4675_s2, %s5170_s11  ;;  %p5176_p10 = scmp.lt.s32.totalorder %s5170_s11, %s5170_s11 }
0x16fd   :  { %p5177_p11 = por %p5176_p10, %p5175_p9 }
0x16ff   :  { %p5178_p12 = pnand %p5177_p11, %p5171_p8 }
0x1701   :  { %5181 = shalt.err (!%p5178_p12)
}
0x1702   :  { %s5182_s13 = scalar_lea.hbm %s5446_s6, 32 }
0x1703   :  { %p5183_p13 = scmp.ne.s32.totalorder %s5446_s6, %s5182_s13  ;;  %p5186_p0 = scmp.lt.u32.totalorder %s5182_s13, %s5446_s6 }
0x1705   :  { %p5188_p1 = pnand %p5186_p0, %p5183_p13 }
0x1707   :  { %5191 = shalt.err (!%p5188_p1)
}
0x1708   :  { %4677 = dma.vmem_to_hbm [thread:$0]  %s4675_s2, 32, %s5446_s6, [#allocation3]  }
0x1709   :  { %s5266_s17 = smov [#allocation6]  }
0x170a   :  { %s4694_s12 = sshll.u32 %s5266_s17, 4  ;;  %s4695_s12 = int_to_ptr.vmem [resolvable:$true] %s4694_s12 }
0x170b   :  { %s5192_s21 = scalar_lea.vmem %s4695_s12, 32  ;;  %p5197_p3 = scmp.lt.s32.totalorder %s4695_s12, %s4695_s12 }
0x170c   :  { %p5193_p2 = scmp.ne.s32.totalorder %s4695_s12, %s5192_s21  ;;  %p5198_p4 = scmp.lt.s32.totalorder %s5192_s21, %s5192_s21 }
0x170e   :  { %p5199_p5 = por %p5198_p4, %p5197_p3 }
0x1710   :  { %p5200_p6 = pnand %p5199_p5, %p5193_p2 }
0x1712   :  { %5203 = shalt.err (!%p5200_p6)
}
0x1713   :  { %s5204_s25 = scalar_lea.hbm %s5456_s27, 32 }
0x1714   :  { %p5205_p7 = scmp.ne.s32.totalorder %s5456_s27, %s5204_s25  ;;  %p5208_p8 = scmp.lt.u32.totalorder %s5204_s25, %s5456_s27 }
0x1716   :  { %p5210_p9 = pnand %p5208_p8, %p5205_p7 }
0x1718   :  { %5213 = shalt.err (!%p5210_p9)
}
0x1719   :  { %4697 = dma.vmem_to_hbm [thread:$0]  %s4695_s12, 32, %s5456_s27, [#allocation5]   ;;  %v5267_v18 = vmov 1983009808   ;;  %v7957_v56 = vld [vmem:[#allocation28_spill] sm:$0xff] }
0x171a   :  { %v4631_v43 = vunpack.c.l.s4 %v5267_v18 }
0x171c   :  { %v4632_v54 = vunpack.c.0.s8 %v4631_v43 }
0x171e   :  { %v4635_v55 = vsub.s32 %v4632_v54, %v7957_v56 }
0x17c4   :  { %v4502_v52 = vpop.f32.mrb[52].mxu0  ;;  %v4543_v40 = vpop.f32.mrb[52].mxu1 }
0x17c5   :  { %v4888_v13 = vmul.f32 -1.442695, %v4502_v52  ;;  %v4890_v16 = vmul.f32 -1.442695, %v4543_v40  ;;  %v4504_v9 = vpop.f32.mrb[53].mxu0  ;;  %v4545_v23 = vpop.f32.mrb[53].mxu1 }
0x17c6   :  { %v4889_v62 = vmul.f32 -1.442695, %v4504_v9  ;;  %v4891_v50 = vmul.f32 -1.442695, %v4545_v23  ;;  %v4506_v32 = vpop.f32.mrb[54].mxu0  ;;  %v4547_v46 = vpop.f32.mrb[54].mxu1 }
0x17c7   :  { %5120 = vpow2.f32 %v4888_v13  ;;  %v4507_v27 = vpop.f32.mrb[55].mxu0  ;;  %v4548_v63 = vpop.f32.mrb[55].mxu1 }
0x17c8   :  { %5122 = vpow2.f32 %v4890_v16 }
0x17c9   :  { %5124 = vpow2.f32 %v4889_v62 }
0x17ca   :  { %5126 = vpow2.f32 %v4891_v50 }
0x17d1   :  { %v5121_v11 = vpop.eup %5120 }
0x17d2   :  { %v5123_v51 = vpop.eup %5122  ;;  %v4562_v38 = vadd.f32 1.0, %v5121_v11 }
0x17d3   :  { %v5125_v37 = vpop.eup %5124  ;;  %v4564_v19 = vadd.f32 1.0, %v5123_v51 }
0x17d4   :  { %v5127_v45 = vpop.eup %5126  ;;  %5128 = vrcp.f32 %v4562_v38  ;;  %v4563_v0 = vadd.f32 1.0, %v5125_v37 }
0x17d5   :  { %5130 = vrcp.f32 %v4564_v19  ;;  %v4565_v30 = vadd.f32 1.0, %v5127_v45 }
0x17d6   :  { %5132 = vrcp.f32 %v4563_v0 }
0x17d7   :  { %5134 = vrcp.f32 %v4565_v30 }
0x17de   :  { %v5129_v53 = vpop.eup %5128 }
0x17df   :  { %v5131_v4 = vpop.eup %5130  ;;  %v4576_v59 = vrot.slane %v5129_v53, 1  ;;  %v4580_v14 = vrot.slane %v5129_v53, 2  ;;  %v4584_v21 = vrot.slane %v5129_v53, 3 }
0x17e0   :  { %v5133_v5 = vpop.eup %5132  ;;  %v4596_v25 = vrot.slane %v5131_v4, 7  ;;  %v4894_v7 = vrot.slane %v5131_v4, 9  ;;  %v4896_v15 = vrot.slane %v5131_v4, 10 }
0x17e1   :  { %v5135_v8 = vpop.eup %5134  ;;  %v4614_v20 = vsel %vm252_vm0, %v4576_v59, %v5131_v4  ;;  %v4577_v22 = vrot.slane %v5133_v5, 1  ;;  %v4581_v10 = vrot.slane %v5133_v5, 2  ;;  %v4585_v42 = vrot.slane %v5133_v5, 3 }
0x17e2   :  { %v4612_v31 = vsel %vm252_vm0, %v5129_v53, %v4596_v25  ;;  %v4616_v33 = vsel %vm252_vm0, %v4580_v14, %v4894_v7  ;;  %v4618_v47 = vsel %vm252_vm0, %v4584_v21, %v4896_v15  ;;  %v4597_v35 = vrot.slane %v5135_v8, 7 }
0x17e3   :  { %v4895_v48 = vrot.slane %v5135_v8, 9  ;;  %v4897_v29 = vrot.slane %v5135_v8, 10  ;;  %v4615_v1 = vsel %vm252_vm0, %v4577_v22, %v5135_v8 }
0x17e4   :  { %v4613_v2 = vsel %vm252_vm0, %v5133_v5, %v4597_v35  ;;  %v4629_v61 = vcombine.low %v4614_v20, %v4615_v1 }
0x17e5   :  { %v4617_v44 = vsel %vm252_vm0, %v4581_v10, %v4895_v48  ;;  %v4619_v58 = vsel %vm252_vm0, %v4585_v42, %v4897_v29  ;;  %v4628_v26 = vcombine.low %v4612_v31, %v4613_v2 }
0x17e6   :  { %v4643_v28 = vrot.slane %v4629_v61, %v4635_v55  ;;  %v4645_v36 = vcombine.low %v4616_v33, %v4617_v44  ;;  %v4646_v3 = vcombine.low %v4618_v47, %v4619_v58 }
0x17e7   :  { %v4636_v34 = vrot.slane %v4628_v26, %v4635_v55 }
0x17e8   :  { %v4653_v39 = vrot.slane %v4645_v36, %v4635_v55  ;;  %v4660_v49 = vrot.slane %v4646_v3, %v4635_v55 }
0x17e9   :  { %v4644_v60 = vcombine.low %v4636_v34, %v4643_v28 }
0x17ea   :  { %v4661_v17 = vcombine.low %v4653_v39, %v4660_v49 }
0x17eb   :  { %4664 = vst [vmem:[%s5441_s4] sm:$0xff] %v4644_v60 }
0x17ec   :  { %4665 = vst [vmem:[%s5441_s4 + $0x8] sm:$0xff] %v4661_v17 }
0x17ed   :  { %5214 = dma.done.wait [#allocation3], 32  }
0x17ee   :  { %5215 = vsyncadd [#allocation3], 4294967264 }
0x17ef   :  { %5216 = dma.done.wait [#allocation5], 64  }
0x17f0   :  { %5217 = vsyncadd [#allocation5], 4294967232 }
0x17f1   :  { %4709 = vsyncpa [#allocation3], 1 }
0x17f2   :  { %4710 = vsyncpa [#allocation5], 1 }

</bundles_post_ra>
